<compile_context>
chip_gen: v7x
topology: tpu7x:2x2x1
jax: 0.10.0
libtpu: 0.0.40
codegen_flags: <defaults>
</compile_context>

<pallas_src>
import functools
import math

import jax
import jax.numpy as jnp
from jax.experimental import pallas as pl
from jax.experimental.pallas import tpu as pltpu

# Fixed synthetic table grid (see TODO(synk) notes below).
NUM_ROW_CELLS = 2
NUM_COL_CELLS = 2

_VMEM_LIMIT = 4 * 1024 * 1024


# ----------------------------- fused Pallas kernel ---------------------------

def _semv2_fused_kernel(xs4_ref, w1_ref, b1_ref, w2_ref, b2_ref,
                        wn_ref, bn_ref, pos_ref,
                        w3_ref, b3_ref, w1x1_ref, b1x1_ref,
                        pool_ref, fcw_ref, fcb_ref, qkw_ref, qkb_ref,
                        logit_ref, rband_ref, cband_ref, mg_ref,
                        c1pad_ref, fpad_ref,
                        *, B, Hf, Wf, Cf, G, D, scale):
    M = B * Hf * Wf
    bf16 = jnp.bfloat16

    # ---- backbone conv1: 3x3 stride-2 conv expressed as a 2x2-tap stride-1
    # conv over the space-to-depth(4) input; the output is produced directly
    # in parity (space-to-depth(2)) layout.  vreg accumulation, no VMEM acc.
    acc = None
    for t in range(4):
        da, db = divmod(t, 2)
        patch = xs4_ref[:, da:da + Hf, db:db + Wf, :].reshape(M, -1)
        part = jnp.dot(patch, w1_ref[t], preferred_element_type=jnp.float32)
        acc = part if acc is None else acc + part
    c1s = jnp.maximum(acc + b1_ref[...], 0.0)                    # [M, 4*C1] f32

    # stage the front-zero-padded parity tensor for conv2's taps
    c1pad_ref[...] = jnp.zeros_like(c1pad_ref)
    c1pad_ref[:, 1:Hf + 1, 1:Wf + 1, :] = c1s.reshape(
        B, Hf, Wf, c1pad_ref.shape[-1])

    # ---- backbone conv2: 3x3 stride-2 conv as a 2x2-tap stride-1 conv over
    # the padded parity tensor with remapped weights.
    acc = None
    for t in range(4):
        dk, dl = divmod(t, 2)
        patch = c1pad_ref[:, dk:dk + Hf, dl:dl + Wf, :].reshape(M, -1)
        part = jnp.dot(patch.astype(bf16), w2_ref[t],
                       preferred_element_type=jnp.float32)
        acc = part if acc is None else acc + part
    c2 = jnp.maximum(acc + b2_ref[...], 0.0)                     # [M, C2] f32

    # ---- neck 1x1 conv + relu, sincos posemb fused into the epilogue
    feats = jnp.dot(c2.astype(bf16), wn_ref[...],
                    preferred_element_type=jnp.float32) + bn_ref[...]
    feats = jnp.maximum(feats, 0.0) + pos_ref[...].astype(jnp.float32)
    feats_bf = feats.astype(bf16)                                # [M, Cf]

    # stage zero-padded feats for the split heads' 3x3 conv
    fpad_ref[...] = jnp.zeros_like(fpad_ref)
    fpad_ref[:, 1:Hf + 1, 1:Wf + 1, :] = feats.reshape(B, Hf, Wf, Cf)

    # ---- fused row+col split heads: 3x3 conv (row||col hidden) -> relu ->
    # block-diagonal 1x1 conv -> logits, plus sigmoid band means (EUP/XLU).
    acc = None
    for t in range(9):
        i, j = divmod(t, 3)
        patch = fpad_ref[:, i:i + Hf, j:j + Wf, :].reshape(M, Cf)
        part = jnp.dot(patch.astype(bf16), w3_ref[t],
                       preferred_element_type=jnp.float32)
        acc = part if acc is None else acc + part
    hidden = jnp.maximum(acc + b3_ref[...], 0.0)                 # [M, 2*Cf]
    logits = jnp.dot(hidden.astype(bf16), w1x1_ref[...],
                     preferred_element_type=jnp.float32) + b1x1_ref[...]
    logits4 = logits.reshape(B, Hf, Wf, 2)
    logit_ref[...] = logits4.astype(logit_ref.dtype)

    probs = jax.nn.sigmoid(logits4)
    rband_ref[...] = jnp.mean(probs, axis=2).astype(rband_ref.dtype)  # [B,Hf,2]
    cband_ref[...] = jnp.mean(probs, axis=1).astype(cband_ref.dtype)  # [B,Wf,2]

    # ---- fused grid extractor + merge head (pooling-as-matmul, block-diag
    # over batch) -> fc(relu) -> fused q/k projection -> per-image Q K^T.
    gf = jnp.dot(pool_ref[...], feats_bf,
                 preferred_element_type=jnp.float32)             # [B*G, Cf]
    h = jnp.maximum(
        jnp.dot(gf.astype(bf16), fcw_ref[...],
                preferred_element_type=jnp.float32) + fcb_ref[...], 0.0)
    qk = jnp.dot(h.astype(bf16), qkw_ref[...],
                 preferred_element_type=jnp.float32) + qkb_ref[...]  # [B*G,2D]
    for b in range(B):
        q = qk[b * G:(b + 1) * G, :D].astype(bf16)
        k = qk[b * G:(b + 1) * G, D:].astype(bf16)
        pair = jax.lax.dot_general(q, k, (((1,), (1,)), ((), ())),
                                   preferred_element_type=jnp.float32)
        mg_ref[b, :, :] = (pair * scale).astype(mg_ref.dtype)


# ------------------------------ wrapper helpers ------------------------------

def _full_block_spec(shape):
    ndim = len(shape)

    def index_map(i):
        return (0,) * ndim

    return pl.BlockSpec(shape, index_map)


def _space_to_depth(x, s):
    B, H, W, C = x.shape
    x = x.reshape(B, H // s, s, W // s, s, C)
    x = x.transpose(0, 1, 3, 2, 4, 5)
    return x.reshape(B, H // s, W // s, s * s * C)


def _prep_input(x):
    """Pad(1) for the first 3x3 stride-2 conv, then space-to-depth by 4."""
    B, H, W, C = x.shape
    x = jnp.pad(x, ((0, 0), (1, 1), (1, 1), (0, 0)))
    Hp, Wp = H + 2, W + 2
    Hq = -(-Hp // 4) * 4
    Wq = -(-Wp // 4) * 4
    x = jnp.pad(x, ((0, 0), (0, Hq - Hp), (0, Wq - Wp), (0, 0)))
    return _space_to_depth(x, 4)                                  # [B,Hq/4,Wq/4,16C]


def _make_conv1_s2d_weights(w1, b1):
    """Remap [3,3,Cin,Cout] stride-2 weights so conv1 runs as a 2x2-tap
    stride-1 conv over the s2d-by-4 input and emits its output in parity
    (s2d-by-2) channel layout."""
    kh, kw, cin, cout = w1.shape
    K = 16 * cin
    w1s = jnp.zeros((2, 2, K, 4 * cout), w1.dtype)
    for a in range(2):
        for bb in range(2):
            for i in range(kh):
                for j in range(kw):
                    ru, cv = 2 * a + i, 2 * bb + j
                    da, u = divmod(ru, 4)
                    db, v = divmod(cv, 4)
                    kin = (u * 4 + v) * cin
                    kout = (a * 2 + bb) * cout
                    w1s = w1s.at[da, db, kin:kin + cin,
                                 kout:kout + cout].set(w1[i, j])
    b1s = jnp.tile(b1, 4)
    return w1s.reshape(4, K, 4 * cout), b1s


def _make_conv2_s2d_weights(w2):
    """Remap [3,3,Cin,Cout] stride-2 weights so conv2 runs as a 2x2-tap
    stride-1 conv over the front-zero-padded parity tensor of conv1."""
    kh, kw, cin, cout = w2.shape
    # conv tap k -> (scratch offset dk, parity a): 0->(0,1), 1->(1,0), 2->(1,1)
    kmap = {0: (0, 1), 1: (1, 0), 2: (1, 1)}
    w2s = jnp.zeros((2, 2, 4 * cin, cout), w2.dtype)
    for k in range(kh):
        for l in range(kw):
            dk, a = kmap[k]
            dl, bb = kmap[l]
            cidx = (a * 2 + bb) * cin
            w2s = w2s.at[dk, dl, cidx:cidx + cin, :].set(w2[k, l])
    return w2s.reshape(4, 4 * cin, cout)


def _sincos_posemb(H, W, C):
    """2D sinusoidal positional embedding, flattened to [H*W, C] (f32)."""
    cq = C // 4
    omega = 1.0 / (10000.0 ** (jnp.arange(cq, dtype=jnp.float32) / cq))
    y = jnp.arange(H, dtype=jnp.float32)[:, None] * omega[None, :]
    x = jnp.arange(W, dtype=jnp.float32)[:, None] * omega[None, :]
    y_emb = jnp.concatenate([jnp.sin(y), jnp.cos(y)], axis=-1)
    x_emb = jnp.concatenate([jnp.sin(x), jnp.cos(x)], axis=-1)
    pos = jnp.concatenate([
        jnp.broadcast_to(y_emb[:, None, :], (H, W, C // 2)),
        jnp.broadcast_to(x_emb[None, :, :], (H, W, C // 2)),
    ], axis=-1)
    return pos.reshape(H * W, C)


def _build_pool_matrix(Hf, Wf, R, C):
    """[R*C, Hf*Wf] averaging matrix so grid pooling runs on the MXU."""
    ch, cw = Hf // R, Wf // C
    row_cell = jnp.arange(Hf) // ch
    col_cell = jnp.arange(Wf) // cw
    cell = (row_cell[:, None] * C + col_cell[None, :]).reshape(-1)
    onehot = (jnp.arange(R * C)[:, None] == cell[None, :]).astype(jnp.float32)
    return onehot / float(ch * cw)


def _build_pool_block_diag(B, Hf, Wf, R, C):
    """Block-diagonal pooling matrix [B*G, B*Hf*Wf] (batch folded into M)."""
    p = _build_pool_matrix(Hf, Wf, R, C)
    G, HW = p.shape
    pbd = jnp.zeros((B * G, B * HW), jnp.float32)
    for b in range(B):
        pbd = pbd.at[b * G:(b + 1) * G, b * HW:(b + 1) * HW].set(p)
    return pbd


# ------------------------------ fused forward --------------------------------

def fused_forward(params, images_nhwc):
    """Single pallas_call covering backbone/neck/posemb/split/merge heads."""
    B = images_nhwc.shape[0]
    xs4 = _prep_input(images_nhwc).astype(jnp.bfloat16)           # [B,Hq,Wq,48]
    _, Hq, Wq, _ = xs4.shape
    Hf, Wf = Hq - 1, Wq - 1                                       # stride-4 map
    C1 = params["bb1_w"].shape[-1]
    C2 = params["bb2_w"].shape[-1]
    Cf = params["neck_w"].shape[-1]
    Ch = 2 * Cf
    D = params["mg_fc_w"].shape[1]
    G = NUM_ROW_CELLS * NUM_COL_CELLS
    M = B * Hf * Wf

    bf, f32 = jnp.bfloat16, jnp.float32

    w1s, b1s = _make_conv1_s2d_weights(params["bb1_w"], params["bb1_b"])
    w2s = _make_conv2_s2d_weights(params["bb2_w"])
    wn = params["neck_w"].reshape(C2, Cf)
    w3 = jnp.concatenate([params["row_w"], params["col_w"]], axis=3)
    w3 = w3.reshape(9, Cf, Ch)
    b3 = jnp.concatenate([params["row_b"], params["col_b"]])
    # block-diagonal 1x1: channel 0 <- row hidden, channel 1 <- col hidden
    w1x1 = jnp.zeros((Ch, 2), f32)
    w1x1 = w1x1.at[:Cf, 0].set(params["row_out_w"].reshape(Cf))
    w1x1 = w1x1.at[Cf:, 1].set(params["col_out_w"].reshape(Cf))
    b1x1 = jnp.concatenate([params["row_out_b"], params["col_out_b"]])
    pool = _build_pool_block_diag(B, Hf, Wf, NUM_ROW_CELLS, NUM_COL_CELLS)
    qkw = jnp.concatenate([params["mg_q_w"], params["mg_k_w"]], axis=1)
    qkb = jnp.concatenate([params["mg_q_b"], params["mg_k_b"]])
    pos = jnp.tile(_sincos_posemb(Hf, Wf, Cf), (B, 1))            # [M, Cf]

    args = [
        xs4,
        w1s.astype(bf), b1s.reshape(1, 4 * C1).astype(f32),
        w2s.astype(bf), params["bb2_b"].reshape(1, C2).astype(f32),
        wn.astype(bf), params["neck_b"].reshape(1, Cf).astype(f32),
        pos.astype(bf),
        w3.astype(bf), b3.reshape(1, Ch).astype(f32),
        w1x1.astype(bf), b1x1.reshape(1, 2).astype(f32),
        pool.astype(bf),
        params["mg_fc_w"].astype(bf),
        params["mg_fc_b"].reshape(1, D).astype(f32),
        qkw.astype(bf), qkb.reshape(1, 2 * D).astype(f32),
    ]
    in_specs = [_full_block_spec(a.shape) for a in args]

    out_shape = (
        jax.ShapeDtypeStruct((B, Hf, Wf, 2), f32),   # row/col segm logits
        jax.ShapeDtypeStruct((B, Hf, 2), f32),       # row band sigmoid means
        jax.ShapeDtypeStruct((B, Wf, 2), f32),       # col band sigmoid means
        jax.ShapeDtypeStruct((B, G, G), f32),        # merge pair logits
    )
    out_specs = tuple(_full_block_spec(s.shape) for s in out_shape)

    scratch_shapes = [
        pltpu.VMEM((B, Hf + 1, Wf + 1, 4 * C1), f32),  # padded conv1 parities
        pltpu.VMEM((B, Hf + 2, Wf + 2, Cf), f32),      # padded feats for 3x3
    ]

    flops = 2 * M * (4 * (16 * 3) * (4 * C1) + 4 * (4 * C1) * C2 + C2 * Cf
                     + 9 * Cf * Ch + Ch * 2)
    flops += 2 * (B * G) * (M * Cf + Cf * D + D * 2 * D) + 2 * B * G * G * D
    bytes_accessed = sum(int(a.size) * a.dtype.itemsize for a in args)
    bytes_accessed += sum(int(math.prod(s.shape)) * jnp.dtype(s.dtype).itemsize
                          for s in out_shape)

    kernel = functools.partial(
        _semv2_fused_kernel, B=B, Hf=Hf, Wf=Wf, Cf=Cf, G=G, D=D,
        scale=1.0 / math.sqrt(D))

    # TODO(synk): on v7x a leading size-B "parallel" grid axis (one batch
    # element per TensorCore) is an alternative to the single fused step.
    logits, rband, cband, mg = pl.pallas_call(
        kernel,
        grid=(1,),
        out_shape=out_shape,
        in_specs=in_specs,
        out_specs=out_specs,
        scratch_shapes=scratch_shapes,
        compiler_params=pltpu.CompilerParams(
            dimension_semantics=("arbitrary",),
            vmem_limit_bytes=_VMEM_LIMIT),
        cost_estimate=pl.CostEstimate(flops=flops,
                                      transcendentals=2 * M,
                                      bytes_accessed=bytes_accessed),
    )(*args)
    return logits, rband, cband, mg, Hf, Wf


# ------------------------------ JAX glue ops ---------------------------------

def compute_center_points(score, num_lines, stride):
    """Soft-argmax of per-band scores (already sigmoid+mean'ed in-kernel)."""
    B, L = score.shape
    band = L // num_lines
    centers = []
    for r in range(num_lines):
        s = score[:, r * band:(r + 1) * band]
        w = jax.nn.softmax(s * 10.0, axis=1)
        posn = jnp.arange(band, dtype=jnp.float32) + r * band
        idx = jnp.sum(w * posn[None, :], axis=1)
        centers.append((idx + 0.5) * stride)
    return jnp.stack(centers, axis=1)


def parse_grid_bboxes(row_centers, col_centers, img_w, img_h):
    # TODO(synk): the real parse_grid_bboxes counts rows/cols dynamically via a
    # score_threshold; that data-dependent grid size is not statically
    # expressible here, so the grid is fixed to NUM_ROW_CELLS x NUM_COL_CELLS.
    B, R = row_centers.shape
    _, C = col_centers.shape

    def edges(centers, limit):
        mids = (centers[:, :-1] + centers[:, 1:]) / 2.0
        z = jnp.zeros((B, 1), jnp.float32)
        lm = jnp.full((B, 1), float(limit), jnp.float32)
        return jnp.concatenate([z, mids, lm], axis=1)

    re = edges(row_centers, img_h)
    ce = edges(col_centers, img_w)
    boxes = []
    for r in range(R):
        for c in range(C):
            boxes.append(jnp.stack([ce[:, c], re[:, r], ce[:, c + 1],
                                    re[:, r + 1]], axis=1))
    return jnp.stack(boxes, axis=1), R, C


# ------------------------------ parameters -----------------------------------

def init_params(key):
    ks = jax.random.split(key, 12)

    def conv_w(k, shape):
        fan_in = shape[0] * shape[1] * shape[2]
        return jax.random.normal(k, shape, jnp.float32) * (2.0 / fan_in) ** 0.5

    def lin_w(k, shape):
        return jax.random.normal(k, shape, jnp.float32) * (2.0 / shape[0]) ** 0.5

    return {
        # backbone (2 stride-2 convs -> stride-4 feature map)
        "bb1_w": conv_w(ks[0], (3, 3, 3, 16)),   "bb1_b": jnp.zeros((16,)),
        "bb2_w": conv_w(ks[1], (3, 3, 16, 32)),  "bb2_b": jnp.zeros((32,)),
        # neck (1x1 conv)
        "neck_w": conv_w(ks[2], (1, 1, 32, 32)), "neck_b": jnp.zeros((32,)),
        # row split head
        "row_w": conv_w(ks[3], (3, 3, 32, 32)),  "row_b": jnp.zeros((32,)),
        "row_out_w": conv_w(ks[4], (1, 1, 32, 1)), "row_out_b": jnp.zeros((1,)),
        # col split head
        "col_w": conv_w(ks[5], (3, 3, 32, 32)),  "col_b": jnp.zeros((32,)),
        "col_out_w": conv_w(ks[6], (1, 1, 32, 1)), "col_out_b": jnp.zeros((1,)),
        # merge head
        "mg_fc_w": lin_w(ks[7], (32, 32)), "mg_fc_b": jnp.zeros((32,)),
        "mg_q_w": lin_w(ks[8], (32, 32)),  "mg_q_b": jnp.zeros((32,)),
        "mg_k_w": lin_w(ks[9], (32, 32)),  "mg_k_b": jnp.zeros((32,)),
    }


# ------------------------------ model forward --------------------------------

def model_forward(params, images, images_size):
    """images: NCHW [B,3,H,W]; images_size: [B,2] (w,h)."""
    result_info = {}   # eval path: split/merge heads contribute no losses
    B, _, H_img, W_img = images.shape
    x = jnp.transpose(images, (0, 2, 3, 1)).astype(jnp.bfloat16)   # NHWC bf16

    # TODO(synk): configurable backbone/neck builders are stood in for by a
    # fixed small conv stack (two 3x3 stride-2 convs + a 1x1 neck).
    logits, rband, cband, mg_logits, Hf, Wf = fused_forward(params, x)

    stride_w = W_img / Wf
    stride_h = H_img / Hf

    row_segm_logits = jnp.transpose(logits[..., 0:1], (0, 3, 1, 2))  # NCHW
    col_segm_logits = jnp.transpose(logits[..., 1:2], (0, 3, 1, 2))  # NCHW

    row_center_points = compute_center_points(rband[..., 0],
                                              NUM_ROW_CELLS, stride_h)
    col_center_points = compute_center_points(cband[..., 1],
                                              NUM_COL_CELLS, stride_w)

    table_grid_bboxes, num_r, num_c = parse_grid_bboxes(
        row_center_points, col_center_points, W_img, H_img)
    # TODO(synk): real grid extractor RoI-aligns each (data-dependent) grid
    # bbox; here cells are pooled on a fixed uniform grid of the feature map,
    # so table_grid_bboxes is computed only for interface fidelity.
    del table_grid_bboxes

    grid_masks = jnp.ones((B, num_r * num_c), jnp.float32)
    pair_mask = grid_masks[:, :, None] * grid_masks[:, None, :]
    mg_logits = jnp.where(pair_mask > 0, mg_logits, -1e9)

    num_rows = jnp.full((B,), num_r, jnp.int32)
    num_cols = jnp.full((B,), num_c, jnp.int32)

    return (result_info, None, row_center_points, row_segm_logits,
            None, col_center_points, col_segm_logits, mg_logits,
            num_rows, num_cols)


# --------------------------------- main ---------------------------------------

if __name__ == "__main__":
    key = jax.random.PRNGKey(0)
    k_img, k_par = jax.random.split(key)

    B, Cin, H, W = 2, 3, 32, 32
    images = jax.random.normal(k_img, (B, Cin, H, W), jnp.float32)
    images_size = jnp.array([[W, H], [W, H]], jnp.float32)

    params = init_params(k_par)
    fwd = jax.jit(model_forward)
    outputs = fwd(params, images, images_size)
    jax.block_until_ready(
        [o for o in outputs if o is not None and not isinstance(o, dict)])
    print("KERNEL_OK")
</pallas_src>

<mosaic_0001>
module attributes {stable_mosaic.version = 11 : i64} {
  func.func @_semv2_fused_kernel(%arg0: i32, %arg1: memref<2x9x9x48xbf16, #tpu.memory_space<vmem>>, %arg2: memref<4x48x64xbf16, #tpu.memory_space<vmem>>, %arg3: memref<1x64xf32, #tpu.memory_space<vmem>>, %arg4: memref<4x64x32xbf16, #tpu.memory_space<vmem>>, %arg5: memref<1x32xf32, #tpu.memory_space<vmem>>, %arg6: memref<32x32xbf16, #tpu.memory_space<vmem>>, %arg7: memref<1x32xf32, #tpu.memory_space<vmem>>, %arg8: memref<128x32xbf16, #tpu.memory_space<vmem>>, %arg9: memref<9x32x64xbf16, #tpu.memory_space<vmem>>, %arg10: memref<1x64xf32, #tpu.memory_space<vmem>>, %arg11: memref<64x2xbf16, #tpu.memory_space<vmem>>, %arg12: memref<1x2xf32, #tpu.memory_space<vmem>>, %arg13: memref<8x128xbf16, #tpu.memory_space<vmem>>, %arg14: memref<32x32xbf16, #tpu.memory_space<vmem>>, %arg15: memref<1x32xf32, #tpu.memory_space<vmem>>, %arg16: memref<32x64xbf16, #tpu.memory_space<vmem>>, %arg17: memref<1x64xf32, #tpu.memory_space<vmem>>, %arg18: memref<2x8x8x2xf32, #tpu.memory_space<vmem>>, %arg19: memref<2x8x2xf32, #tpu.memory_space<vmem>>, %arg20: memref<2x8x2xf32, #tpu.memory_space<vmem>>, %arg21: memref<2x4x4xf32, #tpu.memory_space<vmem>>, %arg22: memref<2x9x9x64xf32, #tpu.memory_space<vmem>>, %arg23: memref<2x10x10x32xf32, #tpu.memory_space<vmem>>) attributes {dimension_semantics = [#tpu.dimension_semantics<arbitrary>], iteration_bounds = array<i64: 1>, scalar_prefetch = 0 : i64, scratch_operands = 2 : i64, tpu.core_type = #tpu.core_type<tc>, window_params = [{pipeline_mode = #tpu.pipeline_mode<synchronous>, transform_indices = @transform_0, window_bounds = array<i64: 2, 9, 9, 48>}, {pipeline_mode = #tpu.pipeline_mode<synchronous>, transform_indices = @transform_1, window_bounds = array<i64: 4, 48, 64>}, {pipeline_mode = #tpu.pipeline_mode<synchronous>, transform_indices = @transform_2, window_bounds = array<i64: 1, 64>}, {pipeline_mode = #tpu.pipeline_mode<synchronous>, transform_indices = @transform_3, window_bounds = array<i64: 4, 64, 32>}, {pipeline_mode = #tpu.pipeline_mode<synchronous>, transform_indices = @transform_4, window_bounds = array<i64: 1, 32>}, {pipeline_mode = #tpu.pipeline_mode<synchronous>, transform_indices = @transform_5, window_bounds = array<i64: 32, 32>}, {pipeline_mode = #tpu.pipeline_mode<synchronous>, transform_indices = @transform_6, window_bounds = array<i64: 1, 32>}, {pipeline_mode = #tpu.pipeline_mode<synchronous>, transform_indices = @transform_7, window_bounds = array<i64: 128, 32>}, {pipeline_mode = #tpu.pipeline_mode<synchronous>, transform_indices = @transform_8, window_bounds = array<i64: 9, 32, 64>}, {pipeline_mode = #tpu.pipeline_mode<synchronous>, transform_indices = @transform_9, window_bounds = array<i64: 1, 64>}, {pipeline_mode = #tpu.pipeline_mode<synchronous>, transform_indices = @transform_10, window_bounds = array<i64: 64, 2>}, {pipeline_mode = #tpu.pipeline_mode<synchronous>, transform_indices = @transform_11, window_bounds = array<i64: 1, 2>}, {pipeline_mode = #tpu.pipeline_mode<synchronous>, transform_indices = @transform_12, window_bounds = array<i64: 8, 128>}, {pipeline_mode = #tpu.pipeline_mode<synchronous>, transform_indices = @transform_13, window_bounds = array<i64: 32, 32>}, {pipeline_mode = #tpu.pipeline_mode<synchronous>, transform_indices = @transform_14, window_bounds = array<i64: 1, 32>}, {pipeline_mode = #tpu.pipeline_mode<synchronous>, transform_indices = @transform_15, window_bounds = array<i64: 32, 64>}, {pipeline_mode = #tpu.pipeline_mode<synchronous>, transform_indices = @transform_16, window_bounds = array<i64: 1, 64>}, {pipeline_mode = #tpu.pipeline_mode<synchronous>, transform_indices = @transform_17, window_bounds = array<i64: 2, 8, 8, 2>}, {pipeline_mode = #tpu.pipeline_mode<synchronous>, transform_indices = @transform_18, window_bounds = array<i64: 2, 8, 2>}, {pipeline_mode = #tpu.pipeline_mode<synchronous>, transform_indices = @transform_19, window_bounds = array<i64: 2, 8, 2>}, {pipeline_mode = #tpu.pipeline_mode<synchronous>, transform_indices = @transform_20, window_bounds = array<i64: 2, 4, 4>}]} {
    %c0 = arith.constant 0 : index
    %c0_0 = arith.constant 0 : index
    %c0_1 = arith.constant 0 : index
    %c0_2 = arith.constant 0 : index
    %0 = vector.load %arg1[%c0, %c0_0, %c0_1, %c0_2] : memref<2x9x9x48xbf16, #tpu.memory_space<vmem>>, vector<2x8x8x48xbf16>
    %1 = vector.shape_cast %0 : vector<2x8x8x48xbf16> to vector<128x48xbf16>
    %c0_3 = arith.constant 0 : index
    %c0_4 = arith.constant 0 : index
    %c0_5 = arith.constant 0 : index
    %2 = vector.load %arg2[%c0_3, %c0_4, %c0_5] : memref<4x48x64xbf16, #tpu.memory_space<vmem>>, vector<1x48x64xbf16>
    %3 = vector.shape_cast %2 : vector<1x48x64xbf16> to vector<48x64xbf16>
    %cst = arith.constant dense<0.000000e+00> : vector<128x64xf32>
    %4 = tpu.matmul %1, %3, %cst {dimension_numbers = #tpu.dot_dimension_numbers<[1], [0], [0], [1], [0, 0, 1, 1], [], []>} : vector<128x48xbf16>, vector<48x64xbf16>, vector<128x64xf32> -> vector<128x64xf32>
    %c0_6 = arith.constant 0 : index
    %c0_7 = arith.constant 0 : index
    %c1 = arith.constant 1 : index
    %c0_8 = arith.constant 0 : index
    %5 = vector.load %arg1[%c0_6, %c0_7, %c1, %c0_8] : memref<2x9x9x48xbf16, #tpu.memory_space<vmem>>, vector<2x8x8x48xbf16>
    %6 = vector.shape_cast %5 : vector<2x8x8x48xbf16> to vector<128x48xbf16>
    %c1_9 = arith.constant 1 : index
    %c0_10 = arith.constant 0 : index
    %c0_11 = arith.constant 0 : index
    %7 = vector.load %arg2[%c1_9, %c0_10, %c0_11] : memref<4x48x64xbf16, #tpu.memory_space<vmem>>, vector<1x48x64xbf16>
    %8 = vector.shape_cast %7 : vector<1x48x64xbf16> to vector<48x64xbf16>
    %cst_12 = arith.constant dense<0.000000e+00> : vector<128x64xf32>
    %9 = tpu.matmul %6, %8, %cst_12 {dimension_numbers = #tpu.dot_dimension_numbers<[1], [0], [0], [1], [0, 0, 1, 1], [], []>} : vector<128x48xbf16>, vector<48x64xbf16>, vector<128x64xf32> -> vector<128x64xf32>
    %10 = arith.addf %4, %9 : vector<128x64xf32>
    %c0_13 = arith.constant 0 : index
    %c1_14 = arith.constant 1 : index
    %c0_15 = arith.constant 0 : index
    %c0_16 = arith.constant 0 : index
    %11 = vector.load %arg1[%c0_13, %c1_14, %c0_15, %c0_16] : memref<2x9x9x48xbf16, #tpu.memory_space<vmem>>, vector<2x8x8x48xbf16>
    %12 = vector.shape_cast %11 : vector<2x8x8x48xbf16> to vector<128x48xbf16>
    %c2 = arith.constant 2 : index
    %c0_17 = arith.constant 0 : index
    %c0_18 = arith.constant 0 : index
    %13 = vector.load %arg2[%c2, %c0_17, %c0_18] : memref<4x48x64xbf16, #tpu.memory_space<vmem>>, vector<1x48x64xbf16>
    %14 = vector.shape_cast %13 : vector<1x48x64xbf16> to vector<48x64xbf16>
    %cst_19 = arith.constant dense<0.000000e+00> : vector<128x64xf32>
    %15 = tpu.matmul %12, %14, %cst_19 {dimension_numbers = #tpu.dot_dimension_numbers<[1], [0], [0], [1], [0, 0, 1, 1], [], []>} : vector<128x48xbf16>, vector<48x64xbf16>, vector<128x64xf32> -> vector<128x64xf32>
    %16 = arith.addf %10, %15 : vector<128x64xf32>
    %c0_20 = arith.constant 0 : index
    %c1_21 = arith.constant 1 : index
    %c1_22 = arith.constant 1 : index
    %c0_23 = arith.constant 0 : index
    %17 = vector.load %arg1[%c0_20, %c1_21, %c1_22, %c0_23] : memref<2x9x9x48xbf16, #tpu.memory_space<vmem>>, vector<2x8x8x48xbf16>
    %18 = vector.shape_cast %17 : vector<2x8x8x48xbf16> to vector<128x48xbf16>
    %c3 = arith.constant 3 : index
    %c0_24 = arith.constant 0 : index
    %c0_25 = arith.constant 0 : index
    %19 = vector.load %arg2[%c3, %c0_24, %c0_25] : memref<4x48x64xbf16, #tpu.memory_space<vmem>>, vector<1x48x64xbf16>
    %20 = vector.shape_cast %19 : vector<1x48x64xbf16> to vector<48x64xbf16>
    %cst_26 = arith.constant dense<0.000000e+00> : vector<128x64xf32>
    %21 = tpu.matmul %18, %20, %cst_26 {dimension_numbers = #tpu.dot_dimension_numbers<[1], [0], [0], [1], [0, 0, 1, 1], [], []>} : vector<128x48xbf16>, vector<48x64xbf16>, vector<128x64xf32> -> vector<128x64xf32>
    %22 = arith.addf %16, %21 : vector<128x64xf32>
    %c0_27 = arith.constant 0 : index
    %c0_28 = arith.constant 0 : index
    %23 = vector.load %arg3[%c0_27, %c0_28] : memref<1x64xf32, #tpu.memory_space<vmem>>, vector<1x64xf32>
    %24 = vector.broadcast %23 : vector<1x64xf32> to vector<128x64xf32>
    %25 = arith.addf %22, %24 : vector<128x64xf32>
    %cst_29 = arith.constant 0.000000e+00 : f32
    %26 = vector.broadcast %cst_29 : f32 to vector<128x64xf32>
    %27 = arith.maximumf %25, %26 : vector<128x64xf32>
    %cst_30 = arith.constant 0.000000e+00 : f32
    %28 = vector.broadcast %cst_30 : f32 to vector<2x9x9x64xf32>
    %c0_31 = arith.constant 0 : index
    %c0_32 = arith.constant 0 : index
    %c0_33 = arith.constant 0 : index
    %c0_34 = arith.constant 0 : index
    %29 = vector.load %arg22[%c0_31, %c0_32, %c0_33, %c0_34] : memref<2x9x9x64xf32, #tpu.memory_space<vmem>>, vector<2x9x9x64xf32>
    tpu.vector_store %arg22[%c0_31, %c0_32, %c0_33, %c0_34], %28 {strides = array<i32>} : memref<2x9x9x64xf32, #tpu.memory_space<vmem>>, vector<2x9x9x64xf32>,
    %30 = vector.shape_cast %27 : vector<128x64xf32> to vector<2x8x8x64xf32>
    %c0_35 = arith.constant 0 : index
    %c1_36 = arith.constant 1 : index
    %c1_37 = arith.constant 1 : index
    %c0_38 = arith.constant 0 : index
    %31 = vector.load %arg22[%c0_35, %c1_36, %c1_37, %c0_38] : memref<2x9x9x64xf32, #tpu.memory_space<vmem>>, vector<2x8x8x64xf32>
    tpu.vector_store %arg22[%c0_35, %c1_36, %c1_37, %c0_38], %30 {strides = array<i32>} : memref<2x9x9x64xf32, #tpu.memory_space<vmem>>, vector<2x8x8x64xf32>,
    %c0_39 = arith.constant 0 : index
    %c0_40 = arith.constant 0 : index
    %c0_41 = arith.constant 0 : index
    %c0_42 = arith.constant 0 : index
    %32 = vector.load %arg22[%c0_39, %c0_40, %c0_41, %c0_42] : memref<2x9x9x64xf32, #tpu.memory_space<vmem>>, vector<2x8x8x64xf32>
    %33 = vector.shape_cast %32 : vector<2x8x8x64xf32> to vector<128x64xf32>
    %34 = arith.truncf %33 : vector<128x64xf32> to vector<128x64xbf16>
    %c0_43 = arith.constant 0 : index
    %c0_44 = arith.constant 0 : index
    %c0_45 = arith.constant 0 : index
    %35 = vector.load %arg4[%c0_43, %c0_44, %c0_45] : memref<4x64x32xbf16, #tpu.memory_space<vmem>>, vector<1x64x32xbf16>
    %36 = vector.shape_cast %35 : vector<1x64x32xbf16> to vector<64x32xbf16>
    %cst_46 = arith.constant dense<0.000000e+00> : vector<128x32xf32>
    %37 = tpu.matmul %34, %36, %cst_46 {dimension_numbers = #tpu.dot_dimension_numbers<[1], [0], [0], [1], [0, 0, 1, 1], [], []>} : vector<128x64xbf16>, vector<64x32xbf16>, vector<128x32xf32> -> vector<128x32xf32>
    %c0_47 = arith.constant 0 : index
    %c0_48 = arith.constant 0 : index
    %c1_49 = arith.constant 1 : index
    %c0_50 = arith.constant 0 : index
    %38 = vector.load %arg22[%c0_47, %c0_48, %c1_49, %c0_50] : memref<2x9x9x64xf32, #tpu.memory_space<vmem>>, vector<2x8x8x64xf32>
    %39 = vector.shape_cast %38 : vector<2x8x8x64xf32> to vector<128x64xf32>
    %40 = arith.truncf %39 : vector<128x64xf32> to vector<128x64xbf16>
    %c1_51 = arith.constant 1 : index
    %c0_52 = arith.constant 0 : index
    %c0_53 = arith.constant 0 : index
    %41 = vector.load %arg4[%c1_51, %c0_52, %c0_53] : memref<4x64x32xbf16, #tpu.memory_space<vmem>>, vector<1x64x32xbf16>
    %42 = vector.shape_cast %41 : vector<1x64x32xbf16> to vector<64x32xbf16>
    %cst_54 = arith.constant dense<0.000000e+00> : vector<128x32xf32>
    %43 = tpu.matmul %40, %42, %cst_54 {dimension_numbers = #tpu.dot_dimension_numbers<[1], [0], [0], [1], [0, 0, 1, 1], [], []>} : vector<128x64xbf16>, vector<64x32xbf16>, vector<128x32xf32> -> vector<128x32xf32>
    %44 = arith.addf %37, %43 : vector<128x32xf32>
    %c0_55 = arith.constant 0 : index
    %c1_56 = arith.constant 1 : index
    %c0_57 = arith.constant 0 : index
    %c0_58 = arith.constant 0 : index
    %45 = vector.load %arg22[%c0_55, %c1_56, %c0_57, %c0_58] : memref<2x9x9x64xf32, #tpu.memory_space<vmem>>, vector<2x8x8x64xf32>
    %46 = vector.shape_cast %45 : vector<2x8x8x64xf32> to vector<128x64xf32>
    %47 = arith.truncf %46 : vector<128x64xf32> to vector<128x64xbf16>
    %c2_59 = arith.constant 2 : index
    %c0_60 = arith.constant 0 : index
    %c0_61 = arith.constant 0 : index
    %48 = vector.load %arg4[%c2_59, %c0_60, %c0_61] : memref<4x64x32xbf16, #tpu.memory_space<vmem>>, vector<1x64x32xbf16>
    %49 = vector.shape_cast %48 : vector<1x64x32xbf16> to vector<64x32xbf16>
    %cst_62 = arith.constant dense<0.000000e+00> : vector<128x32xf32>
    %50 = tpu.matmul %47, %49, %cst_62 {dimension_numbers = #tpu.dot_dimension_numbers<[1], [0], [0], [1], [0, 0, 1, 1], [], []>} : vector<128x64xbf16>, vector<64x32xbf16>, vector<128x32xf32> -> vector<128x32xf32>
    %51 = arith.addf %44, %50 : vector<128x32xf32>
    %c0_63 = arith.constant 0 : index
    %c1_64 = arith.constant 1 : index
    %c1_65 = arith.constant 1 : index
    %c0_66 = arith.constant 0 : index
    %52 = vector.load %arg22[%c0_63, %c1_64, %c1_65, %c0_66] : memref<2x9x9x64xf32, #tpu.memory_space<vmem>>, vector<2x8x8x64xf32>
    %53 = vector.shape_cast %52 : vector<2x8x8x64xf32> to vector<128x64xf32>
    %54 = arith.truncf %53 : vector<128x64xf32> to vector<128x64xbf16>
    %c3_67 = arith.constant 3 : index
    %c0_68 = arith.constant 0 : index
    %c0_69 = arith.constant 0 : index
    %55 = vector.load %arg4[%c3_67, %c0_68, %c0_69] : memref<4x64x32xbf16, #tpu.memory_space<vmem>>, vector<1x64x32xbf16>
    %56 = vector.shape_cast %55 : vector<1x64x32xbf16> to vector<64x32xbf16>
    %cst_70 = arith.constant dense<0.000000e+00> : vector<128x32xf32>
    %57 = tpu.matmul %54, %56, %cst_70 {dimension_numbers = #tpu.dot_dimension_numbers<[1], [0], [0], [1], [0, 0, 1, 1], [], []>} : vector<128x64xbf16>, vector<64x32xbf16>, vector<128x32xf32> -> vector<128x32xf32>
    %58 = arith.addf %51, %57 : vector<128x32xf32>
    %c0_71 = arith.constant 0 : index
    %c0_72 = arith.constant 0 : index
    %59 = vector.load %arg5[%c0_71, %c0_72] : memref<1x32xf32, #tpu.memory_space<vmem>>, vector<1x32xf32>
    %60 = vector.broadcast %59 : vector<1x32xf32> to vector<128x32xf32>
    %61 = arith.addf %58, %60 : vector<128x32xf32>
    %cst_73 = arith.constant 0.000000e+00 : f32
    %62 = vector.broadcast %cst_73 : f32 to vector<128x32xf32>
    %63 = arith.maximumf %61, %62 : vector<128x32xf32>
    %64 = arith.truncf %63 : vector<128x32xf32> to vector<128x32xbf16>
    %c0_74 = arith.constant 0 : index
    %c0_75 = arith.constant 0 : index
    %65 = vector.load %arg6[%c0_74, %c0_75] : memref<32x32xbf16, #tpu.memory_space<vmem>>, vector<32x32xbf16>
    %cst_76 = arith.constant dense<0.000000e+00> : vector<128x32xf32>
    %66 = tpu.matmul %64, %65, %cst_76 {dimension_numbers = #tpu.dot_dimension_numbers<[1], [0], [0], [1], [0, 0, 1, 1], [], []>} : vector<128x32xbf16>, vector<32x32xbf16>, vector<128x32xf32> -> vector<128x32xf32>
    %c0_77 = arith.constant 0 : index
    %c0_78 = arith.constant 0 : index
    %67 = vector.load %arg7[%c0_77, %c0_78] : memref<1x32xf32, #tpu.memory_space<vmem>>, vector<1x32xf32>
    %68 = vector.broadcast %67 : vector<1x32xf32> to vector<128x32xf32>
    %69 = arith.addf %66, %68 : vector<128x32xf32>
    %cst_79 = arith.constant 0.000000e+00 : f32
    %70 = vector.broadcast %cst_79 : f32 to vector<128x32xf32>
    %71 = arith.maximumf %69, %70 : vector<128x32xf32>
    %c0_80 = arith.constant 0 : index
    %c0_81 = arith.constant 0 : index
    %72 = vector.load %arg8[%c0_80, %c0_81] : memref<128x32xbf16, #tpu.memory_space<vmem>>, vector<128x32xbf16>
    %73 = arith.extf %72 : vector<128x32xbf16> to vector<128x32xf32>
    %74 = arith.addf %71, %73 : vector<128x32xf32>
    %75 = arith.truncf %74 : vector<128x32xf32> to vector<128x32xbf16>
    %cst_82 = arith.constant 0.000000e+00 : f32
    %76 = vector.broadcast %cst_82 : f32 to vector<2x10x10x32xf32>
    %c0_83 = arith.constant 0 : index
    %c0_84 = arith.constant 0 : index
    %c0_85 = arith.constant 0 : index
    %c0_86 = arith.constant 0 : index
    %77 = vector.load %arg23[%c0_83, %c0_84, %c0_85, %c0_86] : memref<2x10x10x32xf32, #tpu.memory_space<vmem>>, vector<2x10x10x32xf32>
    tpu.vector_store %arg23[%c0_83, %c0_84, %c0_85, %c0_86], %76 {strides = array<i32>} : memref<2x10x10x32xf32, #tpu.memory_space<vmem>>, vector<2x10x10x32xf32>,
    %78 = vector.shape_cast %74 : vector<128x32xf32> to vector<2x8x8x32xf32>
    %c0_87 = arith.constant 0 : index
    %c1_88 = arith.constant 1 : index
    %c1_89 = arith.constant 1 : index
    %c0_90 = arith.constant 0 : index
    %79 = vector.load %arg23[%c0_87, %c1_88, %c1_89, %c0_90] : memref<2x10x10x32xf32, #tpu.memory_space<vmem>>, vector<2x8x8x32xf32>
    tpu.vector_store %arg23[%c0_87, %c1_88, %c1_89, %c0_90], %78 {strides = array<i32>} : memref<2x10x10x32xf32, #tpu.memory_space<vmem>>, vector<2x8x8x32xf32>,
    %c0_91 = arith.constant 0 : index
    %c0_92 = arith.constant 0 : index
    %c0_93 = arith.constant 0 : index
    %c0_94 = arith.constant 0 : index
    %80 = vector.load %arg23[%c0_91, %c0_92, %c0_93, %c0_94] : memref<2x10x10x32xf32, #tpu.memory_space<vmem>>, vector<2x8x8x32xf32>
    %81 = vector.shape_cast %80 : vector<2x8x8x32xf32> to vector<128x32xf32>
    %82 = arith.truncf %81 : vector<128x32xf32> to vector<128x32xbf16>
    %c0_95 = arith.constant 0 : index
    %c0_96 = arith.constant 0 : index
    %c0_97 = arith.constant 0 : index
    %83 = vector.load %arg9[%c0_95, %c0_96, %c0_97] : memref<9x32x64xbf16, #tpu.memory_space<vmem>>, vector<1x32x64xbf16>
    %84 = vector.shape_cast %83 : vector<1x32x64xbf16> to vector<32x64xbf16>
    %cst_98 = arith.constant dense<0.000000e+00> : vector<128x64xf32>
    %85 = tpu.matmul %82, %84, %cst_98 {dimension_numbers = #tpu.dot_dimension_numbers<[1], [0], [0], [1], [0, 0, 1, 1], [], []>} : vector<128x32xbf16>, vector<32x64xbf16>, vector<128x64xf32> -> vector<128x64xf32>
    %c0_99 = arith.constant 0 : index
    %c0_100 = arith.constant 0 : index
    %c1_101 = arith.constant 1 : index
    %c0_102 = arith.constant 0 : index
    %86 = vector.load %arg23[%c0_99, %c0_100, %c1_101, %c0_102] : memref<2x10x10x32xf32, #tpu.memory_space<vmem>>, vector<2x8x8x32xf32>
    %87 = vector.shape_cast %86 : vector<2x8x8x32xf32> to vector<128x32xf32>
    %88 = arith.truncf %87 : vector<128x32xf32> to vector<128x32xbf16>
    %c1_103 = arith.constant 1 : index
    %c0_104 = arith.constant 0 : index
    %c0_105 = arith.constant 0 : index
    %89 = vector.load %arg9[%c1_103, %c0_104, %c0_105] : memref<9x32x64xbf16, #tpu.memory_space<vmem>>, vector<1x32x64xbf16>
    %90 = vector.shape_cast %89 : vector<1x32x64xbf16> to vector<32x64xbf16>
    %cst_106 = arith.constant dense<0.000000e+00> : vector<128x64xf32>
    %91 = tpu.matmul %88, %90, %cst_106 {dimension_numbers = #tpu.dot_dimension_numbers<[1], [0], [0], [1], [0, 0, 1, 1], [], []>} : vector<128x32xbf16>, vector<32x64xbf16>, vector<128x64xf32> -> vector<128x64xf32>
    %92 = arith.addf %85, %91 : vector<128x64xf32>
    %c0_107 = arith.constant 0 : index
    %c0_108 = arith.constant 0 : index
    %c2_109 = arith.constant 2 : index
    %c0_110 = arith.constant 0 : index
    %93 = vector.load %arg23[%c0_107, %c0_108, %c2_109, %c0_110] : memref<2x10x10x32xf32, #tpu.memory_space<vmem>>, vector<2x8x8x32xf32>
    %94 = vector.shape_cast %93 : vector<2x8x8x32xf32> to vector<128x32xf32>
    %95 = arith.truncf %94 : vector<128x32xf32> to vector<128x32xbf16>
    %c2_111 = arith.constant 2 : index
    %c0_112 = arith.constant 0 : index
    %c0_113 = arith.constant 0 : index
    %96 = vector.load %arg9[%c2_111, %c0_112, %c0_113] : memref<9x32x64xbf16, #tpu.memory_space<vmem>>, vector<1x32x64xbf16>
    %97 = vector.shape_cast %96 : vector<1x32x64xbf16> to vector<32x64xbf16>
    %cst_114 = arith.constant dense<0.000000e+00> : vector<128x64xf32>
    %98 = tpu.matmul %95, %97, %cst_114 {dimension_numbers = #tpu.dot_dimension_numbers<[1], [0], [0], [1], [0, 0, 1, 1], [], []>} : vector<128x32xbf16>, vector<32x64xbf16>, vector<128x64xf32> -> vector<128x64xf32>
    %99 = arith.addf %92, %98 : vector<128x64xf32>
    %c0_115 = arith.constant 0 : index
    %c1_116 = arith.constant 1 : index
    %c0_117 = arith.constant 0 : index
    %c0_118 = arith.constant 0 : index
    %100 = vector.load %arg23[%c0_115, %c1_116, %c0_117, %c0_118] : memref<2x10x10x32xf32, #tpu.memory_space<vmem>>, vector<2x8x8x32xf32>
    %101 = vector.shape_cast %100 : vector<2x8x8x32xf32> to vector<128x32xf32>
    %102 = arith.truncf %101 : vector<128x32xf32> to vector<128x32xbf16>
    %c3_119 = arith.constant 3 : index
    %c0_120 = arith.constant 0 : index
    %c0_121 = arith.constant 0 : index
    %103 = vector.load %arg9[%c3_119, %c0_120, %c0_121] : memref<9x32x64xbf16, #tpu.memory_space<vmem>>, vector<1x32x64xbf16>
    %104 = vector.shape_cast %103 : vector<1x32x64xbf16> to vector<32x64xbf16>
    %cst_122 = arith.constant dense<0.000000e+00> : vector<128x64xf32>
    %105 = tpu.matmul %102, %104, %cst_122 {dimension_numbers = #tpu.dot_dimension_numbers<[1], [0], [0], [1], [0, 0, 1, 1], [], []>} : vector<128x32xbf16>, vector<32x64xbf16>, vector<128x64xf32> -> vector<128x64xf32>
    %106 = arith.addf %99, %105 : vector<128x64xf32>
    %c0_123 = arith.constant 0 : index
    %c1_124 = arith.constant 1 : index
    %c1_125 = arith.constant 1 : index
    %c0_126 = arith.constant 0 : index
    %107 = vector.load %arg23[%c0_123, %c1_124, %c1_125, %c0_126] : memref<2x10x10x32xf32, #tpu.memory_space<vmem>>, vector<2x8x8x32xf32>
    %108 = vector.shape_cast %107 : vector<2x8x8x32xf32> to vector<128x32xf32>
    %109 = arith.truncf %108 : vector<128x32xf32> to vector<128x32xbf16>
    %c4 = arith.constant 4 : index
    %c0_127 = arith.constant 0 : index
    %c0_128 = arith.constant 0 : index
    %110 = vector.load %arg9[%c4, %c0_127, %c0_128] : memref<9x32x64xbf16, #tpu.memory_space<vmem>>, vector<1x32x64xbf16>
    %111 = vector.shape_cast %110 : vector<1x32x64xbf16> to vector<32x64xbf16>
    %cst_129 = arith.constant dense<0.000000e+00> : vector<128x64xf32>
    %112 = tpu.matmul %109, %111, %cst_129 {dimension_numbers = #tpu.dot_dimension_numbers<[1], [0], [0], [1], [0, 0, 1, 1], [], []>} : vector<128x32xbf16>, vector<32x64xbf16>, vector<128x64xf32> -> vector<128x64xf32>
    %113 = arith.addf %106, %112 : vector<128x64xf32>
    %c0_130 = arith.constant 0 : index
    %c1_131 = arith.constant 1 : index
    %c2_132 = arith.constant 2 : index
    %c0_133 = arith.constant 0 : index
    %114 = vector.load %arg23[%c0_130, %c1_131, %c2_132, %c0_133] : memref<2x10x10x32xf32, #tpu.memory_space<vmem>>, vector<2x8x8x32xf32>
    %115 = vector.shape_cast %114 : vector<2x8x8x32xf32> to vector<128x32xf32>
    %116 = arith.truncf %115 : vector<128x32xf32> to vector<128x32xbf16>
    %c5 = arith.constant 5 : index
    %c0_134 = arith.constant 0 : index
    %c0_135 = arith.constant 0 : index
    %117 = vector.load %arg9[%c5, %c0_134, %c0_135] : memref<9x32x64xbf16, #tpu.memory_space<vmem>>, vector<1x32x64xbf16>
    %118 = vector.shape_cast %117 : vector<1x32x64xbf16> to vector<32x64xbf16>
    %cst_136 = arith.constant dense<0.000000e+00> : vector<128x64xf32>
    %119 = tpu.matmul %116, %118, %cst_136 {dimension_numbers = #tpu.dot_dimension_numbers<[1], [0], [0], [1], [0, 0, 1, 1], [], []>} : vector<128x32xbf16>, vector<32x64xbf16>, vector<128x64xf32> -> vector<128x64xf32>
    %120 = arith.addf %113, %119 : vector<128x64xf32>
    %c0_137 = arith.constant 0 : index
    %c2_138 = arith.constant 2 : index
    %c0_139 = arith.constant 0 : index
    %c0_140 = arith.constant 0 : index
    %121 = vector.load %arg23[%c0_137, %c2_138, %c0_139, %c0_140] : memref<2x10x10x32xf32, #tpu.memory_space<vmem>>, vector<2x8x8x32xf32>
    %122 = vector.shape_cast %121 : vector<2x8x8x32xf32> to vector<128x32xf32>
    %123 = arith.truncf %122 : vector<128x32xf32> to vector<128x32xbf16>
    %c6 = arith.constant 6 : index
    %c0_141 = arith.constant 0 : index
    %c0_142 = arith.constant 0 : index
    %124 = vector.load %arg9[%c6, %c0_141, %c0_142] : memref<9x32x64xbf16, #tpu.memory_space<vmem>>, vector<1x32x64xbf16>
    %125 = vector.shape_cast %124 : vector<1x32x64xbf16> to vector<32x64xbf16>
    %cst_143 = arith.constant dense<0.000000e+00> : vector<128x64xf32>
    %126 = tpu.matmul %123, %125, %cst_143 {dimension_numbers = #tpu.dot_dimension_numbers<[1], [0], [0], [1], [0, 0, 1, 1], [], []>} : vector<128x32xbf16>, vector<32x64xbf16>, vector<128x64xf32> -> vector<128x64xf32>
    %127 = arith.addf %120, %126 : vector<128x64xf32>
    %c0_144 = arith.constant 0 : index
    %c2_145 = arith.constant 2 : index
    %c1_146 = arith.constant 1 : index
    %c0_147 = arith.constant 0 : index
    %128 = vector.load %arg23[%c0_144, %c2_145, %c1_146, %c0_147] : memref<2x10x10x32xf32, #tpu.memory_space<vmem>>, vector<2x8x8x32xf32>
    %129 = vector.shape_cast %128 : vector<2x8x8x32xf32> to vector<128x32xf32>
    %130 = arith.truncf %129 : vector<128x32xf32> to vector<128x32xbf16>
    %c7 = arith.constant 7 : index
    %c0_148 = arith.constant 0 : index
    %c0_149 = arith.constant 0 : index
    %131 = vector.load %arg9[%c7, %c0_148, %c0_149] : memref<9x32x64xbf16, #tpu.memory_space<vmem>>, vector<1x32x64xbf16>
    %132 = vector.shape_cast %131 : vector<1x32x64xbf16> to vector<32x64xbf16>
    %cst_150 = arith.constant dense<0.000000e+00> : vector<128x64xf32>
    %133 = tpu.matmul %130, %132, %cst_150 {dimension_numbers = #tpu.dot_dimension_numbers<[1], [0], [0], [1], [0, 0, 1, 1], [], []>} : vector<128x32xbf16>, vector<32x64xbf16>, vector<128x64xf32> -> vector<128x64xf32>
    %134 = arith.addf %127, %133 : vector<128x64xf32>
    %c0_151 = arith.constant 0 : index
    %c2_152 = arith.constant 2 : index
    %c2_153 = arith.constant 2 : index
    %c0_154 = arith.constant 0 : index
    %135 = vector.load %arg23[%c0_151, %c2_152, %c2_153, %c0_154] : memref<2x10x10x32xf32, #tpu.memory_space<vmem>>, vector<2x8x8x32xf32>
    %136 = vector.shape_cast %135 : vector<2x8x8x32xf32> to vector<128x32xf32>
    %137 = arith.truncf %136 : vector<128x32xf32> to vector<128x32xbf16>
    %c8 = arith.constant 8 : index
    %c0_155 = arith.constant 0 : index
    %c0_156 = arith.constant 0 : index
    %138 = vector.load %arg9[%c8, %c0_155, %c0_156] : memref<9x32x64xbf16, #tpu.memory_space<vmem>>, vector<1x32x64xbf16>
    %139 = vector.shape_cast %138 : vector<1x32x64xbf16> to vector<32x64xbf16>
    %cst_157 = arith.constant dense<0.000000e+00> : vector<128x64xf32>
    %140 = tpu.matmul %137, %139, %cst_157 {dimension_numbers = #tpu.dot_dimension_numbers<[1], [0], [0], [1], [0, 0, 1, 1], [], []>} : vector<128x32xbf16>, vector<32x64xbf16>, vector<128x64xf32> -> vector<128x64xf32>
    %141 = arith.addf %134, %140 : vector<128x64xf32>
    %c0_158 = arith.constant 0 : index
    %c0_159 = arith.constant 0 : index
    %142 = vector.load %arg10[%c0_158, %c0_159] : memref<1x64xf32, #tpu.memory_space<vmem>>, vector<1x64xf32>
    %143 = vector.broadcast %142 : vector<1x64xf32> to vector<128x64xf32>
    %144 = arith.addf %141, %143 : vector<128x64xf32>
    %cst_160 = arith.constant 0.000000e+00 : f32
    %145 = vector.broadcast %cst_160 : f32 to vector<128x64xf32>
    %146 = arith.maximumf %144, %145 : vector<128x64xf32>
    %147 = arith.truncf %146 : vector<128x64xf32> to vector<128x64xbf16>
    %c0_161 = arith.constant 0 : index
    %c0_162 = arith.constant 0 : index
    %148 = vector.load %arg11[%c0_161, %c0_162] : memref<64x2xbf16, #tpu.memory_space<vmem>>, vector<64x2xbf16>
    %cst_163 = arith.constant dense<0.000000e+00> : vector<128x2xf32>
    %149 = tpu.matmul %147, %148, %cst_163 {dimension_numbers = #tpu.dot_dimension_numbers<[1], [0], [0], [1], [0, 0, 1, 1], [], []>} : vector<128x64xbf16>, vector<64x2xbf16>, vector<128x2xf32> -> vector<128x2xf32>
    %c0_164 = arith.constant 0 : index
    %c0_165 = arith.constant 0 : index
    %150 = vector.load %arg12[%c0_164, %c0_165] : memref<1x2xf32, #tpu.memory_space<vmem>>, vector<1x2xf32>
    %151 = vector.broadcast %150 : vector<1x2xf32> to vector<128x2xf32>
    %152 = arith.addf %149, %151 : vector<128x2xf32>
    %153 = vector.shape_cast %152 : vector<128x2xf32> to vector<2x8x8x2xf32>
    %c0_166 = arith.constant 0 : index
    %c0_167 = arith.constant 0 : index
    %c0_168 = arith.constant 0 : index
    %c0_169 = arith.constant 0 : index
    %154 = vector.load %arg18[%c0_166, %c0_167, %c0_168, %c0_169] : memref<2x8x8x2xf32, #tpu.memory_space<vmem>>, vector<2x8x8x2xf32>
    tpu.vector_store %arg18[%c0_166, %c0_167, %c0_168, %c0_169], %153 {strides = array<i32>} : memref<2x8x8x2xf32, #tpu.memory_space<vmem>>, vector<2x8x8x2xf32>,
    %155 = arith.negf %153 : vector<2x8x8x2xf32>
    %156 = math.exp %155 : vector<2x8x8x2xf32>
    %cst_170 = arith.constant 1.000000e+00 : f32
    %157 = vector.broadcast %cst_170 : f32 to vector<2x8x8x2xf32>
    %158 = arith.addf %157, %156 : vector<2x8x8x2xf32>
    %159 = arith.divf %157, %158 : vector<2x8x8x2xf32>
    %cst_171 = arith.constant dense<0.000000e+00> : vector<2x8x2xf32>
    %160 = vector.multi_reduction <add>, %159, %cst_171 [2] : vector<2x8x8x2xf32> to vector<2x8x2xf32>
    %cst_172 = arith.constant 8.000000e+00 : f32
    %161 = vector.broadcast %cst_172 : f32 to vector<2x8x2xf32>
    %162 = arith.divf %160, %161 : vector<2x8x2xf32>
    %c0_173 = arith.constant 0 : index
    %c0_174 = arith.constant 0 : index
    %c0_175 = arith.constant 0 : index
    %163 = vector.load %arg19[%c0_173, %c0_174, %c0_175] : memref<2x8x2xf32, #tpu.memory_space<vmem>>, vector<2x8x2xf32>
    tpu.vector_store %arg19[%c0_173, %c0_174, %c0_175], %162 {strides = array<i32>} : memref<2x8x2xf32, #tpu.memory_space<vmem>>, vector<2x8x2xf32>,
    %cst_176 = arith.constant dense<0.000000e+00> : vector<2x8x2xf32>
    %164 = vector.multi_reduction <add>, %159, %cst_176 [1] : vector<2x8x8x2xf32> to vector<2x8x2xf32>
    %cst_177 = arith.constant 8.000000e+00 : f32
    %165 = vector.broadcast %cst_177 : f32 to vector<2x8x2xf32>
    %166 = arith.divf %164, %165 : vector<2x8x2xf32>
    %c0_178 = arith.constant 0 : index
    %c0_179 = arith.constant 0 : index
    %c0_180 = arith.constant 0 : index
    %167 = vector.load %arg20[%c0_178, %c0_179, %c0_180] : memref<2x8x2xf32, #tpu.memory_space<vmem>>, vector<2x8x2xf32>
    tpu.vector_store %arg20[%c0_178, %c0_179, %c0_180], %166 {strides = array<i32>} : memref<2x8x2xf32, #tpu.memory_space<vmem>>, vector<2x8x2xf32>,
    %c0_181 = arith.constant 0 : index
    %c0_182 = arith.constant 0 : index
    %168 = vector.load %arg13[%c0_181, %c0_182] : memref<8x128xbf16, #tpu.memory_space<vmem>>, vector<8x128xbf16>
    %cst_183 = arith.constant dense<0.000000e+00> : vector<8x32xf32>
    %169 = tpu.matmul %168, %75, %cst_183 {dimension_numbers = #tpu.dot_dimension_numbers<[1], [0], [0], [1], [0, 0, 1, 1], [], []>} : vector<8x128xbf16>, vector<128x32xbf16>, vector<8x32xf32> -> vector<8x32xf32>
    %170 = arith.truncf %169 : vector<8x32xf32> to vector<8x32xbf16>
    %c0_184 = arith.constant 0 : index
    %c0_185 = arith.constant 0 : index
    %171 = vector.load %arg14[%c0_184, %c0_185] : memref<32x32xbf16, #tpu.memory_space<vmem>>, vector<32x32xbf16>
    %cst_186 = arith.constant dense<0.000000e+00> : vector<8x32xf32>
    %172 = tpu.matmul %170, %171, %cst_186 {dimension_numbers = #tpu.dot_dimension_numbers<[1], [0], [0], [1], [0, 0, 1, 1], [], []>} : vector<8x32xbf16>, vector<32x32xbf16>, vector<8x32xf32> -> vector<8x32xf32>
    %c0_187 = arith.constant 0 : index
    %c0_188 = arith.constant 0 : index
    %173 = vector.load %arg15[%c0_187, %c0_188] : memref<1x32xf32, #tpu.memory_space<vmem>>, vector<1x32xf32>
    %174 = vector.broadcast %173 : vector<1x32xf32> to vector<8x32xf32>
    %175 = arith.addf %172, %174 : vector<8x32xf32>
    %cst_189 = arith.constant 0.000000e+00 : f32
    %176 = vector.broadcast %cst_189 : f32 to vector<8x32xf32>
    %177 = arith.maximumf %175, %176 : vector<8x32xf32>
    %178 = arith.truncf %177 : vector<8x32xf32> to vector<8x32xbf16>
    %c0_190 = arith.constant 0 : index
    %c0_191 = arith.constant 0 : index
    %179 = vector.load %arg16[%c0_190, %c0_191] : memref<32x64xbf16, #tpu.memory_space<vmem>>, vector<32x64xbf16>
    %cst_192 = arith.constant dense<0.000000e+00> : vector<8x64xf32>
    %180 = tpu.matmul %178, %179, %cst_192 {dimension_numbers = #tpu.dot_dimension_numbers<[1], [0], [0], [1], [0, 0, 1, 1], [], []>} : vector<8x32xbf16>, vector<32x64xbf16>, vector<8x64xf32> -> vector<8x64xf32>
    %c0_193 = arith.constant 0 : index
    %c0_194 = arith.constant 0 : index
    %181 = vector.load %arg17[%c0_193, %c0_194] : memref<1x64xf32, #tpu.memory_space<vmem>>, vector<1x64xf32>
    %182 = vector.broadcast %181 : vector<1x64xf32> to vector<8x64xf32>
    %183 = arith.addf %180, %182 : vector<8x64xf32>
    %184 = vector.extract_strided_slice %183 {offsets = [0, 0], sizes = [4, 32], strides = [1, 1]} : vector<8x64xf32> to vector<4x32xf32>
    %185 = arith.truncf %184 : vector<4x32xf32> to vector<4x32xbf16>
    %186 = vector.extract_strided_slice %183 {offsets = [0, 32], sizes = [4, 32], strides = [1, 1]} : vector<8x64xf32> to vector<4x32xf32>
    %187 = arith.truncf %186 : vector<4x32xf32> to vector<4x32xbf16>
    %cst_195 = arith.constant dense<0.000000e+00> : vector<4x4xf32>
    %188 = tpu.matmul %185, %187, %cst_195 {dimension_numbers = #tpu.dot_dimension_numbers<[1], [1], [0], [0], [0, 0, 1, 0], [], []>} : vector<4x32xbf16>, vector<4x32xbf16>, vector<4x4xf32> -> vector<4x4xf32>
    %cst_196 = arith.constant 0.176776692 : f32
    %189 = vector.broadcast %cst_196 : f32 to vector<4x4xf32>
    %190 = arith.mulf %188, %189 : vector<4x4xf32>
    %c0_197 = arith.constant 0 : index
    %c0_198 = arith.constant 0 : index
    %c0_199 = arith.constant 0 : index
    %191 = vector.load %arg21[%c0_197, %c0_198, %c0_199] : memref<2x4x4xf32, #tpu.memory_space<vmem>>, vector<1x4x4xf32>
    %192 = vector.shape_cast %191 : vector<1x4x4xf32> to vector<4x4xf32>
    %193 = vector.shape_cast %190 : vector<4x4xf32> to vector<1x4x4xf32>
    tpu.vector_store %arg21[%c0_197, %c0_198, %c0_199], %193 {strides = array<i32>} : memref<2x4x4xf32, #tpu.memory_space<vmem>>, vector<1x4x4xf32>,
    %194 = vector.extract_strided_slice %183 {offsets = [4, 0], sizes = [4, 32], strides = [1, 1]} : vector<8x64xf32> to vector<4x32xf32>
    %195 = arith.truncf %194 : vector<4x32xf32> to vector<4x32xbf16>
    %196 = vector.extract_strided_slice %183 {offsets = [4, 32], sizes = [4, 32], strides = [1, 1]} : vector<8x64xf32> to vector<4x32xf32>
    %197 = arith.truncf %196 : vector<4x32xf32> to vector<4x32xbf16>
    %cst_200 = arith.constant dense<0.000000e+00> : vector<4x4xf32>
    %198 = tpu.matmul %195, %197, %cst_200 {dimension_numbers = #tpu.dot_dimension_numbers<[1], [1], [0], [0], [0, 0, 1, 0], [], []>} : vector<4x32xbf16>, vector<4x32xbf16>, vector<4x4xf32> -> vector<4x4xf32>
    %cst_201 = arith.constant 0.176776692 : f32
    %199 = vector.broadcast %cst_201 : f32 to vector<4x4xf32>
    %200 = arith.mulf %198, %199 : vector<4x4xf32>
    %c1_202 = arith.constant 1 : index
    %c0_203 = arith.constant 0 : index
    %c0_204 = arith.constant 0 : index
    %201 = vector.load %arg21[%c1_202, %c0_203, %c0_204] : memref<2x4x4xf32, #tpu.memory_space<vmem>>, vector<1x4x4xf32>
    %202 = vector.shape_cast %201 : vector<1x4x4xf32> to vector<4x4xf32>
    %203 = vector.shape_cast %200 : vector<4x4xf32> to vector<1x4x4xf32>
    tpu.vector_store %arg21[%c1_202, %c0_203, %c0_204], %203 {strides = array<i32>} : memref<2x4x4xf32, #tpu.memory_space<vmem>>, vector<1x4x4xf32>,
    return
  }
  func.func @transform_0(%arg0: i32) -> (i32, i32, i32, i32) {
    %c0_i32 = arith.constant 0 : i32
    %c0_i32_0 = arith.constant 0 : i32
    %c0_i32_1 = arith.constant 0 : i32
    %c0_i32_2 = arith.constant 0 : i32
    %c0_i32_3 = arith.constant 0 : i32
    return %c0_i32, %c0_i32_0, %c0_i32_1, %c0_i32_2 : i32, i32, i32, i32
  }
  func.func @transform_1(%arg0: i32) -> (i32, i32, i32) {
    %c0_i32 = arith.constant 0 : i32
    %c0_i32_0 = arith.constant 0 : i32
    %c0_i32_1 = arith.constant 0 : i32
    %c0_i32_2 = arith.constant 0 : i32
    return %c0_i32, %c0_i32_0, %c0_i32_1 : i32, i32, i32
  }
  func.func @transform_2(%arg0: i32) -> (i32, i32) {
    %c0_i32 = arith.constant 0 : i32
    %c0_i32_0 = arith.constant 0 : i32
    %c0_i32_1 = arith.constant 0 : i32
    return %c0_i32, %c0_i32_0 : i32, i32
  }
  func.func @transform_3(%arg0: i32) -> (i32, i32, i32) {
    %c0_i32 = arith.constant 0 : i32
    %c0_i32_0 = arith.constant 0 : i32
    %c0_i32_1 = arith.constant 0 : i32
    %c0_i32_2 = arith.constant 0 : i32
    return %c0_i32, %c0_i32_0, %c0_i32_1 : i32, i32, i32
  }
  func.func @transform_4(%arg0: i32) -> (i32, i32) {
    %c0_i32 = arith.constant 0 : i32
    %c0_i32_0 = arith.constant 0 : i32
    %c0_i32_1 = arith.constant 0 : i32
    return %c0_i32, %c0_i32_0 : i32, i32
  }
  func.func @transform_5(%arg0: i32) -> (i32, i32) {
    %c0_i32 = arith.constant 0 : i32
    %c0_i32_0 = arith.constant 0 : i32
    %c0_i32_1 = arith.constant 0 : i32
    return %c0_i32, %c0_i32_0 : i32, i32
  }
  func.func @transform_6(%arg0: i32) -> (i32, i32) {
    %c0_i32 = arith.constant 0 : i32
    %c0_i32_0 = arith.constant 0 : i32
    %c0_i32_1 = arith.constant 0 : i32
    return %c0_i32, %c0_i32_0 : i32, i32
  }
  func.func @transform_7(%arg0: i32) -> (i32, i32) {
    %c0_i32 = arith.constant 0 : i32
    %c0_i32_0 = arith.constant 0 : i32
    %c0_i32_1 = arith.constant 0 : i32
    return %c0_i32, %c0_i32_0 : i32, i32
  }
  func.func @transform_8(%arg0: i32) -> (i32, i32, i32) {
    %c0_i32 = arith.constant 0 : i32
    %c0_i32_0 = arith.constant 0 : i32
    %c0_i32_1 = arith.constant 0 : i32
    %c0_i32_2 = arith.constant 0 : i32
    return %c0_i32, %c0_i32_0, %c0_i32_1 : i32, i32, i32
  }
  func.func @transform_9(%arg0: i32) -> (i32, i32) {
    %c0_i32 = arith.constant 0 : i32
    %c0_i32_0 = arith.constant 0 : i32
    %c0_i32_1 = arith.constant 0 : i32
    return %c0_i32, %c0_i32_0 : i32, i32
  }
  func.func @transform_10(%arg0: i32) -> (i32, i32) {
    %c0_i32 = arith.constant 0 : i32
    %c0_i32_0 = arith.constant 0 : i32
    %c0_i32_1 = arith.constant 0 : i32
    return %c0_i32, %c0_i32_0 : i32, i32
  }
  func.func @transform_11(%arg0: i32) -> (i32, i32) {
    %c0_i32 = arith.constant 0 : i32
    %c0_i32_0 = arith.constant 0 : i32
    %c0_i32_1 = arith.constant 0 : i32
    return %c0_i32, %c0_i32_0 : i32, i32
  }
  func.func @transform_12(%arg0: i32) -> (i32, i32) {
    %c0_i32 = arith.constant 0 : i32
    %c0_i32_0 = arith.constant 0 : i32
    %c0_i32_1 = arith.constant 0 : i32
    return %c0_i32, %c0_i32_0 : i32, i32
  }
  func.func @transform_13(%arg0: i32) -> (i32, i32) {
    %c0_i32 = arith.constant 0 : i32
    %c0_i32_0 = arith.constant 0 : i32
    %c0_i32_1 = arith.constant 0 : i32
    return %c0_i32, %c0_i32_0 : i32, i32
  }
  func.func @transform_14(%arg0: i32) -> (i32, i32) {
    %c0_i32 = arith.constant 0 : i32
    %c0_i32_0 = arith.constant 0 : i32
    %c0_i32_1 = arith.constant 0 : i32
    return %c0_i32, %c0_i32_0 : i32, i32
  }
  func.func @transform_15(%arg0: i32) -> (i32, i32) {
    %c0_i32 = arith.constant 0 : i32
    %c0_i32_0 = arith.constant 0 : i32
    %c0_i32_1 = arith.constant 0 : i32
    return %c0_i32, %c0_i32_0 : i32, i32
  }
  func.func @transform_16(%arg0: i32) -> (i32, i32) {
    %c0_i32 = arith.constant 0 : i32
    %c0_i32_0 = arith.constant 0 : i32
    %c0_i32_1 = arith.constant 0 : i32
    return %c0_i32, %c0_i32_0 : i32, i32
  }
  func.func @transform_17(%arg0: i32) -> (i32, i32, i32, i32) {
    %c0_i32 = arith.constant 0 : i32
    %c0_i32_0 = arith.constant 0 : i32
    %c0_i32_1 = arith.constant 0 : i32
    %c0_i32_2 = arith.constant 0 : i32
    %c0_i32_3 = arith.constant 0 : i32
    return %c0_i32, %c0_i32_0, %c0_i32_1, %c0_i32_2 : i32, i32, i32, i32
  }
  func.func @transform_18(%arg0: i32) -> (i32, i32, i32) {
    %c0_i32 = arith.constant 0 : i32
    %c0_i32_0 = arith.constant 0 : i32
    %c0_i32_1 = arith.constant 0 : i32
    %c0_i32_2 = arith.constant 0 : i32
    return %c0_i32, %c0_i32_0, %c0_i32_1 : i32, i32, i32
  }
  func.func @transform_19(%arg0: i32) -> (i32, i32, i32) {
    %c0_i32 = arith.constant 0 : i32
    %c0_i32_0 = arith.constant 0 : i32
    %c0_i32_1 = arith.constant 0 : i32
    %c0_i32_2 = arith.constant 0 : i32
    return %c0_i32, %c0_i32_0, %c0_i32_1 : i32, i32, i32
  }
  func.func @transform_20(%arg0: i32) -> (i32, i32, i32) {
    %c0_i32 = arith.constant 0 : i32
    %c0_i32_0 = arith.constant 0 : i32
    %c0_i32_1 = arith.constant 0 : i32
    %c0_i32_2 = arith.constant 0 : i32
    return %c0_i32, %c0_i32_0, %c0_i32_1 : i32, i32, i32
  }
}

</mosaic_0001>

<bundles_post_ra>
// kernel: tile.12
= control target key start
LH: loop header
LB: loop body
LE: loop exit
PB: predicated region body
PF: predicated region fallthrough
CT: control target
= control target key end

     0   :  { %s22_s0 = inlined_call_operand.vmem [shape: f32[16], index: 0, kind: input, shape index: {}]   ;;  %s23_s1 = inlined_call_operand.vmem [shape: f32[4,16], index: 1, kind: output, shape index: {}]  }
   0x1   :  { %v4_v0 = vld [vmem:[%s22_s0] ss:$0 sm:$0xff] }
   0x2   :  { %5 = vst [vmem:[%s23_s1] sm:$0xf] %v4_v0 }

// kernel: tile.17
= control target key start
LH: loop header
LB: loop body
LE: loop exit
PB: predicated region body
PF: predicated region fallthrough
CT: control target
= control target key end

     0   :  { %vm7_vm0 = vcmask 130048   ;;  %s37_s8 = smov 16   ;;  %s38_s9 = smov 32   ;;  %vm13_vm1 = vcmask 523648   ;;  %vm19_vm2 = vcmask 392448   ;;  %vm25_vm3 = vcmask 261248   ;;  %s55_s0 = inlined_call_operand.vmem [shape: f32[4,16], index: 0, kind: input, shape index: {}]   ;;  %s56_s1 = inlined_call_operand.vmem [shape: f32[1,64], index: 1, kind: output, shape index: {}]  }
   0x1   :  { %v4_v0 = vld [vmem:[%s55_s0] sm:$0xf]  ;;  %s36_s0 = smov 48  }
   0x2   :  { %5 = vst [vmem:[#allocation1] sm:$0xf] %v4_v0 }
   0x9   :  { %v10_v1 = vld [vmem:[#allocation1 + $0x3] sm:$0x1]   ;;  %v22_v2 = vld [vmem:[#allocation1 + $0x1] sm:$0x1]   ;;  %v6_v3 = vld [vmem:[#allocation1] sm:$0x1]  }
   0xa   :  { %11 = vrot.lane.b32.xlu0 %v10_v1, %s36_s0  ;;  %23 = vrot.lane.b32.xlu1 %v22_v2, %s37_s8  ;;  %v16_v4 = vld [vmem:[#allocation1 + $0x2] sm:$0x1]   ;;  %8 = vst.msk [vmem:[#allocation0] sm:$0x1] %vm7_vm0, %v6_v3  }
   0xe   :  { %17 = vrot.lane.b32.xlu0 %v16_v4, %s38_s9 }
  0x7c   :  { %v12_v5 = vpop.permute.xlu0 %11   ;;  %v24_v6 = vpop.permute.xlu1 %23  }
  0x7d   :  { %14 = vst.msk [vmem:[#allocation0] sm:$0x1] %vm13_vm1, %v12_v5  }
  0x80   :  { %v18_v7 = vpop.permute.xlu0 %17  }
  0x81   :  { %20 = vst.msk [vmem:[#allocation0] sm:$0x1] %vm19_vm2, %v18_v7  }
  0x82   :  { %26 = vst.msk [vmem:[#allocation0] sm:$0x1] %vm25_vm3, %v24_v6  }
  0x89   :  { %v30_v8 = vld [vmem:[#allocation0] sm:$0x1] }
  0x8a   :  { %32 = vst [vmem:[%s56_s1] sm:$0x1] %v30_v8 }

// kernel: model_forward.1
= control target key start
LH: loop header
LB: loop body
LE: loop exit
PB: predicated region body
PF: predicated region fallthrough
CT: control target
= control target key end

     0   :  { %s8079_s0 = inlined_call_operand.vmem [shape: bf16[2,9,9,48], index: 0, kind: input, shape index: {}]   ;;  %s8080_s1 = inlined_call_operand.vmem [shape: bf16[4,48,64], index: 1, kind: input, shape index: {}]   ;;  %s8081_s2 = inlined_call_operand.vmem [shape: f32[1,64], index: 2, kind: input, shape index: {}]   ;;  %s8082_s3 = inlined_call_operand.vmem [shape: bf16[4,64,32], index: 3, kind: input, shape index: {}]   ;;  %s8083_s4 = inlined_call_operand.vmem [shape: f32[1,32], index: 4, kind: input, shape index: {}]   ;;  %s8084_s5 = inlined_call_operand.vmem [shape: bf16[32,32], index: 5, kind: input, shape index: {}]   ;;  %s8085_s6 = inlined_call_operand.vmem [shape: f32[1,32], index: 6, kind: input, shape index: {}]   ;;  %s8086_s7 = inlined_call_operand.vmem [shape: bf16[128,32], index: 7, kind: input, shape index: {}]   ;;  %s8087_s8 = inlined_call_operand.vmem [shape: bf16[9,32,64], index: 8, kind: input, shape index: {}]   ;;  %s8088_s9 = inlined_call_operand.vmem [shape: f32[1,64], index: 9, kind: input, shape index: {}]   ;;  %s8089_s10 = inlined_call_operand.vmem [shape: bf16[64,2], index: 10, kind: input, shape index: {}]   ;;  %s8090_s11 = inlined_call_operand.vmem [shape: f32[1,2], index: 11, kind: input, shape index: {}]   ;;  %s8091_s12 = inlined_call_operand.vmem [shape: bf16[8,128], index: 12, kind: input, shape index: {}]   ;;  %s8092_s13 = inlined_call_operand.vmem [shape: bf16[32,32], index: 13, kind: input, shape index: {}]   ;;  %s8093_s14 = inlined_call_operand.vmem [shape: f32[1,32], index: 14, kind: input, shape index: {}]   ;;  %s8094_s15 = inlined_call_operand.vmem [shape: bf16[32,64], index: 15, kind: input, shape index: {}]   ;;  %s8095_s16 = inlined_call_operand.vmem [shape: f32[1,64], index: 16, kind: input, shape index: {}]   ;;  %s8096_s17 = inlined_call_operand.vmem [shape: f32[2,8,8,2], index: 17, kind: output, shape index: {0}]   ;;  %s8097_s18 = inlined_call_operand.vmem [shape: f32[2,8,2], index: 18, kind: output, shape index: {1}]   ;;  %s8098_s19 = inlined_call_operand.vmem [shape: f32[2,8,2], index: 19, kind: output, shape index: {2}]   ;;  %s8099_s20 = inlined_call_operand.hbm [shape: f32[2,4,4], index: 20, kind: output, shape index: {3}]  }
   0x1   :  { %8122 = sst [smem:[#allocation24_spill]] %s8079_s0 }
   0x2   :  { %8123 = sst [smem:[#allocation25_spill]] %s8080_s1 }
   0x3   :  { %8124 = sst [smem:[#allocation26_spill]] %s8081_s2 }
   0x4   :  { %8125 = sst [smem:[#allocation27_spill]] %s8082_s3 }
   0x5   :  { %8126 = sst [smem:[#allocation28_spill]] %s8083_s4 }
   0x6   :  { %s8127_s23 = sld [smem:[#allocation25_spill]]  ;;  %s8128_s28 = sld [smem:[#allocation24_spill]]  ;;  %vm100_vm0 = vsmask.f32 3328  ;;  %vm101_vm1 = vsmask.f32 7440 }
   0x7   :  { %vm6546_vm2 = vmor %vm100_vm0, %vm101_vm1  ;;  %vm376_vm3 = vcmask 392192   ;;  %s8131_s25 = sld [smem:[#allocation27_spill]] }
   0xc   :  { %v6221_v0 = vld [vmem:[%s8127_s23 + $0x18] sm:$0xff]   ;;  %v6222_v1 = vld [vmem:[%s8127_s23 + $0x20] sm:$0xff]   ;;  %v6223_v2 = vld [vmem:[%s8127_s23 + $0x28] sm:$0xff]  }
   0xd   :  { %5535 = vmatprep.subr.bf16.mxu0 %v6221_v0  ;;  %v6504_v3 = vld [vmem:[%s8128_s28] sm:$0xf]  ;;  %v6509_v4 = vld [vmem:[%s8128_s28 + $0x8] sm:$0xf]  ;;  %v84_v5 = vld [vmem:[%s8128_s28 + $0x4] sm:$0x1] }
   0xe   :  { %5536 = vmatpush3.bf16.msra.mxu0 %v6221_v0  ;;  %v85_v6 = vld [vmem:[%s8128_s28 + $0xc] sm:$0x1]  ;;  %v104_v7 = vshrl.u32 %v6504_v3, 16  ;;  %v107_v8 = vshll.u32 %v6504_v3, 16  ;;  %v113_v9 = vshll.u32 %v84_v5, 16  ;;  %v118_v10 = vshrl.u32 %v6509_v4, 16 }
   0xf   :  { %5537 = vmatprep.subr.bf16.mxu0 %v6222_v1  ;;  %v6523_v11 = vld [vmem:[%s8128_s28 + $0x10] sm:$0xf]  ;;  %v121_v12 = vshll.u32 %v6509_v4, 16  ;;  %v127_v13 = vshll.u32 %v85_v6, 16  ;;  %v6529_v14 = vld [vmem:[%s8128_s28 + $0x18] sm:$0xf] }
  0x10   :  { %v86_v15 = vld [vmem:[%s8128_s28 + $0x14] sm:$0x1]  ;;  %v106_v16 = vrot.slane %v104_v7, 4  ;;  %v109_v17 = vrot.slane %v107_v8, 5  ;;  %v115_v18 = vrot.slane %v113_v9, 5  ;;  %v120_v19 = vrot.slane %v118_v10, 4 }
  0x11   :  { %v87_v20 = vld [vmem:[%s8128_s28 + $0x1c] sm:$0x1]  ;;  %v123_v21 = vrot.slane %v121_v12, 5  ;;  %v129_v22 = vrot.slane %v127_v13, 5  ;;  %v132_v23 = vshrl.u32 %v6523_v11, 16  ;;  %v135_v24 = vshll.u32 %v6523_v11, 16 }
  0x12   :  { %5538 = vmatpush3.bf16.msra.mxu0 %v6222_v1  ;;  %v110_v25 = vor.u32 %v109_v17, %v106_v16  ;;  %v141_v26 = vshll.u32 %v86_v15, 16  ;;  %v146_v27 = vshrl.u32 %v6529_v14, 16  ;;  %v149_v28 = vshll.u32 %v6529_v14, 16  ;;  %v6224_v29 = vld [vmem:[%s8127_s23] sm:$0xff]   ;;  %v6558_v39 = vld [vmem:[%s8128_s28 + $0x28] sm:$0xf] }
  0x13   :  { %5539 = vmatprep.subr.bf16.mxu0 %v6223_v2  ;;  %v124_v31 = vor.u32 %v123_v21, %v120_v19  ;;  %v134_v32 = vrot.slane %v132_v23, 4  ;;  %v137_v33 = vrot.slane %v135_v24, 5  ;;  %v155_v34 = vshll.u32 %v87_v20, 16  ;;  %v6553_v35 = vld [vmem:[%s8128_s28 + $0x20] sm:$0xf]  ;;  %v6225_v13 = vld [vmem:[%s8127_s23 + $0x8] sm:$0xff]  }
  0x14   :  { %v111_v36 = vrot.slane %v110_v25, 4  ;;  %v148_v37 = vrot.slane %v146_v27, 4  ;;  %v151_v38 = vrot.slane %v149_v28, 5  ;;  %v143_v42 = vrot.slane %v141_v26, 5  ;;  %v88_v44 = vld [vmem:[%s8128_s28 + $0x24] sm:$0x1] }
  0x15   :  { %v125_v40 = vrot.slane %v124_v31, 4  ;;  %v138_v41 = vor.u32 %v137_v33, %v134_v32  ;;  %v157_v43 = vrot.slane %v155_v34, 5  ;;  %v89_v47 = vld [vmem:[%s8128_s28 + $0x2c] sm:$0x1]  ;;  %v160_v48 = vshrl.u32 %v6553_v35, 16 }
  0x16   :  { %5540 = vmatpush3.bf16.msra.mxu0 %v6223_v2  ;;  %v116_v45 = vsel %vm6546_vm2, %v111_v36, %v115_v18  ;;  %v152_v46 = vor.u32 %v151_v38, %v148_v37  ;;  %v163_v49 = vshll.u32 %v6553_v35, 16  ;;  %v6573_v50 = vld [vmem:[%s8128_s28 + $0x30] sm:$0xf]  ;;  %v169_v53 = vshll.u32 %v88_v44, 16  ;;  %v6581_v55 = vld [vmem:[%s8128_s28 + $0x38] sm:$0xf] }
  0x17   :  { %5557 = vmatprep.subr.bf16.mxu0 %v6224_v29  ;;  %v130_v51 = vsel %vm6546_vm2, %v125_v40, %v129_v22  ;;  %v139_v52 = vrot.slane %v138_v41, 4  ;;  %v174_v54 = vshrl.u32 %v6558_v39, 16  ;;  %v162_v58 = vrot.slane %v160_v48, 4  ;;  %v90_v60 = vld [vmem:[%s8128_s28 + $0x34] sm:$0x1] }
  0x18   :  { %v4890_v56 = vcombine.low %v116_v45, %v130_v51  ;;  %v153_v57 = vrot.slane %v152_v46, 4  ;;  %v165_v59 = vrot.slane %v163_v49, 5  ;;  %v171_v62 = vrot.slane %v169_v53, 5  ;;  %v91_v6 = vld [vmem:[%s8128_s28 + $0x3c] sm:$0x1]  ;;  %v6226_v38 = vld [vmem:[%s8127_s23 + $0x10] sm:$0xff]  }
  0x19   :  { %v144_v61 = vsel %vm6546_vm2, %v139_v52, %v143_v42  ;;  %v176_v63 = vrot.slane %v174_v54, 4  ;;  %v177_v0 = vshll.u32 %v6558_v39, 16  ;;  %v183_v5 = vshll.u32 %v89_v47, 16  ;;  %v6603_v15 = vld [vmem:[%s8128_s28 + $0x48] sm:$0xf] }
  0x1a   :  { %5541 = vmatprep.mubr.msk.bf16.mxu0 %vm376_vm3, %v4890_v56  ;;  %v158_v1 = vsel %vm6546_vm2, %v153_v57, %v157_v43  ;;  %v166_v2 = vor.u32 %v165_v59, %v162_v58  ;;  %v188_v7 = vshrl.u32 %v6573_v50, 16  ;;  %v191_v10 = vshll.u32 %v6573_v50, 16  ;;  %v6609_v20 = vld [vmem:[%s8128_s28 + $0x50] sm:$0xf]  ;;  %v92_v25 = vld [vmem:[%s8128_s28 + $0x4c] sm:$0x1] }
  0x1b   :  { %v4891_v8 = vcombine.low %v144_v61, %v158_v1  ;;  %v179_v9 = vrot.slane %v177_v0, 5  ;;  %v197_v12 = vshll.u32 %v90_v60, 16  ;;  %v185_v17 = vrot.slane %v183_v5, 5  ;;  %v93_v31 = vld [vmem:[%s8128_s28 + $0x54] sm:$0x1] }
  0x1c   :  { %v167_v16 = vrot.slane %v166_v2, 4  ;;  %v190_v18 = vrot.slane %v188_v7, 4  ;;  %v202_v19 = vshrl.u32 %v6581_v55, 16  ;;  %v193_v22 = vrot.slane %v191_v10, 5  ;;  %v6635_v44 = vld [vmem:[%s8128_s28 + $0x60] sm:$0xf] }
  0x1d   :  { %5542 = vmatmul.mubr.msk.bf16.vlgmr.msra.gmra.mrb[0].mxu0 %vm376_vm3, %v4891_v8  ;;  %v180_v21 = vor.u32 %v179_v9, %v176_v63  ;;  %v199_v23 = vrot.slane %v197_v12, 5  ;;  %v205_v24 = vshll.u32 %v6581_v55, 16  ;;  %v211_v28 = vshll.u32 %v91_v6, 16  ;;  %v94_v49 = vld [vmem:[%s8128_s28 + $0x5c] sm:$0x1]  ;;  %v6648_v60 = vld [vmem:[%s8127_s23 + $0x30] sm:$0xff]  }
  0x1e   :  { %5558 = vmatpush3.bf16.msra.mxu0 %v6224_v29  ;;  %v172_v26 = vsel %vm6546_vm2, %v167_v16, %v171_v62  ;;  %v204_v27 = vrot.slane %v202_v19, 4  ;;  %v216_v32 = vshrl.u32 %v6603_v15, 16  ;;  %v194_v34 = vor.u32 %v193_v22, %v190_v18  ;;  %v6626_v29 = vld [vmem:[%s8128_s28 + $0x58] sm:$0xf]  ;;  %v95_v62 = vld [vmem:[%s8128_s28 + $0x64] sm:$0x1] }
  0x1f   :  { %v181_v33 = vrot.slane %v180_v21, 4  ;;  %v207_v36 = vrot.slane %v205_v24, 5  ;;  %5559 = vmatprep.subr.bf16.mxu0 %v6225_v13  ;;  %v219_v37 = vshll.u32 %v6603_v15, 16  ;;  %v213_v40 = vrot.slane %v211_v28, 5  ;;  %v6662_v8 = vld [vmem:[%s8128_s28 + $0x68] sm:$0xf] }
  0x20   :  { %v218_v41 = vrot.slane %v216_v32, 4  ;;  %v225_v42 = vshll.u32 %v92_v25, 16  ;;  %v230_v43 = vshrl.u32 %v6609_v20, 16  ;;  %v195_v46 = vrot.slane %v194_v34, 4  ;;  %v6667_v16 = vld [vmem:[%s8128_s28 + $0x70] sm:$0xf] }
  0x21   :  { %v186_v45 = vsel %vm6546_vm2, %v181_v33, %v185_v17  ;;  %v208_v47 = vor.u32 %v207_v36, %v204_v27  ;;  %v221_v48 = vrot.slane %v219_v37, 5  ;;  %v233_v54 = vshll.u32 %v6609_v20, 16  ;;  %v96_v17 = vld [vmem:[%s8128_s28 + $0x6c] sm:$0x1]  ;;  %v6684_v28 = vld [vmem:[%s8128_s28 + $0x78] sm:$0xf] }
  0x22   :  { %v4892_v51 = vcombine.low %v172_v26, %v186_v45  ;;  %5560 = vmatpush3.bf16.msra.mxu0 %v6225_v13  ;;  %v227_v52 = vrot.slane %v225_v42, 5  ;;  %v232_v53 = vrot.slane %v230_v43, 4  ;;  %v200_v56 = vsel %vm6546_vm2, %v195_v46, %v199_v23  ;;  %v97_v23 = vld [vmem:[%s8128_s28 + $0x74] sm:$0x1]  ;;  %v6691_v34 = vld [vmem:[%s8128_s28 + $0x80] sm:$0xf] }
  0x23   :  { %v209_v57 = vrot.slane %v208_v47, 4  ;;  %v222_v58 = vor.u32 %v221_v48, %v218_v41  ;;  %v239_v59 = vshll.u32 %v93_v31, 16  ;;  %5561 = vmatprep.subr.bf16.mxu0 %v6226_v38  ;;  %v235_v61 = vrot.slane %v233_v54, 5  ;;  %v98_v36 = vld [vmem:[%s8128_s28 + $0x7c] sm:$0x1] }
  0x24   :  { %5545 = vmatprep.mubr.msk.bf16.mxu0 %vm376_vm3, %v4892_v51  ;;  %v244_v63 = vshrl.u32 %v6626_v29, 16  ;;  %v247_v0 = vshll.u32 %v6626_v29, 16  ;;  %v253_v1 = vshll.u32 %v94_v49, 16  ;;  %v258_v7 = vshrl.u32 %v6635_v44, 16 }
  0x25   :  { %v214_v2 = vsel %vm6546_vm2, %v209_v57, %v213_v40  ;;  %v223_v5 = vrot.slane %v222_v58, 4  ;;  %v241_v6 = vrot.slane %v239_v59, 5  ;;  %v236_v10 = vor.u32 %v235_v61, %v232_v53 }
  0x26   :  { %v4893_v9 = vcombine.low %v200_v56, %v214_v2  ;;  %v246_v12 = vrot.slane %v244_v63, 4  ;;  %v249_v13 = vrot.slane %v247_v0, 5  ;;  %5562 = vmatpush3.bf16.msra.mxu0 %v6226_v38  ;;  %v255_v19 = vrot.slane %v253_v1, 5 }
  0x27   :  { %v228_v18 = vsel %vm6546_vm2, %v223_v5, %v227_v52  ;;  %v260_v21 = vrot.slane %v258_v7, 4  ;;  %v261_v22 = vshll.u32 %v6635_v44, 16  ;;  %5579 = vmatprep.subr.bf16.mxu0 %v6648_v60  ;;  %v237_v24 = vrot.slane %v236_v10, 4  ;;  %v99_v52 = vld [vmem:[%s8128_s28 + $0x84] sm:$0x1] }
  0x28   :  { %5546 = vmatmul.mubr.msk.bf16.gmra.mrb[4].mxu0 %vm376_vm3, %v4893_v9  ;;  %v250_v25 = vor.u32 %v249_v13, %v246_v12  ;;  %v267_v26 = vshll.u32 %v95_v62, 16  ;;  %v272_v27 = vshrl.u32 %v6662_v8, 16  ;;  %v275_v32 = vshll.u32 %v6662_v8, 16 }
  0x29   :  { %v263_v31 = vrot.slane %v261_v22, 5  ;;  %v286_v33 = vshrl.u32 %v6667_v16, 16  ;;  %v242_v37 = vsel %vm6546_vm2, %v237_v24, %v241_v6  ;;  %v281_v41 = vshll.u32 %v96_v17, 16 }
  0x2a   :  { %v251_v38 = vrot.slane %v250_v25, 4  ;;  %v274_v40 = vrot.slane %v272_v27, 4  ;;  %v4894_v42 = vcombine.low %v228_v18, %v242_v37  ;;  %v269_v45 = vrot.slane %v267_v26, 5 }
  0x2b   :  { %v264_v43 = vor.u32 %v263_v31, %v260_v21  ;;  %v277_v46 = vrot.slane %v275_v32, 5  ;;  %v288_v48 = vrot.slane %v286_v33, 4  ;;  %v289_v49 = vshll.u32 %v6667_v16, 16 }
  0x2c   :  { %v256_v47 = vsel %vm6546_vm2, %v251_v38, %v255_v19  ;;  %v295_v51 = vshll.u32 %v97_v23, 16  ;;  %5549 = vmatprep.mubr.msk.bf16.mxu0 %vm376_vm3, %v4894_v42  ;;  %v300_v56 = vshrl.u32 %v6684_v28, 16  ;;  %v303_v57 = vshll.u32 %v6684_v28, 16  ;;  %v4972_v42 = vld [vmem:[%s8128_s28 + $0x14] sm:$0x1] }
  0x2d   :  { %v265_v53 = vrot.slane %v264_v43, 4  ;;  %v278_v54 = vor.u32 %v277_v46, %v274_v40  ;;  %v283_v58 = vrot.slane %v281_v41, 5  ;;  %v291_v59 = vrot.slane %v289_v49, 5  ;;  %v6232_v40 = vld [vmem:[%s8127_s23 + $0x38] sm:$0xff]   ;;  %v4970_v41 = vld [vmem:[%s8128_s28 + $0xc] sm:$0x1] }
  0x2e   :  { %v309_v61 = vshll.u32 %v98_v36, 16  ;;  %v314_v62 = vshrl.u32 %v6691_v34, 16  ;;  %v302_v1 = vrot.slane %v300_v56, 4  ;;  %v305_v2 = vrot.slane %v303_v57, 5  ;;  %v6757_v46 = vld [vmem:[%s8127_s23 + $0x48] sm:$0xff]  }
  0x2f   :  { %v270_v63 = vsel %vm6546_vm2, %v265_v53, %v269_v45  ;;  %v279_v0 = vrot.slane %v278_v54, 4  ;;  %v292_v6 = vor.u32 %v291_v59, %v288_v48  ;;  %v297_v7 = vrot.slane %v295_v51, 5  ;;  %v4974_v49 = vld [vmem:[%s8128_s28 + $0x1c] sm:$0x1]  ;;  %v4976_v53 = vld [vmem:[%s8128_s28 + $0x24] sm:$0x1] }
  0x30   :  { %v4895_v5 = vcombine.low %v256_v47, %v270_v63  ;;  %v306_v9 = vor.u32 %v305_v2, %v302_v1  ;;  %v316_v10 = vrot.slane %v314_v62, 4  ;;  %v317_v12 = vshll.u32 %v6691_v34, 16  ;;  %v4977_v59 = vld [vmem:[%s8128_s28 + $0x28] sm:$0xf] }
  0x31   :  { %v323_v13 = vshll.u32 %v99_v52, 16  ;;  %v284_v17 = vsel %vm6546_vm2, %v279_v0, %v283_v58  ;;  %v293_v18 = vrot.slane %v292_v6, 4  ;;  %v311_v21 = vrot.slane %v309_v61, 5 }
  0x32   :  { %5550 = vmatmul.mubr.msk.bf16.gmra.mrb[8].mxu0 %vm376_vm3, %v4895_v5  ;;  %v307_v19 = vrot.slane %v306_v9, 4  ;;  %v319_v22 = vrot.slane %v317_v12, 5  ;;  %v4909_v33 = vcombine.low %v6504_v3, %v6509_v4  ;;  %v4910_v37 = vcombine.low %v6523_v11, %v6529_v14  ;;  %v4969_v3 = vld [vmem:[%s8128_s28 + $0x8] sm:$0xf]  ;;  %v6235_v4 = vld [vmem:[%s8127_s23 + $0x40] sm:$0xff]  }
  0x33   :  { %v298_v23 = vsel %vm6546_vm2, %v293_v18, %v297_v7  ;;  %v325_v26 = vrot.slane %v323_v13, 5  ;;  %v4911_v38 = vcombine.low %v6553_v35, %v6558_v39  ;;  %v4971_v11 = vld [vmem:[%s8128_s28 + $0x10] sm:$0xf]  ;;  %v929_v14 = vshrl.u32 %v4969_v3, 16 }
  0x34   :  { %v4896_v24 = vcombine.low %v284_v17, %v298_v23  ;;  %v320_v25 = vor.u32 %v319_v22, %v316_v10  ;;  %v312_v27 = vsel %vm6546_vm2, %v307_v19, %v311_v21  ;;  %v932_v35 = vshll.u32 %v4969_v3, 16 }
  0x35   :  { %v4912_v39 = vcombine.low %v6573_v50, %v6581_v55  ;;  %v943_v43 = vshrl.u32 %v4971_v11, 16  ;;  %v946_v45 = vshll.u32 %v4971_v11, 16  ;;  %v931_v50 = vrot.slane %v929_v14, 4 }
  0x36   :  { %5553 = vmatprep.mubr.msk.bf16.mxu0 %vm376_vm3, %v4896_v24  ;;  %v321_v31 = vrot.slane %v320_v25, 4  ;;  %v934_v55 = vrot.slane %v932_v35, 5  ;;  %v938_v47 = vshll.u32 %v4970_v41, 16  ;;  %v952_v48 = vshll.u32 %v4972_v42, 16  ;;  %v4980_v25 = vld [vmem:[%s8128_s28 + $0x34] sm:$0x1] }
  0x37   :  { %v945_v51 = vrot.slane %v943_v43, 4  ;;  %v948_v52 = vrot.slane %v946_v45, 5  ;;  %v966_v62 = vshll.u32 %v4974_v49, 16  ;;  %v4914_v63 = vcombine.low %v6626_v29, %v6635_v44  ;;  %v4978_v29 = vld [vmem:[%s8128_s28 + $0x2c] sm:$0x1] }
  0x38   :  { %v326_v32 = vsel %vm6546_vm2, %v321_v31, %v325_v26  ;;  %v935_v61 = vor.u32 %v934_v55, %v931_v50  ;;  %v4915_v0 = vcombine.low %v6662_v8, %v6667_v16  ;;  %v6781_v1 = vrot.slane %v938_v47, 5  ;;  %v4979_v44 = vld [vmem:[%s8128_s28 + $0x30] sm:$0xf]  ;;  %v4987_v42 = vld [vmem:[%s8128_s28 + $0x58] sm:$0xf] }
  0x39   :  { %v4897_v36 = vcombine.low %v312_v27, %v326_v32  ;;  %v6783_v2 = vrot.slane %v952_v48, 5  ;;  %v949_v5 = vor.u32 %v948_v52, %v945_v51  ;;  %v980_v6 = vshll.u32 %v4976_v53, 16  ;;  %v6238_v26 = vld [vmem:[%s8128_s28 + $0x8] ss:$8 sps:$4 sm:$0xff]   ;;  %v4981_v32 = vld [vmem:[%s8128_s28 + $0x38] sm:$0xf] }
  0x3a   :  { %v985_v7 = vshrl.u32 %v4977_v59, 16  ;;  %v988_v9 = vshll.u32 %v4977_v59, 16  ;;  %v6785_v18 = vrot.slane %v935_v61, 4  ;;  %v6787_v19 = vrot.slane %v966_v62, 5  ;;  %v6241_v48 = vld [vmem:[%s8128_s28 + $0x28] ss:$8 sps:$4 sm:$0xff]  }
  0x3b   :  { %5554 = vmatmul.mubr.msk.bf16.gmra.mrb[12].mxu0 %vm376_vm3, %v4897_v36  ;;  %v6797_v21 = vrot.slane %v949_v5, 4  ;;  %v6799_v24 = vrot.slane %v980_v6, 5  ;;  %v994_v27 = vshll.u32 %v4978_v29, 16  ;;  %v999_v31 = vshrl.u32 %v4979_v44, 16  ;;  %v6815_v36 = vld [vmem:[%s8128_s28 + $0x3c] sm:$0x1] }
  0x3c   :  { %5563 = vmatprep.mubr.msk.bf16.mxu0 %vm376_vm3, %v4909_v33  ;;  %v987_v8 = vrot.slane %v985_v7, 4  ;;  %v990_v16 = vrot.slane %v988_v9, 5  ;;  %v4916_v33 = vcombine.low %v6684_v28, %v6691_v34  ;;  %v1008_v3 = vshll.u32 %v4980_v25, 16  ;;  %v6243_v52 = vld [vmem:[%s8127_s23 + $0x50] sm:$0xff]   ;;  %v6246_v61 = vld [vmem:[%s8127_s23 + $0x58] sm:$0xff]   ;;  %v6871_v6 = vld [vmem:[%s8131_s25 + $0x20] sm:$0xff]  }
  0x3d   :  { %v6827_v28 = vrot.slane %v994_v27, 5  ;;  %v1001_v34 = vrot.slane %v999_v31, 4  ;;  %v1013_v35 = vshrl.u32 %v4981_v32, 16  ;;  %v1022_v55 = vshll.u32 %v6815_v36, 16  ;;  %v6244_v5 = vld [vmem:[%s8128_s28 + $0x50] ss:$8 sps:$4 sm:$0xff]  }
  0x3e   :  { %v6836_v50 = vrot.slane %v1008_v3, 5  ;;  %v6247_v7 = vld [vmem:[%s8128_s28 + $0x70] ss:$8 sps:$4 sm:$0xff]   ;;  %v4984_v9 = vld [vmem:[%s8128_s28 + $0x44] sm:$0x1] }
  0x3f   :  { %v6845_v49 = vrot.slane %v1013_v35, 4  ;;  %v6248_v29 = vld [vmem:[%s8128_s28 + $0x80] ss:$8 sps:$4 sm:$0xff]  }
  0x43   :  { %5564 = vmatmul.mubr.msk.bf16.vlgmr.msra.gmra.mrb[0].mxu0 %vm376_vm3, %v4910_v37  ;;  %v4983_v37 = vld [vmem:[%s8128_s28 + $0x40] sm:$0xf] }
  0x44   :  { %5580 = vmatpush3.bf16.msra.mxu0 %v6648_v60  ;;  %5567 = vmatprep.mubr.msk.bf16.mxu0 %vm376_vm3, %v4911_v38  ;;  %v4913_v60 = vcombine.low %v6603_v15, %v6609_v20  ;;  %v4973_v15 = vld [vmem:[%s8128_s28 + $0x18] sm:$0xf]  ;;  %v4975_v20 = vld [vmem:[%s8128_s28 + $0x20] sm:$0xf]  ;;  %v991_v38 = vor.u32 %v990_v16, %v987_v8  ;;  %v1030_v41 = vshll.u32 %v4983_v37, 16 }
  0x45   :  { %5581 = vmatprep.subr.bf16.mxu0 %v6232_v40  ;;  %v957_v54 = vshrl.u32 %v4973_v15, 16  ;;  %v960_v56 = vshll.u32 %v4973_v15, 16  ;;  %v971_v57 = vshrl.u32 %v4975_v20, 16  ;;  %v974_v58 = vshll.u32 %v4975_v20, 16  ;;  %v6239_v15 = vld [vmem:[%s8128_s28 + $0x18] ss:$8 sps:$4 sm:$0xff]  }
  0x46   :  { %v6834_v43 = vrot.slane %v991_v38, 4  ;;  %v4989_v8 = vld [vmem:[%s8128_s28 + $0x60] sm:$0xf] }
  0x47   :  { %v959_v10 = vrot.slane %v957_v54, 4  ;;  %v962_v12 = vrot.slane %v960_v56, 5  ;;  %v973_v13 = vrot.slane %v971_v57, 4  ;;  %v976_v17 = vrot.slane %v974_v58, 5 }
  0x48   :  { %5582 = vmatpush3.bf16.msra.mxu0 %v6232_v40  ;;  %v1002_v40 = vshll.u32 %v4979_v44, 16  ;;  %v6852_v54 = vrot.slane %v1030_v41, 5  ;;  %v1055_v56 = vshrl.u32 %v4987_v42, 16  ;;  %v1058_v57 = vshll.u32 %v4987_v42, 16  ;;  %v4988_v44 = vld [vmem:[%s8128_s28 + $0x5c] sm:$0x1] }
  0x49   :  { %5583 = vmatprep.subr.bf16.mxu0 %v6235_v4  ;;  %v963_v22 = vor.u32 %v962_v12, %v959_v10  ;;  %v977_v23 = vor.u32 %v976_v17, %v973_v13  ;;  %v4986_v10 = vld [vmem:[%s8128_s28 + $0x54] sm:$0x1]  ;;  %v941_v12 = vsel %vm6546_vm2, %v6785_v18, %v6781_v1  ;;  %v955_v13 = vsel %vm6546_vm2, %v6797_v21, %v6783_v2 }
  0x4a   :  { %v1004_v45 = vrot.slane %v1002_v40, 5  ;;  %v1057_v62 = vrot.slane %v1055_v56, 4  ;;  %v5007_v18 = vcombine.low %v941_v12, %v955_v13 }
  0x4b   :  { %5568 = vmatmul.mubr.msk.bf16.gmra.mrb[4].mxu0 %vm376_vm3, %v4912_v39  ;;  %v6823_v11 = vrot.slane %v963_v22, 4  ;;  %v6825_v14 = vrot.slane %v977_v23, 4  ;;  %v1016_v39 = vshll.u32 %v4981_v32, 16 }
  0x4c   :  { %5571 = vmatprep.mubr.msk.bf16.mxu0 %vm376_vm3, %v4913_v60  ;;  %5584 = vmatpush3.bf16.msra.mxu0 %v6235_v4  ;;  %v4985_v4 = vld [vmem:[%s8128_s28 + $0x50] sm:$0xf]  ;;  %v1027_v60 = vshrl.u32 %v4983_v37, 16  ;;  %v1005_v17 = vor.u32 %v1004_v45, %v1001_v34 }
  0x4d   :  { %5601 = vmatprep.subr.bf16.mxu0 %v6757_v46  ;;  %v1041_v20 = vshrl.u32 %v4985_v4, 16  ;;  %v1044_v47 = vshll.u32 %v4985_v4, 16  ;;  %v1018_v51 = vrot.slane %v1016_v39, 5  ;;  %v969_v1 = vsel %vm6546_vm2, %v6823_v11, %v6787_v19 }
  0x4e   :  { %v6850_v53 = vrot.slane %v1027_v60, 4  ;;  %v983_v2 = vsel %vm6546_vm2, %v6825_v14, %v6799_v24 }
  0x4f   :  { %v6854_v58 = vrot.slane %v1041_v20, 4  ;;  %v1046_v59 = vrot.slane %v1044_v47, 5 }
  0x53   :  { %5572 = vmatmul.mubr.msk.bf16.gmra.mrb[8].mxu0 %vm376_vm3, %v4914_v63  ;;  %v1060_v63 = vrot.slane %v1058_v57, 5 }
  0x54   :  { %5575 = vmatprep.mubr.msk.bf16.mxu0 %vm376_vm3, %v4915_v0  ;;  %v6242_v0 = vld [vmem:[%s8128_s28 + $0x38] ss:$8 sps:$4 sm:$0xff]  }
  0x5b   :  { %5576 = vmatmul.mubr.msk.bf16.gmra.mrb[12].mxu0 %vm376_vm3, %v4916_v33 }
  0x5c   :  { %5585 = vmatprep.mubr.msk.bf16.mxu0 %vm376_vm3, %v6238_v26 }
  0x63   :  { %5586 = vmatmul.mubr.msk.bf16.vlgmr.msra.gmra.mrb[0].mxu0 %vm376_vm3, %v6239_v15 }
  0x64   :  { %5602 = vmatpush3.bf16.msra.mxu0 %v6757_v46  ;;  %5589 = vmatprep.mubr.msk.bf16.mxu0 %vm376_vm3, %v6241_v48  ;;  %v6245_v46 = vld [vmem:[%s8128_s28 + $0x60] ss:$8 sps:$4 sm:$0xff]  }
  0x65   :  { %5603 = vmatprep.subr.bf16.mxu0 %v6243_v52 }
  0x68   :  { %5604 = vmatpush3.bf16.msra.mxu0 %v6243_v52 }
  0x69   :  { %5605 = vmatprep.subr.bf16.mxu0 %v6246_v61 }
  0x6b   :  { %5590 = vmatmul.mubr.msk.bf16.gmra.mrb[4].mxu0 %vm376_vm3, %v6242_v0 }
  0x6c   :  { %5593 = vmatprep.mubr.msk.bf16.mxu0 %vm376_vm3, %v6244_v5  ;;  %5606 = vmatpush3.bf16.msra.mxu0 %v6246_v61 }
  0x6d   :  { %5623 = vmatprep.subr.bf16.mxu0 %v6871_v6 }
  0x73   :  { %5594 = vmatmul.mubr.msk.bf16.gmra.mrb[8].mxu0 %vm376_vm3, %v6245_v46 }
  0x74   :  { %5597 = vmatprep.mubr.msk.bf16.mxu0 %vm376_vm3, %v6247_v7 }
  0x75   :  { %26 = vsyncpa [#allocation5], 0  ;;  %v1006_v16 = vrot.slane %v1005_v17, 4  ;;  %v1019_v21 = vor.u32 %v1018_v51, %v6845_v49  ;;  %v1036_v22 = vshll.u32 %v4984_v9, 16  ;;  %v1050_v23 = vshll.u32 %v4986_v10, 16  ;;  %v6253_v30 = vld [vmem:[%s8131_s25 + $0x68] sm:$0xff]  }
  0x76   :  { %v4991_v25 = vld [vmem:[%s8128_s28 + $0x68] sm:$0xf]  ;;  %v5008_v26 = vcombine.low %v969_v1, %v983_v2  ;;  %v997_v19 = vsel %vm6546_vm2, %v6834_v43, %v6827_v28  ;;  %v1024_v27 = vrot.slane %v1022_v55, 5  ;;  %v1033_v24 = vor.u32 %v6852_v54, %v6850_v53  ;;  %v4993_v36 = vld [vmem:[%s8128_s28 + $0x70] sm:$0xf]  ;;  %s8132_s23 = sld [smem:[#allocation26_spill]] }
  0x77   :  { %v1047_v31 = vor.u32 %v1046_v59, %v6854_v58  ;;  %v1064_v32 = vshll.u32 %v4988_v44, 16  ;;  %v1069_v33 = vshrl.u32 %v4989_v8, 16  ;;  %v4995_v37 = vld [vmem:[%s8128_s28 + $0x78] sm:$0xf]  ;;  %v1061_v38 = vor.u32 %v1060_v63, %v1057_v62  ;;  %v4990_v20 = vld [vmem:[%s8128_s28 + $0x64] sm:$0x1] }
  0x78   :  { %v1072_v40 = vshll.u32 %v4989_v8, 16  ;;  %v1083_v3 = vshrl.u32 %v4991_v25, 16  ;;  %v1086_v4 = vshll.u32 %v4991_v25, 16  ;;  %v1011_v11 = vsel %vm6546_vm2, %v1006_v16, %v6836_v50  ;;  %v4992_v51 = vld [vmem:[%s8128_s28 + $0x6c] sm:$0x1]  ;;  %s8133_s0 = sld [smem:[#allocation28_spill]] }
  0x79   :  { %v1020_v14 = vrot.slane %v1019_v21, 4  ;;  %v1038_v28 = vrot.slane %v1036_v22, 5  ;;  %v1052_v34 = vrot.slane %v1050_v23, 5  ;;  %v1097_v35 = vshrl.u32 %v4993_v36, 16  ;;  %v4997_v52 = vld [vmem:[%s8128_s28 + $0x80] sm:$0xf] }
  0x7a   :  { %v1100_v39 = vshll.u32 %v4993_v36, 16  ;;  %v1111_v60 = vshrl.u32 %v4995_v37, 16  ;;  %v1114_v41 = vshll.u32 %v4995_v37, 16  ;;  %v1034_v42 = vrot.slane %v1033_v24, 4  ;;  %v6250_v53 = vld [vmem:[%s8131_s25 + $0x28] sm:$0xff]  }
  0x7b   :  { %5598 = vmatmul.mubr.msk.bf16.gmra.mrb[12].mxu0 %vm376_vm3, %v6248_v29  ;;  %v1048_v43 = vrot.slane %v1047_v31, 4  ;;  %v1066_v45 = vrot.slane %v1064_v32, 5  ;;  %v1071_v55 = vrot.slane %v1069_v33, 4  ;;  %v1062_v15 = vrot.slane %v1061_v38, 4  ;;  %v4999_v59 = vld [vmem:[%s8128_s28 + $0x88] sm:$0xf] }
  0x7c   :  { %5607 = vmatprep.mubr.msk.bf16.mxu0 %vm376_vm3, %v5007_v18  ;;  %v1074_v47 = vrot.slane %v1072_v40, 5  ;;  %v1085_v48 = vrot.slane %v1083_v3, 4  ;;  %v1088_v49 = vrot.slane %v1086_v4, 5  ;;  %v5009_v50 = vcombine.low %v997_v19, %v1011_v11  ;;  %v4994_v5 = vld [vmem:[%s8128_s28 + $0x74] sm:$0x1] }
  0x7d   :  { %v1099_v54 = vrot.slane %v1097_v35, 4  ;;  %v1102_v56 = vrot.slane %v1100_v39, 5  ;;  %v1113_v57 = vrot.slane %v1111_v60, 4  ;;  %v1116_v58 = vrot.slane %v1114_v41, 5  ;;  %v4996_v46 = vld [vmem:[%s8128_s28 + $0x7c] sm:$0x1] }
  0x7e   :  { %v1025_v61 = vsel %vm6546_vm2, %v1020_v14, %v1024_v27  ;;  %v1039_v62 = vsel %vm6546_vm2, %v1034_v42, %v1038_v28  ;;  %v1053_v63 = vsel %vm6546_vm2, %v1048_v43, %v1052_v34  ;;  %v1078_v0 = vshll.u32 %v4990_v20, 16  ;;  %v4998_v19 = vld [vmem:[%s8128_s28 + $0x84] sm:$0x1]  ;;  %v5000_v38 = vld [vmem:[%s8128_s28 + $0x8c] sm:$0x1] }
  0x7f   :  { %v1067_v7 = vsel %vm6546_vm2, %v1062_v15, %v1066_v45  ;;  %v1075_v9 = vor.u32 %v1074_v47, %v1071_v55  ;;  %v1089_v10 = vor.u32 %v1088_v49, %v1085_v48  ;;  %v1092_v12 = vshll.u32 %v4992_v51, 16  ;;  %v6252_v47 = vld [vmem:[%s8131_s25 + $0x60] sm:$0xff]   ;;  %v6251_v49 = vld [vmem:[%s8131_s25 + $0x30] sm:$0xff]   ;;  %v6254_v51 = vld [vmem:[%s8131_s25 + $0x38] sm:$0xff]  }
  0x80   :  { %v1125_v13 = vshrl.u32 %v4997_v52, 16  ;;  %v1128_v17 = vshll.u32 %v4997_v52, 16  ;;  %v1139_v29 = vshrl.u32 %v4999_v59, 16  ;;  %v1142_v44 = vshll.u32 %v4999_v59, 16  ;;  %5695 = vmatprep.subr.bf16.mxu1 %v6252_v47  ;;  %v6256_v52 = vld [vmem:[%s8131_s25 + $0x78] sm:$0xff]  }
  0x81   :  { %v1103_v8 = vor.u32 %v1102_v56, %v1099_v54  ;;  %v1106_v1 = vshll.u32 %v4994_v5, 16  ;;  %v1117_v2 = vor.u32 %v1116_v58, %v1113_v57  ;;  %v1120_v18 = vshll.u32 %v4996_v46, 16  ;;  %5696 = vmatpush3.bf16.msra.mxu1 %v6252_v47  ;;  %v7088_v54 = vld [vmem:[%s8132_s23] ss:$0 sm:$0xff]  ;;  %v6260_v47 = vld [vmem:[%s8131_s25 + $0x18] sm:$0xff]  }
  0x82   :  { %v5010_v16 = vcombine.low %v1025_v61, %v1039_v62  ;;  %v1080_v21 = vrot.slane %v1078_v0, 5  ;;  %v5011_v22 = vcombine.low %v1053_v63, %v1067_v7  ;;  %v1076_v23 = vrot.slane %v1075_v9, 4  ;;  %5697 = vmatprep.subr.bf16.mxu1 %v6253_v30 }
  0x83   :  { %5608 = vmatmul.mubr.msk.bf16.vlgmr.msra.gmra.mrb[0].mxu0 %vm376_vm3, %v5008_v26  ;;  %v1090_v25 = vrot.slane %v1089_v10, 4  ;;  %v1094_v26 = vrot.slane %v1092_v12, 5  ;;  %v1127_v27 = vrot.slane %v1125_v13, 4  ;;  %v1130_v24 = vrot.slane %v1128_v17, 5 }
  0x84   :  { %5611 = vmatprep.mubr.msk.bf16.mxu0 %vm376_vm3, %v5009_v50  ;;  %5624 = vmatpush3.bf16.msra.mxu0 %v6871_v6  ;;  %v1141_v31 = vrot.slane %v1139_v29, 4  ;;  %v1144_v32 = vrot.slane %v1142_v44, 5  ;;  %v1104_v6 = vrot.slane %v1103_v8, 4  ;;  %v1108_v33 = vrot.slane %v1106_v1, 5  ;;  %v6255_v50 = vld [vmem:[%s8131_s25 + $0x70] sm:$0xff]  }
  0x85   :  { %5625 = vmatprep.subr.bf16.mxu0 %v6250_v53  ;;  %v1118_v36 = vrot.slane %v1117_v2, 4  ;;  %v1122_v37 = vrot.slane %v1120_v18, 5  ;;  %v1081_v40 = vsel %vm6546_vm2, %v1076_v23, %v1080_v21  ;;  %v1134_v3 = vshll.u32 %v4998_v19, 16  ;;  %5698 = vmatpush3.bf16.msra.mxu1 %v6253_v30 }
  0x86   :  { %v1095_v4 = vsel %vm6546_vm2, %v1090_v25, %v1094_v26  ;;  %v1131_v11 = vor.u32 %v1130_v24, %v1127_v27  ;;  %v1145_v14 = vor.u32 %v1144_v32, %v1141_v31  ;;  %v1148_v28 = vshll.u32 %v5000_v38, 16  ;;  %5699 = vmatprep.subr.bf16.mxu1 %v6255_v50 }
  0x87   :  { %v1109_v34 = vsel %vm6546_vm2, %v1104_v6, %v1108_v33  ;;  %v1123_v35 = vsel %vm6546_vm2, %v1118_v36, %v1122_v37  ;;  %v5012_v39 = vcombine.low %v1081_v40, %v1095_v4  ;;  %v1136_v60 = vrot.slane %v1134_v3, 5  ;;  %v6258_v6 = vld [vmem:[%s8131_s25 + $0x8] sm:$0xff]  }
  0x88   :  { %5626 = vmatpush3.bf16.msra.mxu0 %v6250_v53  ;;  %v5013_v41 = vcombine.low %v1109_v34, %v1123_v35  ;;  %v1132_v42 = vrot.slane %v1131_v11, 4  ;;  %v1146_v43 = vrot.slane %v1145_v14, 4  ;;  %v1150_v45 = vrot.slane %v1148_v28, 5  ;;  %v6257_v53 = vld [vmem:[%s8131_s25] sm:$0xff]   ;;  %v6259_v34 = vld [vmem:[%s8131_s25 + $0x10] sm:$0xff]  }
  0x89   :  { %vm1377_vm4 = vcmask 523264   ;;  %vm1379_vm5 = vcmask 516096   ;;  %v8103_v48 = vmov 0.0   ;;  %5627 = vmatprep.subr.bf16.mxu0 %v6251_v49  ;;  %5700 = vmatpush3.bf16.msra.mxu1 %v6255_v50  ;;  %vm2245_vm6 = vcmask 261120  }
  0x8a   :  { %v1137_v55 = vsel %vm6546_vm2, %v1132_v42, %v1136_v60  ;;  %v1151_v15 = vsel %vm6546_vm2, %v1146_v43, %v1150_v45  ;;  %1385 = vst.msk [vmem:[#allocation2 + $0x30] sm:$0xff] %vm1377_vm4, %v8103_v48  ;;  %1378 = vst.msk [vmem:[#allocation2] sm:$0xff] %vm1377_vm4, %v8103_v48  ;;  %5701 = vmatprep.subr.bf16.mxu1 %v6256_v52  ;;  %vm2440_vm7 = vcmask 254976   ;;  %vm6382_vm8 = vmmov 0  }
  0x8b   :  { %5612 = vmatmul.mubr.msk.bf16.gmra.mrb[4].mxu0 %vm376_vm3, %v5010_v16  ;;  %v5014_v20 = vcombine.low %v1137_v55, %v1151_v15  ;;  %1386 = vst.msk [vmem:[#allocation2 + $0x38] sm:$0x1] %vm1379_vm5, %v8103_v48  ;;  %1380 = vst.msk [vmem:[#allocation2 + $0x8] sm:$0x1] %vm1379_vm5, %v8103_v48  ;;  %vm4274_vm9 = vcmask 15360   ;;  %vm4532_vm10 = vcmask 1041409  }
  0x8c   :  { %5615 = vmatprep.mubr.msk.bf16.mxu0 %vm376_vm3, %v5011_v22  ;;  %1381 = vst.msk [vmem:[#allocation2 + $0x10] sm:$0xff] %vm1377_vm4, %v8103_v48  ;;  %1383 = vst.msk [vmem:[#allocation2 + $0x20] sm:$0xff] %vm1377_vm4, %v8103_v48  ;;  %5628 = vmatpush3.bf16.msra.mxu0 %v6251_v49  ;;  %vm4534_vm11 = vcmask 1042434   ;;  %vm4536_vm12 = vcmask 1043459   ;;  %vm4538_vm13 = vcmask 1044484   ;;  %vm4540_vm14 = vcmask 1045509  }
  0x8d   :  { %1382 = vst.msk [vmem:[#allocation2 + $0x18] sm:$0x1] %vm1379_vm5, %v8103_v48  ;;  %1384 = vst.msk [vmem:[#allocation2 + $0x28] sm:$0x1] %vm1379_vm5, %v8103_v48  ;;  %5629 = vmatprep.subr.bf16.mxu0 %v6254_v51  ;;  %5702 = vmatpush3.bf16.msra.mxu1 %v6256_v52  ;;  %vm4542_vm15 = vcmask 1046534   ;;  %vm4544_vm0 = vcmask 1047559  }
  0x8e   :  { %1387 = vst.msk [vmem:[#allocation2 + $0x40] sm:$0xff] %vm1377_vm4, %v8103_v48  ;;  %1389 = vst.msk [vmem:[#allocation2 + $0x50] sm:$0xff] %vm1377_vm4, %v8103_v48  ;;  %vm4802_vm1 = vcmask 27648  }
  0x8f   :  { %1388 = vst.msk [vmem:[#allocation2 + $0x48] sm:$0x1] %vm1379_vm5, %v8103_v48  ;;  %1390 = vst.msk [vmem:[#allocation2 + $0x58] sm:$0x1] %vm1379_vm5, %v8103_v48 }
  0x90   :  { %1391 = vst.msk [vmem:[#allocation2 + $0x60] sm:$0xff] %vm1377_vm4, %v8103_v48  ;;  %1393 = vst.msk [vmem:[#allocation2 + $0x70] sm:$0xff] %vm1377_vm4, %v8103_v48  ;;  %5630 = vmatpush3.bf16.msra.mxu0 %v6254_v51 }
  0x91   :  { %1392 = vst.msk [vmem:[#allocation2 + $0x68] sm:$0x1] %vm1379_vm5, %v8103_v48  ;;  %1394 = vst.msk [vmem:[#allocation2 + $0x78] sm:$0x1] %vm1379_vm5, %v8103_v48  ;;  %5647 = vmatprep.subr.bf16.mxu0 %v6257_v53 }
  0x92   :  { %1395 = vst.msk [vmem:[#allocation2 + $0x80] sm:$0xff] %vm1377_vm4, %v8103_v48  ;;  %1397 = vst.msk [vmem:[#allocation2 + $0x90] sm:$0xff] %vm1377_vm4, %v8103_v48  ;;  %v1464_v2 = vld [vmem:[#allocation2 + $0x1] sm:$0xff] }
  0x93   :  { %5616 = vmatmul.mubr.msk.bf16.gmra.mrb[8].mxu0 %vm376_vm3, %v5012_v39  ;;  %1396 = vst.msk [vmem:[#allocation2 + $0x88] sm:$0x1] %vm1379_vm5, %v8103_v48  ;;  %1398 = vst.msk [vmem:[#allocation2 + $0x98] sm:$0x1] %vm1379_vm5, %v8103_v48 }
  0x94   :  { %5619 = vmatprep.mubr.msk.bf16.mxu0 %vm376_vm3, %v5013_v41  ;;  %1399 = vst.msk [vmem:[#allocation2 + $0xa0] sm:$0xff] %vm1377_vm4, %v8103_v48  ;;  %1401 = vst.msk [vmem:[#allocation2 + $0xb0] sm:$0xff] %vm1377_vm4, %v8103_v48 }
  0x95   :  { %1400 = vst.msk [vmem:[#allocation2 + $0xa8] sm:$0x1] %vm1379_vm5, %v8103_v48  ;;  %1402 = vst.msk [vmem:[#allocation2 + $0xb8] sm:$0x1] %vm1379_vm5, %v8103_v48 }
  0x96   :  { %1403 = vst.msk [vmem:[#allocation2 + $0xc0] sm:$0xff] %vm1377_vm4, %v8103_v48  ;;  %1405 = vst.msk [vmem:[#allocation2 + $0xd0] sm:$0xff] %vm1377_vm4, %v8103_v48 }
  0x97   :  { %1404 = vst.msk [vmem:[#allocation2 + $0xc8] sm:$0x1] %vm1379_vm5, %v8103_v48  ;;  %1406 = vst.msk [vmem:[#allocation2 + $0xd8] sm:$0x1] %vm1379_vm5, %v8103_v48 }
  0x98   :  { %1407 = vst.msk [vmem:[#allocation2 + $0xe0] sm:$0xff] %vm1377_vm4, %v8103_v48  ;;  %1409 = vst.msk [vmem:[#allocation2 + $0xf0] sm:$0xff] %vm1377_vm4, %v8103_v48 }
  0x99   :  { %1408 = vst.msk [vmem:[#allocation2 + $0xe8] sm:$0x1] %vm1379_vm5, %v8103_v48  ;;  %1410 = vst.msk [vmem:[#allocation2 + $0xf8] sm:$0x1] %vm1379_vm5, %v8103_v48 }
  0x9a   :  { %1411 = vst.msk [vmem:[#allocation2 + $0x100] sm:$0xff] %vm1377_vm4, %v8103_v48  ;;  %1413 = vst.msk [vmem:[#allocation2 + $0x110] sm:$0xff] %vm1377_vm4, %v8103_v48 }
  0x9b   :  { %5620 = vmatmul.mubr.msk.bf16.gmra.mrb[12].mxu0 %vm376_vm3, %v5014_v20  ;;  %1412 = vst.msk [vmem:[#allocation2 + $0x108] sm:$0x1] %vm1379_vm5, %v8103_v48  ;;  %1414 = vst.msk [vmem:[#allocation2 + $0x118] sm:$0x1] %vm1379_vm5, %v8103_v48 }
  0x9c   :  { %2439 = vst.msk [vmem:[#allocation3] sm:$0xff] %vm2245_vm6, %v8103_v48  ;;  %2442 = vst.msk [vmem:[#allocation3 + $0x10] sm:$0xff] %vm2245_vm6, %v8103_v48 }
  0x9d   :  { %2444 = vst.msk [vmem:[#allocation3 + $0x20] sm:$0xff] %vm2245_vm6, %v8103_v48  ;;  %2446 = vst.msk [vmem:[#allocation3 + $0x30] sm:$0xff] %vm2245_vm6, %v8103_v48 }
  0x9e   :  { %2448 = vst.msk [vmem:[#allocation3 + $0x40] sm:$0xff] %vm2245_vm6, %v8103_v48  ;;  %2450 = vst.msk [vmem:[#allocation3 + $0x50] sm:$0xff] %vm2245_vm6, %v8103_v48 }
  0x9f   :  { %2452 = vst.msk [vmem:[#allocation3 + $0x60] sm:$0xff] %vm2245_vm6, %v8103_v48  ;;  %2454 = vst.msk [vmem:[#allocation3 + $0x70] sm:$0xff] %vm2245_vm6, %v8103_v48 }
  0xa0   :  { %2456 = vst.msk [vmem:[#allocation3 + $0x80] sm:$0xff] %vm2245_vm6, %v8103_v48  ;;  %2458 = vst.msk [vmem:[#allocation3 + $0x90] sm:$0xff] %vm2245_vm6, %v8103_v48 }
  0xa1   :  { %2460 = vst.msk [vmem:[#allocation3 + $0xa0] sm:$0xff] %vm2245_vm6, %v8103_v48  ;;  %2462 = vst.msk [vmem:[#allocation3 + $0xb0] sm:$0xff] %vm2245_vm6, %v8103_v48 }
  0xa2   :  { %2464 = vst.msk [vmem:[#allocation3 + $0xc0] sm:$0xff] %vm2245_vm6, %v8103_v48  ;;  %2466 = vst.msk [vmem:[#allocation3 + $0xd0] sm:$0xff] %vm2245_vm6, %v8103_v48 }
  0xa3   :  { %2468 = vst.msk [vmem:[#allocation3 + $0xe0] sm:$0xff] %vm2245_vm6, %v8103_v48  ;;  %2470 = vst.msk [vmem:[#allocation3 + $0xf0] sm:$0xff] %vm2245_vm6, %v8103_v48 }
  0xa4   :  { %2472 = vst.msk [vmem:[#allocation3 + $0x100] sm:$0xff] %vm2245_vm6, %v8103_v48  ;;  %2474 = vst.msk [vmem:[#allocation3 + $0x110] sm:$0xff] %vm2245_vm6, %v8103_v48 }
  0xa5   :  { %2476 = vst.msk [vmem:[#allocation3 + $0x120] sm:$0xff] %vm2245_vm6, %v8103_v48  ;;  %2478 = vst.msk [vmem:[#allocation3 + $0x130] sm:$0xff] %vm2245_vm6, %v8103_v48 }
  0xa6   :  { %2447 = vst.msk [vmem:[#allocation3 + $0x38] sm:$0x3] %vm2440_vm7, %v8103_v48  ;;  %2441 = vst.msk [vmem:[#allocation3 + $0x8] sm:$0x3] %vm2440_vm7, %v8103_v48 }
  0xa7   :  { %2443 = vst.msk [vmem:[#allocation3 + $0x18] sm:$0x3] %vm2440_vm7, %v8103_v48  ;;  %2445 = vst.msk [vmem:[#allocation3 + $0x28] sm:$0x3] %vm2440_vm7, %v8103_v48 }
  0xa8   :  { %2449 = vst.msk [vmem:[#allocation3 + $0x48] sm:$0x3] %vm2440_vm7, %v8103_v48  ;;  %2451 = vst.msk [vmem:[#allocation3 + $0x58] sm:$0x3] %vm2440_vm7, %v8103_v48 }
  0xa9   :  { %2453 = vst.msk [vmem:[#allocation3 + $0x68] sm:$0x3] %vm2440_vm7, %v8103_v48  ;;  %2455 = vst.msk [vmem:[#allocation3 + $0x78] sm:$0x3] %vm2440_vm7, %v8103_v48 }
  0xaa   :  { %2457 = vst.msk [vmem:[#allocation3 + $0x88] sm:$0x3] %vm2440_vm7, %v8103_v48  ;;  %2459 = vst.msk [vmem:[#allocation3 + $0x98] sm:$0x3] %vm2440_vm7, %v8103_v48 }
  0xab   :  { %2461 = vst.msk [vmem:[#allocation3 + $0xa8] sm:$0x3] %vm2440_vm7, %v8103_v48  ;;  %2463 = vst.msk [vmem:[#allocation3 + $0xb8] sm:$0x3] %vm2440_vm7, %v8103_v48 }
  0xac   :  { %2465 = vst.msk [vmem:[#allocation3 + $0xc8] sm:$0x3] %vm2440_vm7, %v8103_v48  ;;  %2467 = vst.msk [vmem:[#allocation3 + $0xd8] sm:$0x3] %vm2440_vm7, %v8103_v48 }
  0xad   :  { %2469 = vst.msk [vmem:[#allocation3 + $0xe8] sm:$0x3] %vm2440_vm7, %v8103_v48  ;;  %2471 = vst.msk [vmem:[#allocation3 + $0xf8] sm:$0x3] %vm2440_vm7, %v8103_v48 }
  0xae   :  { %2473 = vst.msk [vmem:[#allocation3 + $0x108] sm:$0x3] %vm2440_vm7, %v8103_v48  ;;  %2475 = vst.msk [vmem:[#allocation3 + $0x118] sm:$0x3] %vm2440_vm7, %v8103_v48 }
  0xaf   :  { %2477 = vst.msk [vmem:[#allocation3 + $0x128] sm:$0x3] %vm2440_vm7, %v8103_v48  ;;  %2479 = vst.msk [vmem:[#allocation3 + $0x138] sm:$0x3] %vm2440_vm7, %v8103_v48 }
 0x156   :  { %v5609_v56 = vpop.f32.mrb[0].mxu0 }
 0x157   :  { %v1347_v57 = vadd.f32 %v5609_v56, %v7088_v54  ;;  %v1259_v58 = vpop.f32.mrb[1].mxu0 }
 0x158   :  { %v1345_v59 = vadd.f32 %v7088_v54, %v1259_v58  ;;  %v5610_v61 = vpop.f32.mrb[2].mxu0  ;;  %v1472_v58 = vld [vmem:[#allocation2 + $0x91] sm:$0xff] }
 0x159   :  { %v1363_v62 = vmax.f32 %v1347_v57, 0.0  ;;  %v1348_v63 = vadd.f32 %v5610_v61, %v7088_v54  ;;  %v1262_v0 = vpop.f32.mrb[3].mxu0 }
 0x15a   :  { %v1361_v5 = vmax.f32 %v1345_v59, 0.0  ;;  %v1346_v46 = vadd.f32 %v7088_v54, %v1262_v0 }
 0x15b   :  { %1418 = vst.msk [vmem:[#allocation2 + $0x31] sm:$0xff] %vm1377_vm4, %v1363_v62  ;;  %v1364_v7 = vmax.f32 %v1348_v63, 0.0  ;;  %v6261_v62 = vld [vmem:[%s8131_s25 + $0x40] sm:$0xff]  }
 0x15c   :  { %1416 = vst.msk [vmem:[#allocation2 + $0x11] sm:$0xff] %vm1377_vm4, %v1361_v5  ;;  %v1362_v9 = vmax.f32 %v1346_v46, 0.0 }
 0x15d   :  { %1419 = vst.msk [vmem:[#allocation2 + $0x41] sm:$0xff] %vm1377_vm4, %v1364_v7 }
 0x15e   :  { %1417 = vst.msk [vmem:[#allocation2 + $0x21] sm:$0xff] %vm1377_vm4, %v1362_v9  ;;  %v5613_v10 = vpop.f32.mrb[4].mxu0 }
 0x15f   :  { %v1351_v12 = vadd.f32 %v5613_v10, %v7088_v54  ;;  %v1275_v13 = vpop.f32.mrb[5].mxu0 }
 0x160   :  { %v1349_v17 = vadd.f32 %v7088_v54, %v1275_v13  ;;  %v5614_v29 = vpop.f32.mrb[6].mxu0 }
 0x161   :  { %v1367_v44 = vmax.f32 %v1351_v12, 0.0  ;;  %v1352_v8 = vadd.f32 %v5614_v29, %v7088_v54  ;;  %v1278_v1 = vpop.f32.mrb[7].mxu0 }
 0x162   :  { %v1365_v18 = vmax.f32 %v1349_v17, 0.0  ;;  %v1350_v16 = vadd.f32 %v7088_v54, %v1278_v1  ;;  %v1467_v27 = vld [vmem:[#allocation2 + $0x31] sm:$0xff] }
 0x163   :  { %1422 = vst.msk [vmem:[#allocation2 + $0x71] sm:$0xff] %vm1377_vm4, %v1367_v44  ;;  %v1368_v21 = vmax.f32 %v1352_v8, 0.0  ;;  %v1465_v22 = vld [vmem:[#allocation2 + $0x11] sm:$0xff]  ;;  %v1432_v44 = vld [vmem:[#allocation2] sm:$0xff] }
 0x164   :  { %1420 = vst.msk [vmem:[#allocation2 + $0x51] sm:$0xff] %vm1377_vm4, %v1365_v18  ;;  %v1366_v23 = vmax.f32 %v1350_v16, 0.0  ;;  %v1480_v25 = vpack.c.bf16 %v1465_v22, %v1464_v2  ;;  %v1984_v26 = vld [vmem:[#allocation2 + $0x41] sm:$0xff]  ;;  %v1433_v8 = vld [vmem:[#allocation2 + $0x10] sm:$0xff] }
 0x165   :  { %1423 = vst.msk [vmem:[#allocation2 + $0x81] sm:$0xff] %vm1377_vm4, %v1368_v21  ;;  %v1466_v19 = vld [vmem:[#allocation2 + $0x21] sm:$0xff]  ;;  %v1998_v37 = vpack.c.bf16 %v1984_v26, %v1467_v27 }
 0x166   :  { %1421 = vst.msk [vmem:[#allocation2 + $0x61] sm:$0xff] %vm1377_vm4, %v1366_v23  ;;  %v5617_v24 = vpop.f32.mrb[8].mxu0  ;;  %5631 = vmatprep.mubr.msk.bf16.mxu0 %vm1377_vm4, %v1480_v25  ;;  %v1481_v31 = vpack.c.bf16 %v1467_v27, %v1466_v19  ;;  %v1997_v32 = vpack.c.bf16 %v1466_v19, %v1465_v22  ;;  %v1448_v22 = vpack.c.bf16 %v1433_v8, %v1432_v44  ;;  %v1434_v25 = vld [vmem:[#allocation2 + $0x20] sm:$0xff]  ;;  %v1435_v19 = vld [vmem:[#allocation2 + $0x30] sm:$0xff] }
 0x167   :  { %v1355_v33 = vadd.f32 %v5617_v24, %v7088_v54  ;;  %v1291_v36 = vpop.f32.mrb[9].mxu0  ;;  %v1449_v27 = vpack.c.bf16 %v1435_v19, %v1434_v25  ;;  %v1436_v24 = vld [vmem:[#allocation2 + $0x40] sm:$0xff] }
 0x168   :  { %v1353_v38 = vadd.f32 %v7088_v54, %v1291_v36  ;;  %v5618_v40 = vpop.f32.mrb[10].mxu0  ;;  %5632 = vmatmul.mubr.msk.bf16.vlgmr.msra.gmra.mrb[16].mxu0 %vm1377_vm4, %v1481_v31  ;;  %5703 = vmatprep.mubr.msk.bf16.mxu1 %vm1377_vm4, %v1997_v32  ;;  %v6262_v31 = vld [vmem:[%s8131_s25 + $0x48] sm:$0xff]   ;;  %v1440_v36 = vld [vmem:[#allocation2 + $0x90] sm:$0xff]  ;;  %v7235_v44 = vld [vmem:[%s8133_s0] ss:$0 sm:$0xff] }
 0x169   :  { %v1371_v3 = vmax.f32 %v1355_v33, 0.0  ;;  %v1356_v4 = vadd.f32 %v5618_v40, %v7088_v54  ;;  %v1294_v11 = vpop.f32.mrb[11].mxu0  ;;  %5648 = vmatpush3.bf16.msra.mxu0 %v6257_v53  ;;  %5704 = vmatmul.mubr.msk.bf16.vlgmr.msra.gmra.mrb[0].mxu1 %vm1377_vm4, %v1998_v37 }
 0x16a   :  { %v1369_v14 = vmax.f32 %v1353_v38, 0.0  ;;  %v1354_v28 = vadd.f32 %v7088_v54, %v1294_v11  ;;  %5649 = vmatprep.subr.bf16.mxu0 %v6258_v6  ;;  %v1471_v45 = vld [vmem:[#allocation2 + $0x71] sm:$0xff] }
 0x16b   :  { %1426 = vst.msk [vmem:[#allocation2 + $0xc1] sm:$0xff] %vm1377_vm4, %v1371_v3  ;;  %v1372_v35 = vmax.f32 %v1356_v4, 0.0  ;;  %v1469_v39 = vld [vmem:[#allocation2 + $0x51] sm:$0xff] }
 0x16c   :  { %1424 = vst.msk [vmem:[#allocation2 + $0xa1] sm:$0xff] %vm1377_vm4, %v1369_v14  ;;  %v1370_v60 = vmax.f32 %v1354_v28, 0.0  ;;  %v1482_v41 = vpack.c.bf16 %v1469_v39, %v1984_v26  ;;  %v1988_v42 = vld [vmem:[#allocation2 + $0x81] sm:$0xff]  ;;  %v1437_v26 = vld [vmem:[#allocation2 + $0x50] sm:$0xff]  ;;  %v6264_v3 = vld [vmem:[%s8131_s25 + $0x58] sm:$0xff]  }
 0x16d   :  { %1427 = vst.msk [vmem:[#allocation2 + $0xd1] sm:$0xff] %vm1377_vm4, %v1372_v35  ;;  %v1470_v43 = vld [vmem:[#allocation2 + $0x61] sm:$0xff]  ;;  %5650 = vmatpush3.bf16.msra.mxu0 %v6258_v6  ;;  %v2000_v50 = vpack.c.bf16 %v1988_v42, %v1471_v45  ;;  %v1450_v32 = vpack.c.bf16 %v1437_v26, %v1436_v24  ;;  %v6263_v6 = vld [vmem:[%s8131_s25 + $0x50] sm:$0xff]  }
 0x16e   :  { %1425 = vst.msk [vmem:[#allocation2 + $0xb1] sm:$0xff] %vm1377_vm4, %v1370_v60  ;;  %v5621_v55 = vpop.f32.mrb[12].mxu0  ;;  %5635 = vmatprep.mubr.msk.bf16.mxu0 %vm1377_vm4, %v1482_v41  ;;  %v1483_v15 = vpack.c.bf16 %v1471_v45, %v1470_v43  ;;  %v1999_v20 = vpack.c.bf16 %v1470_v43, %v1469_v39  ;;  %5651 = vmatprep.subr.bf16.mxu0 %v6259_v34  ;;  %v1438_v33 = vld [vmem:[#allocation2 + $0x60] sm:$0xff]  ;;  %v1439_v38 = vld [vmem:[#allocation2 + $0x70] sm:$0xff] }
 0x16f   :  { %v1359_v30 = vadd.f32 %v5621_v55, %v7088_v54  ;;  %v1307_v49 = vpop.f32.mrb[13].mxu0  ;;  %v1451_v40 = vpack.c.bf16 %v1439_v38, %v1438_v33  ;;  %v1803_v43 = vpack.c.bf16 %v1434_v25, %v1433_v8  ;;  %v1804_v45 = vpack.c.bf16 %v1436_v24, %v1435_v19 }
 0x170   :  { %v1357_v51 = vadd.f32 %v7088_v54, %v1307_v49  ;;  %v5622_v52 = vpop.f32.mrb[14].mxu0  ;;  %5636 = vmatmul.mubr.msk.bf16.gmra.mrb[20].mxu0 %vm1377_vm4, %v1483_v15  ;;  %5707 = vmatprep.mubr.msk.bf16.mxu1 %vm1377_vm4, %v1999_v20  ;;  %v1805_v55 = vpack.c.bf16 %v1438_v33, %v1437_v26  ;;  %v1794_v15 = vld [vmem:[#allocation2 + $0x80] sm:$0xff] }
 0x171   :  { %v1375_v53 = vmax.f32 %v1359_v30, 0.0  ;;  %v1360_v56 = vadd.f32 %v5622_v52, %v7088_v54  ;;  %v1310_v57 = vpop.f32.mrb[15].mxu0  ;;  %5708 = vmatmul.mubr.msk.bf16.gmra.mrb[4].mxu1 %vm1377_vm4, %v2000_v50  ;;  %5652 = vmatpush3.bf16.msra.mxu0 %v6259_v34  ;;  %v1806_v20 = vpack.c.bf16 %v1794_v15, %v1439_v38  ;;  %v6265_v52 = vld [vmem:[%s8084_s5] sm:$0xff]  }
 0x172   :  { %v1373_v59 = vmax.f32 %v1357_v51, 0.0  ;;  %v1358_v61 = vadd.f32 %v7088_v54, %v1310_v57  ;;  %5653 = vmatprep.subr.bf16.mxu0 %v6260_v47  ;;  %v1475_v10 = vld [vmem:[#allocation2 + $0xc1] sm:$0xff] }
 0x173   :  { %1430 = vst.msk [vmem:[#allocation2 + $0x101] sm:$0xff] %vm1377_vm4, %v1375_v53  ;;  %v1376_v63 = vmax.f32 %v1360_v56, 0.0  ;;  %v1473_v0 = vld [vmem:[#allocation2 + $0xa1] sm:$0xff]  ;;  %v6267_v56 = vld [vmem:[%s8087_s8 + $0x10] sm:$0xff]  }
 0x174   :  { %1428 = vst.msk [vmem:[#allocation2 + $0xe1] sm:$0xff] %vm1377_vm4, %v1373_v59  ;;  %v1374_v5 = vmax.f32 %v1358_v61, 0.0  ;;  %v1484_v46 = vpack.c.bf16 %v1473_v0, %v1472_v58  ;;  %v1992_v7 = vld [vmem:[#allocation2 + $0xd1] sm:$0xff]  ;;  %v1441_v37 = vld [vmem:[#allocation2 + $0xa0] sm:$0xff]  ;;  %v6266_v53 = vld [vmem:[%s8084_s5 + $0x8] sm:$0xff]   ;;  %5739 = vmatprep.subr.bf16.mxu1 %v6267_v56 }
 0x175   :  { %1431 = vst.msk [vmem:[#allocation2 + $0x111] sm:$0xff] %vm1377_vm4, %v1376_v63  ;;  %v1474_v9 = vld [vmem:[#allocation2 + $0xb1] sm:$0xff]  ;;  %5654 = vmatpush3.bf16.msra.mxu0 %v6260_v47  ;;  %v2002_v13 = vpack.c.bf16 %v1992_v7, %v1475_v10  ;;  %v1452_v4 = vpack.c.bf16 %v1441_v37, %v1440_v36  ;;  %v1443_v28 = vld [vmem:[#allocation2 + $0xc0] sm:$0xff]  ;;  %5740 = vmatpush3.bf16.msra.mxu1 %v6267_v56 }
 0x176   :  { %1429 = vst.msk [vmem:[#allocation2 + $0xf1] sm:$0xff] %vm1377_vm4, %v1374_v5  ;;  %5639 = vmatprep.mubr.msk.bf16.mxu0 %vm1377_vm4, %v1484_v46  ;;  %v1485_v54 = vpack.c.bf16 %v1475_v10, %v1474_v9  ;;  %v2001_v12 = vpack.c.bf16 %v1474_v9, %v1473_v0  ;;  %5671 = vmatprep.subr.bf16.mxu0 %v6261_v62  ;;  %v1442_v11 = vld [vmem:[#allocation2 + $0xb0] sm:$0xff] }
 0x177   :  { %v1453_v34 = vpack.c.bf16 %v1443_v28, %v1442_v11  ;;  %v1444_v35 = vld [vmem:[#allocation2 + $0xd0] sm:$0xff]  ;;  %v1807_v47 = vpack.c.bf16 %v1442_v11, %v1441_v37 }
 0x178   :  { %5640 = vmatmul.mubr.msk.bf16.gmra.mrb[24].mxu0 %vm1377_vm4, %v1485_v54  ;;  %5711 = vmatprep.mubr.msk.bf16.mxu1 %vm1377_vm4, %v2001_v12  ;;  %v1808_v30 = vpack.c.bf16 %v1444_v35, %v1443_v28 }
 0x179   :  { %5712 = vmatmul.mubr.msk.bf16.gmra.mrb[8].mxu1 %vm1377_vm4, %v2002_v13 }
 0x17a   :  { %v1479_v18 = vld [vmem:[#allocation2 + $0x101] sm:$0xff] }
 0x17b   :  { %v1477_v17 = vld [vmem:[#allocation2 + $0xe1] sm:$0xff] }
 0x17c   :  { %v1486_v29 = vpack.c.bf16 %v1477_v17, %v1992_v7  ;;  %v1996_v1 = vld [vmem:[#allocation2 + $0x111] sm:$0xff]  ;;  %v1445_v14 = vld [vmem:[#allocation2 + $0xe0] sm:$0xff] }
 0x17d   :  { %v1478_v2 = vld [vmem:[#allocation2 + $0xf1] sm:$0xff]  ;;  %v2004_v23 = vpack.c.bf16 %v1996_v1, %v1479_v18  ;;  %v1454_v39 = vpack.c.bf16 %v1445_v14, %v1444_v35  ;;  %v1447_v41 = vld [vmem:[#allocation2 + $0x100] sm:$0xff] }
 0x17e   :  { %5643 = vmatprep.mubr.msk.bf16.mxu0 %vm1377_vm4, %v1486_v29  ;;  %v1487_v16 = vpack.c.bf16 %v1479_v18, %v1478_v2  ;;  %v2003_v21 = vpack.c.bf16 %v1478_v2, %v1477_v17  ;;  %v1446_v60 = vld [vmem:[#allocation2 + $0xf0] sm:$0xff] }
 0x17f   :  { %v1455_v42 = vpack.c.bf16 %v1447_v41, %v1446_v60  ;;  %v1809_v49 = vpack.c.bf16 %v1446_v60, %v1445_v14  ;;  %v1802_v50 = vld [vmem:[#allocation2 + $0x110] sm:$0xff] }
 0x180   :  { %5644 = vmatmul.mubr.msk.bf16.gmra.mrb[28].mxu0 %vm1377_vm4, %v1487_v16  ;;  %5715 = vmatprep.mubr.msk.bf16.mxu1 %vm1377_vm4, %v2003_v21  ;;  %v1810_v51 = vpack.c.bf16 %v1802_v50, %v1447_v41 }
 0x181   :  { %5655 = vmatprep.mubr.msk.bf16.mxu0 %vm1377_vm4, %v1448_v22  ;;  %5716 = vmatmul.mubr.msk.bf16.gmra.mrb[12].mxu1 %vm1377_vm4, %v2004_v23 }
 0x188   :  { %5656 = vmatmul.mubr.msk.bf16.vlgmr.msra.gmra.mrb[16].mxu0 %vm1377_vm4, %v1449_v27 }
 0x189   :  { %5659 = vmatprep.mubr.msk.bf16.mxu0 %vm1377_vm4, %v1450_v32  ;;  %5672 = vmatpush3.bf16.msra.mxu0 %v6261_v62 }
 0x18a   :  { %5673 = vmatprep.subr.bf16.mxu0 %v6262_v31 }
 0x18d   :  { %5674 = vmatpush3.bf16.msra.mxu0 %v6262_v31 }
 0x18e   :  { %5675 = vmatprep.subr.bf16.mxu0 %v6263_v6 }
 0x190   :  { %5660 = vmatmul.mubr.msk.bf16.gmra.mrb[20].mxu0 %vm1377_vm4, %v1451_v40 }
 0x191   :  { %5663 = vmatprep.mubr.msk.bf16.mxu0 %vm1377_vm4, %v1452_v4  ;;  %5676 = vmatpush3.bf16.msra.mxu0 %v6263_v6 }
 0x192   :  { %5677 = vmatprep.subr.bf16.mxu0 %v6264_v3 }
 0x195   :  { %5678 = vmatpush3.bf16.msra.mxu0 %v6264_v3 }
 0x196   :  { %5719 = vmatprep.subr.bf16.mxu0 %v6265_v52 }
 0x198   :  { %5664 = vmatmul.mubr.msk.bf16.gmra.mrb[24].mxu0 %vm1377_vm4, %v1453_v34 }
 0x199   :  { %5667 = vmatprep.mubr.msk.bf16.mxu0 %vm1377_vm4, %v1454_v39 }
 0x1a0   :  { %5668 = vmatmul.mubr.msk.bf16.gmra.mrb[28].mxu0 %vm1377_vm4, %v1455_v42 }
 0x1a1   :  { %5679 = vmatprep.mubr.msk.bf16.mxu0 %vm1377_vm4, %v1803_v43 }
 0x1a8   :  { %5680 = vmatmul.mubr.msk.bf16.vlgmr.msra.gmra.mrb[16].mxu0 %vm1377_vm4, %v1804_v45 }
 0x1a9   :  { %5683 = vmatprep.mubr.msk.bf16.mxu0 %vm1377_vm4, %v1805_v55  ;;  %5720 = vmatpush3.bf16.msra.mxu0 %v6265_v52 }
 0x1aa   :  { %5721 = vmatprep.subr.bf16.mxu0 %v6266_v53 }
 0x1ad   :  { %5722 = vmatpush3.bf16.msra.mxu0 %v6266_v53 }
 0x1b0   :  { %5684 = vmatmul.mubr.msk.bf16.gmra.mrb[20].mxu0 %vm1377_vm4, %v1806_v20 }
 0x1b1   :  { %5687 = vmatprep.mubr.msk.bf16.mxu0 %vm1377_vm4, %v1807_v47 }
 0x1b8   :  { %5688 = vmatmul.mubr.msk.bf16.gmra.mrb[24].mxu0 %vm1377_vm4, %v1808_v30 }
 0x1b9   :  { %5691 = vmatprep.mubr.msk.bf16.mxu0 %vm1377_vm4, %v1809_v49 }
 0x1c0   :  { %5692 = vmatmul.mubr.msk.bf16.gmra.mrb[28].mxu0 %vm1377_vm4, %v1810_v51 }
 0x23c   :  { %v5705_v57 = vpop.f32.mrb[0].mxu1 }
 0x23d   :  { %v2096_v58 = vpop.f32.mrb[1].mxu1 }
 0x23e   :  { %v5706_v59 = vpop.f32.mrb[2].mxu1 }
 0x23f   :  { %v2099_v61 = vpop.f32.mrb[3].mxu1 }
 0x244   :  { %v5709_v62 = vpop.f32.mrb[4].mxu1 }
 0x245   :  { %v2112_v63 = vpop.f32.mrb[5].mxu1 }
 0x246   :  { %v5710_v0 = vpop.f32.mrb[6].mxu1 }
 0x247   :  { %v2115_v5 = vpop.f32.mrb[7].mxu1 }
 0x24c   :  { %v5713_v46 = vpop.f32.mrb[8].mxu1 }
 0x24d   :  { %v2128_v7 = vpop.f32.mrb[9].mxu1 }
 0x24e   :  { %v5714_v9 = vpop.f32.mrb[10].mxu1 }
 0x24f   :  { %v2131_v10 = vpop.f32.mrb[11].mxu1 }
 0x254   :  { %v7224_v54 = vpop.f32.mrb[12].mxu1 }
 0x255   :  { %v7226_v12 = vpop.f32.mrb[13].mxu1 }
 0x256   :  { %v7228_v13 = vpop.f32.mrb[14].mxu1 }
 0x257   :  { %v7230_v17 = vpop.f32.mrb[15].mxu1 }
 0x27b   :  { %v5681_v29 = vpop.f32.mrb[16].mxu0 }
 0x27c   :  { %v5991_v8 = vadd.f32 %v5705_v57, %v5681_v29  ;;  %v1902_v1 = vpop.f32.mrb[17].mxu0 }
 0x27d   :  { %v5992_v2 = vadd.f32 %v2096_v58, %v1902_v1  ;;  %v5682_v18 = vpop.f32.mrb[18].mxu0 }
 0x27e   :  { %v2184_v16 = vadd.f32 %v5991_v8, %v7235_v44  ;;  %v5993_v21 = vadd.f32 %v5706_v59, %v5682_v18  ;;  %v1905_v22 = vpop.f32.mrb[19].mxu0 }
 0x27f   :  { %v2182_v23 = vadd.f32 %v5992_v2, %v7235_v44  ;;  %v5994_v25 = vadd.f32 %v2099_v61, %v1905_v22 }
 0x280   :  { %v2185_v26 = vadd.f32 %v5993_v21, %v7235_v44  ;;  %v2200_v27 = vmax.f32 %v2184_v16, 0.0 }
 0x281   :  { %v2183_v19 = vadd.f32 %v5994_v25, %v7235_v44  ;;  %v2198_v31 = vmax.f32 %v2182_v23, 0.0 }
 0x282   :  { %v2201_v24 = vmax.f32 %v2185_v26, 0.0 }
 0x283   :  { %v2199_v32 = vmax.f32 %v2183_v19, 0.0  ;;  %v5685_v6 = vpop.f32.mrb[20].mxu0 }
 0x284   :  { %v2215_v33 = vpack.c.bf16 %v2201_v24, %v2200_v27  ;;  %v5995_v36 = vadd.f32 %v5709_v62, %v5685_v6  ;;  %v1918_v37 = vpop.f32.mrb[21].mxu0  ;;  %v5305_v27 = vld [vmem:[%s8086_s7 + $0x8] sm:$0xff]   ;;  %v5274_v24 = vld [vmem:[%s8086_s7] sm:$0xff]  }
 0x285   :  { %v2214_v38 = vpack.c.bf16 %v2199_v32, %v2198_v31  ;;  %v5996_v40 = vadd.f32 %v2112_v63, %v1918_v37  ;;  %v5686_v3 = vpop.f32.mrb[22].mxu0  ;;  %v5279_v6 = vunpack.c.l.bf16 %v5305_v27  ;;  %v5275_v37 = vunpack.c.l.bf16 %v5274_v24 }
 0x286   :  { %v2188_v4 = vadd.f32 %v5995_v36, %v7235_v44  ;;  %v5997_v11 = vadd.f32 %v5710_v0, %v5686_v3  ;;  %v1921_v14 = vpop.f32.mrb[23].mxu0 }
 0x287   :  { %v2186_v28 = vadd.f32 %v5996_v40, %v7235_v44  ;;  %v5998_v34 = vadd.f32 %v2115_v5, %v1921_v14  ;;  %5723 = vmatprep.mubr.msk.bf16.mxu0 %vm2245_vm6, %v2214_v38 }
 0x288   :  { %v2189_v35 = vadd.f32 %v5997_v11, %v7235_v44  ;;  %5724 = vmatmul.mubr.msk.bf16.vlgmr.msra.gmra.mrb[32].mxu0 %vm2245_vm6, %v2215_v33  ;;  %v2204_v60 = vmax.f32 %v2188_v4, 0.0  ;;  %v5280_v4 = vunpack.c.h.bf16 %v5305_v27 }
 0x289   :  { %v2187_v39 = vadd.f32 %v5998_v34, %v7235_v44  ;;  %v2202_v42 = vmax.f32 %v2186_v28, 0.0  ;;  %v5276_v34 = vunpack.c.h.bf16 %v5274_v24 }
 0x28a   :  { %v2205_v41 = vmax.f32 %v2189_v35, 0.0 }
 0x28b   :  { %v2203_v43 = vmax.f32 %v2187_v39, 0.0  ;;  %v5689_v45 = vpop.f32.mrb[24].mxu0 }
 0x28c   :  { %v2217_v55 = vpack.c.bf16 %v2205_v41, %v2204_v60  ;;  %v5999_v15 = vadd.f32 %v5713_v46, %v5689_v45  ;;  %v1934_v20 = vpop.f32.mrb[25].mxu0  ;;  %v5306_v45 = vld [vmem:[%s8086_s7 + $0x10] sm:$0xff]  }
 0x28d   :  { %v2216_v47 = vpack.c.bf16 %v2203_v43, %v2202_v42  ;;  %v6000_v30 = vadd.f32 %v2128_v7, %v1934_v20  ;;  %v5690_v49 = vpop.f32.mrb[26].mxu0  ;;  %v5307_v42 = vld [vmem:[%s8086_s7 + $0x18] sm:$0xff]  }
 0x28e   :  { %v2192_v50 = vadd.f32 %v5999_v15, %v7235_v44  ;;  %v6001_v51 = vadd.f32 %v5714_v9, %v5690_v49  ;;  %v1937_v52 = vpop.f32.mrb[27].mxu0 }
 0x28f   :  { %v2190_v53 = vadd.f32 %v6000_v30, %v7235_v44  ;;  %v6002_v56 = vadd.f32 %v2131_v10, %v1937_v52  ;;  %5727 = vmatprep.mubr.msk.bf16.mxu0 %vm2245_vm6, %v2216_v47  ;;  %v5287_v30 = vunpack.c.l.bf16 %v5307_v42  ;;  %v5283_v52 = vunpack.c.l.bf16 %v5306_v45 }
 0x290   :  { %v2193_v57 = vadd.f32 %v6001_v51, %v7235_v44  ;;  %5728 = vmatmul.mubr.msk.bf16.gmra.mrb[36].mxu0 %vm2245_vm6, %v2217_v55  ;;  %v2208_v59 = vmax.f32 %v2192_v50, 0.0 }
 0x291   :  { %v2191_v58 = vadd.f32 %v6002_v56, %v7235_v44  ;;  %v2206_v62 = vmax.f32 %v2190_v53, 0.0 }
 0x292   :  { %v2209_v61 = vmax.f32 %v2193_v57, 0.0 }
 0x293   :  { %v2207_v63 = vmax.f32 %v2191_v58, 0.0  ;;  %v5693_v0 = vpop.f32.mrb[28].mxu0  ;;  %v5288_v58 = vunpack.c.h.bf16 %v5307_v42 }
 0x294   :  { %v2219_v5 = vpack.c.bf16 %v2209_v61, %v2208_v59  ;;  %v6003_v46 = vadd.f32 %v7224_v54, %v5693_v0  ;;  %v1950_v7 = vpop.f32.mrb[29].mxu0 }
 0x295   :  { %v2218_v9 = vpack.c.bf16 %v2207_v63, %v2206_v62  ;;  %v6004_v10 = vadd.f32 %v7226_v12, %v1950_v7  ;;  %v5694_v29 = vpop.f32.mrb[30].mxu0  ;;  %v5284_v63 = vunpack.c.h.bf16 %v5306_v45 }
 0x296   :  { %v2196_v8 = vadd.f32 %v6003_v46, %v7235_v44  ;;  %v6005_v1 = vadd.f32 %v7228_v13, %v5694_v29  ;;  %v1953_v2 = vpop.f32.mrb[31].mxu0  ;;  %v6268_v13 = vld [vmem:[%s8087_s8 + $0x18] sm:$0xff]   ;;  %v2525_v46 = vld [vmem:[#allocation3 + $0x1] sm:$0xff] }
 0x297   :  { %v2194_v18 = vadd.f32 %v6004_v10, %v7235_v44  ;;  %v6006_v16 = vadd.f32 %v7230_v17, %v1953_v2  ;;  %5731 = vmatprep.mubr.msk.bf16.mxu0 %vm2245_vm6, %v2218_v9  ;;  %5741 = vmatprep.subr.bf16.mxu1 %v6268_v13  ;;  %v7311_v17 = vld [vmem:[%s8087_s8] sm:$0xff]   ;;  %v5309_v10 = vld [vmem:[%s8086_s7 + $0x28] sm:$0xff]  }
 0x298   :  { %v2197_v21 = vadd.f32 %v6005_v1, %v7235_v44  ;;  %5732 = vmatmul.mubr.msk.bf16.gmra.mrb[40].mxu0 %vm2245_vm6, %v2219_v5  ;;  %v2212_v22 = vmax.f32 %v2196_v8, 0.0  ;;  %5742 = vmatpush3.bf16.msra.mxu1 %v6268_v13  ;;  %v5308_v8 = vld [vmem:[%s8086_s7 + $0x20] sm:$0xff]  }
 0x299   :  { %v2195_v54 = vadd.f32 %v6006_v16, %v7235_v44  ;;  %v2210_v23 = vmax.f32 %v2194_v18, 0.0  ;;  %5759 = vmatprep.subr.bf16.mxu1 %v7311_v17  ;;  %v7317_v44 = vld [vmem:[%s8085_s6] ss:$0 sm:$0xff] }
 0x29a   :  { %v2213_v12 = vmax.f32 %v2197_v21, 0.0 }
 0x29b   :  { %v2211_v25 = vmax.f32 %v2195_v54, 0.0 }
 0x29c   :  { %v2221_v26 = vpack.c.bf16 %v2213_v12, %v2212_v22 }
 0x29d   :  { %v2220_v19 = vpack.c.bf16 %v2211_v25, %v2210_v23  ;;  %v5295_v23 = vunpack.c.l.bf16 %v5309_v10 }
 0x29f   :  { %5735 = vmatprep.mubr.msk.bf16.mxu0 %vm2245_vm6, %v2220_v19 }
 0x2a0   :  { %5736 = vmatmul.mubr.msk.bf16.gmra.mrb[44].mxu0 %vm2245_vm6, %v2221_v26 }
 0x35b   :  { %v5725_v31 = vpop.f32.mrb[32].mxu0 }
 0x35c   :  { %v2313_v32 = vadd.f32 %v5725_v31, %v7317_v44  ;;  %v2304_v33 = vpop.f32.mrb[33].mxu0  ;;  %v5291_v31 = vunpack.c.l.bf16 %v5308_v8 }
 0x35d   :  { %v2305_v36 = vadd.f32 %v7317_v44, %v2304_v33  ;;  %v5726_v38 = vpop.f32.mrb[34].mxu0  ;;  %v6270_v33 = vld [vmem:[%s8087_s8 + $0x8] sm:$0xff]  }
 0x35e   :  { %v2369_v40 = vmax.f32 %v2313_v32, 0.0  ;;  %v2316_v3 = vadd.f32 %v5726_v38, %v7317_v44  ;;  %v2307_v11 = vpop.f32.mrb[35].mxu0 }
 0x35f   :  { %v2367_v14 = vmax.f32 %v2305_v36, 0.0  ;;  %v2308_v28 = vadd.f32 %v7317_v44, %v2307_v11 }
 0x360   :  { %v7329_v35 = vadd.f32 %v5279_v6, %v2369_v40  ;;  %v2370_v39 = vmax.f32 %v2316_v3, 0.0  ;;  %v5296_v40 = vunpack.c.h.bf16 %v5309_v10 }
 0x361   :  { %v7331_v60 = vadd.f32 %v5275_v37, %v2367_v14  ;;  %v2368_v41 = vmax.f32 %v2308_v28, 0.0 }
 0x362   :  { %8134 = vst [vmem:[#allocation7_spill] sm:$0xff] %v7329_v35  ;;  %2483 = vst.msk [vmem:[#allocation3 + $0x31] sm:$0xff] %vm2245_vm6, %v7329_v35  ;;  %v7338_v43 = vadd.f32 %v5280_v4, %v2370_v39  ;;  %v5292_v4 = vunpack.c.h.bf16 %v5308_v8 }
 0x363   :  { %8135 = vst [vmem:[#allocation8_spill] sm:$0xff] %v7331_v60  ;;  %2481 = vst.msk [vmem:[#allocation3 + $0x11] sm:$0xff] %vm2245_vm6, %v7331_v60  ;;  %v7345_v55 = vadd.f32 %v5276_v34, %v2368_v41  ;;  %v5729_v15 = vpop.f32.mrb[36].mxu0  ;;  %v6272_v41 = vld [vmem:[%s8087_s8 + $0x28] sm:$0xff]  }
 0x364   :  { %8136 = vst [vmem:[#allocation9_spill] sm:$0xff] %v7338_v43  ;;  %2484 = vst.msk [vmem:[#allocation3 + $0x41] sm:$0xff] %vm2245_vm6, %v7338_v43  ;;  %v2329_v47 = vadd.f32 %v5729_v15, %v7317_v44  ;;  %v2320_v49 = vpop.f32.mrb[37].mxu0 }
 0x365   :  { %8137 = vst [vmem:[#allocation10_spill] sm:$0xff] %v7345_v55  ;;  %2482 = vst.msk [vmem:[#allocation3 + $0x21] sm:$0xff] %vm2245_vm6, %v7345_v55  ;;  %v2321_v51 = vadd.f32 %v7317_v44, %v2320_v49  ;;  %v5730_v53 = vpop.f32.mrb[38].mxu0  ;;  %v5311_v49 = vld [vmem:[%s8086_s7 + $0x38] sm:$0xff]   ;;  %v6276_v55 = vld [vmem:[%s8087_s8 + $0x48] sm:$0xff]  }
 0x366   :  { %v2373_v56 = vmax.f32 %v2329_v47, 0.0  ;;  %v2332_v57 = vadd.f32 %v5730_v53, %v7317_v44  ;;  %v2323_v59 = vpop.f32.mrb[39].mxu0 }
 0x367   :  { %v2371_v61 = vmax.f32 %v2321_v51, 0.0  ;;  %v2324_v62 = vadd.f32 %v7317_v44, %v2323_v59  ;;  %v7435_v51 = vld [vmem:[%s8087_s8 + $0x20] sm:$0xff]  }
 0x368   :  { %v7359_v0 = vadd.f32 %v5287_v30, %v2373_v56  ;;  %v2374_v5 = vmax.f32 %v2332_v57, 0.0 }
 0x369   :  { %v7361_v7 = vadd.f32 %v5283_v52, %v2371_v61  ;;  %v2372_v9 = vmax.f32 %v2324_v62, 0.0  ;;  %v7380_v21 = vld [vmem:[#allocation3 + $0x31] sm:$0xff]  ;;  %v5303_v62 = vunpack.c.l.bf16 %v5311_v49 }
 0x36a   :  { %8138 = vst [vmem:[#allocation11_spill] sm:$0xff] %v7359_v0  ;;  %2487 = vst.msk [vmem:[#allocation3 + $0x71] sm:$0xff] %vm2245_vm6, %v7359_v0  ;;  %v7368_v29 = vadd.f32 %v5288_v58, %v2374_v5  ;;  %v7373_v1 = vld [vmem:[#allocation3 + $0x11] sm:$0xff] }
 0x36b   :  { %8139 = vst [vmem:[#allocation12_spill] sm:$0xff] %v7361_v7  ;;  %2485 = vst.msk [vmem:[#allocation3 + $0x51] sm:$0xff] %vm2245_vm6, %v7361_v7  ;;  %v7377_v2 = vadd.f32 %v5284_v63, %v2372_v9  ;;  %v5733_v18 = vpop.f32.mrb[40].mxu0  ;;  %v2541_v16 = vpack.c.bf16 %v7373_v1, %v2525_v46  ;;  %v7382_v54 = vld [vmem:[#allocation3 + $0x41] sm:$0xff]  ;;  %v7411_v11 = vld [vmem:[#allocation3 + $0x12] sm:$0xff] }
 0x36c   :  { %8140 = vst [vmem:[#allocation13_spill] sm:$0xff] %v7368_v29  ;;  %2488 = vst.msk [vmem:[#allocation3 + $0x81] sm:$0xff] %vm2245_vm6, %v7368_v29  ;;  %v2345_v12 = vadd.f32 %v5733_v18, %v7317_v44  ;;  %v2336_v25 = vpop.f32.mrb[41].mxu0  ;;  %v7389_v26 = vld [vmem:[#allocation3 + $0x21] sm:$0xff]  ;;  %v7416_v34 = vld [vmem:[#allocation3 + $0x32] sm:$0xff] }
 0x36d   :  { %8141 = vst [vmem:[#allocation14_spill] sm:$0xff] %v7377_v2  ;;  %v7391_v19 = vld [vmem:[#allocation3 + $0x22] sm:$0xff]  ;;  %2486 = vst.msk [vmem:[#allocation3 + $0x61] sm:$0xff] %vm2245_vm6, %v7377_v2  ;;  %v2337_v24 = vadd.f32 %v7317_v44, %v2336_v25  ;;  %v5734_v32 = vpop.f32.mrb[42].mxu0  ;;  %5743 = vmatprep.mubr.msk.bf16.mxu1 %vm2245_vm6, %v2541_v16  ;;  %v7403_v6 = vpack.c.bf16 %v7380_v21, %v7389_v26  ;;  %v5310_v52 = vld [vmem:[%s8086_s7 + $0x30] sm:$0xff]  }
 0x36e   :  { %v7408_v36 = vld [vmem:[#allocation3 + $0x42] sm:$0xff]  ;;  %v2377_v37 = vmax.f32 %v2345_v12, 0.0  ;;  %v2348_v38 = vadd.f32 %v5734_v32, %v7317_v44  ;;  %v2339_v3 = vpop.f32.mrb[43].mxu0  ;;  %v5299_v8 = vunpack.c.l.bf16 %v5310_v52  ;;  %v6274_v0 = vld [vmem:[%s8087_s8 + $0x38] sm:$0xff]  }
 0x36f   :  { %v2375_v14 = vmax.f32 %v2337_v24, 0.0  ;;  %v2340_v28 = vadd.f32 %v7317_v44, %v2339_v3  ;;  %5744 = vmatmul.mubr.msk.bf16.vlgmr.msra.gmra.mrb[16].mxu1 %vm2245_vm6, %v7403_v6  ;;  %v5304_v24 = vunpack.c.h.bf16 %v5311_v49 }
 0x370   :  { %v7422_v42 = vadd.f32 %v5295_v23, %v2377_v37  ;;  %v2378_v45 = vmax.f32 %v2348_v38, 0.0  ;;  %5760 = vmatpush3.bf16.msra.mxu1 %v7311_v17  ;;  %v5300_v37 = vunpack.c.h.bf16 %v5310_v52 }
 0x371   :  { %v7427_v47 = vadd.f32 %v5291_v31, %v2375_v14  ;;  %v2376_v30 = vmax.f32 %v2340_v28, 0.0  ;;  %5761 = vmatprep.subr.bf16.mxu1 %v6270_v33  ;;  %v7461_v46 = vld [vmem:[#allocation3 + $0x71] sm:$0xff]  ;;  %v2533_v14 = vld [vmem:[#allocation3 + $0xa1] sm:$0xff] }
 0x372   :  { %8142 = vst [vmem:[#allocation15_spill] sm:$0xff] %v7422_v42  ;;  %2491 = vst.msk [vmem:[#allocation3 + $0xd1] sm:$0xff] %vm2245_vm6, %v7422_v42  ;;  %v7439_v17 = vadd.f32 %v5296_v40, %v2378_v45  ;;  %v7444_v53 = vld [vmem:[#allocation3 + $0x51] sm:$0xff] }
 0x373   :  { %8143 = vst [vmem:[#allocation16_spill] sm:$0xff] %v7427_v47  ;;  %2489 = vst.msk [vmem:[#allocation3 + $0xb1] sm:$0xff] %vm2245_vm6, %v7427_v47  ;;  %v7448_v56 = vadd.f32 %v5292_v4, %v2376_v30  ;;  %v5737_v57 = vpop.f32.mrb[44].mxu0  ;;  %v7452_v58 = vpack.c.bf16 %v7444_v53, %v7382_v54  ;;  %v7481_v38 = vld [vmem:[#allocation3 + $0x52] sm:$0xff] }
 0x374   :  { %8144 = vst [vmem:[#allocation17_spill] sm:$0xff] %v7439_v17  ;;  %2492 = vst.msk [vmem:[#allocation3 + $0xe1] sm:$0xff] %vm2245_vm6, %v7439_v17  ;;  %v2361_v61 = vadd.f32 %v5737_v57, %v7317_v44  ;;  %v2352_v63 = vpop.f32.mrb[45].mxu0  ;;  %v7459_v5 = vld [vmem:[#allocation3 + $0x61] sm:$0xff]  ;;  %5762 = vmatpush3.bf16.msra.mxu1 %v6270_v33  ;;  %v7571_v28 = vld [vmem:[#allocation3 + $0x30] sm:$0xff]  ;;  %v7621_v29 = vpack.c.bf16 %v7481_v38, %v7408_v36 }
 0x375   :  { %8145 = vst [vmem:[#allocation18_spill] sm:$0xff] %v7448_v56  ;;  %2490 = vst.msk [vmem:[#allocation3 + $0xc1] sm:$0xff] %vm2245_vm6, %v7448_v56  ;;  %v2353_v10 = vadd.f32 %v7317_v44, %v2352_v63  ;;  %v5738_v18 = vpop.f32.mrb[46].mxu0  ;;  %5747 = vmatprep.mubr.msk.bf16.mxu1 %vm2245_vm6, %v7452_v58  ;;  %v7472_v16 = vpack.c.bf16 %v7461_v46, %v7459_v5  ;;  %5779 = vmatprep.subr.bf16.mxu1 %v7435_v51  ;;  %v7475_v12 = vld [vmem:[#allocation3 + $0x62] sm:$0xff]  ;;  %v2504_v40 = vld [vmem:[#allocation3 + $0x70] sm:$0xff] }
 0x376   :  { %v2381_v23 = vmax.f32 %v2361_v61, 0.0  ;;  %v2364_v25 = vadd.f32 %v5738_v18, %v7317_v44  ;;  %v2355_v31 = vpop.f32.mrb[47].mxu0  ;;  %v2503_v50 = vld [vmem:[#allocation3 + $0x60] sm:$0xff]  ;;  %v7614_v56 = vpack.c.bf16 %v7416_v34, %v7391_v19  ;;  %v7630_v7 = vld [vmem:[#allocation3 + $0x72] sm:$0xff] }
 0x377   :  { %v2379_v32 = vmax.f32 %v2353_v10, 0.0  ;;  %v2356_v33 = vadd.f32 %v7317_v44, %v2355_v31  ;;  %5748 = vmatmul.mubr.msk.bf16.gmra.mrb[20].mxu1 %vm2245_vm6, %v7472_v16  ;;  %v7592_v13 = vpack.c.bf16 %v2504_v40, %v2503_v50  ;;  %v7634_v2 = vpack.c.bf16 %v7630_v7, %v7475_v12 }
 0x378   :  { %v7485_v3 = vadd.f32 %v5303_v62, %v2381_v23  ;;  %v2382_v4 = vmax.f32 %v2364_v25, 0.0  ;;  %v2505_v25 = vld [vmem:[#allocation3 + $0xa0] sm:$0xff] }
 0x379   :  { %v7489_v45 = vadd.f32 %v5299_v8, %v2379_v32  ;;  %v2380_v30 = vmax.f32 %v2356_v33, 0.0  ;;  %v7497_v52 = vld [vmem:[#allocation3 + $0xd1] sm:$0xff] }
 0x37a   :  { %8146 = vst [vmem:[#allocation19_spill] sm:$0xff] %v7485_v3  ;;  %2495 = vst.msk [vmem:[#allocation3 + $0x111] sm:$0xff] %vm2245_vm6, %v7485_v3  ;;  %v7493_v44 = vadd.f32 %v5304_v24, %v2382_v4  ;;  %v7495_v49 = vld [vmem:[#allocation3 + $0xb1] sm:$0xff]  ;;  %v2499_v24 = vld [vmem:[#allocation3 + $0x20] sm:$0xff] }
 0x37b   :  { %8147 = vst [vmem:[#allocation20_spill] sm:$0xff] %v7489_v45  ;;  %2493 = vst.msk [vmem:[#allocation3 + $0xf1] sm:$0xff] %vm2245_vm6, %v7489_v45  ;;  %v7501_v57 = vadd.f32 %v5300_v37, %v2380_v30  ;;  %v2545_v61 = vpack.c.bf16 %v7495_v49, %v2533_v14  ;;  %v7504_v62 = vld [vmem:[#allocation3 + $0xe1] sm:$0xff]  ;;  %v7506_v63 = vld [vmem:[#allocation3 + $0xd2] sm:$0xff]  ;;  %v7574_v15 = vpack.c.bf16 %v7571_v28, %v2499_v24 }
 0x37c   :  { %8148 = vst [vmem:[#allocation21_spill] sm:$0xff] %v7493_v44  ;;  %v7508_v10 = vld [vmem:[#allocation3 + $0xe2] sm:$0xff]  ;;  %2496 = vst.msk [vmem:[#allocation3 + $0x121] sm:$0xff] %vm2245_vm6, %v7493_v44  ;;  %v7531_v33 = vld [vmem:[#allocation3 + $0xb2] sm:$0xff] }
 0x37d   :  { %8149 = vst [vmem:[#allocation22_spill] sm:$0xff] %v7501_v57  ;;  %v7514_v18 = vld [vmem:[#allocation3 + $0xc1] sm:$0xff]  ;;  %2494 = vst.msk [vmem:[#allocation3 + $0x101] sm:$0xff] %vm2245_vm6, %v7501_v57  ;;  %5751 = vmatprep.mubr.msk.bf16.mxu1 %vm2245_vm6, %v2545_v61  ;;  %v7545_v8 = vld [vmem:[#allocation3 + $0x10] sm:$0xff] }
 0x37e   :  { %v7516_v23 = vld [vmem:[#allocation3 + $0xc2] sm:$0xff]  ;;  %v7529_v32 = vpack.c.bf16 %v7497_v52, %v7514_v18  ;;  %v7569_v4 = vld [vmem:[#allocation3 + $0x50] sm:$0xff] }
 0x37f   :  { %v2497_v61 = vld [vmem:[#allocation3] sm:$0xff]  ;;  %v7590_v37 = vld [vmem:[#allocation3 + $0xb0] sm:$0xff] }
 0x380   :  { %5752 = vmatmul.mubr.msk.bf16.gmra.mrb[24].mxu1 %vm2245_vm6, %v7529_v32  ;;  %v2513_v20 = vpack.c.bf16 %v7545_v8, %v2497_v61  ;;  %v2501_v61 = vld [vmem:[#allocation3 + $0x40] sm:$0xff]  ;;  %v2517_v39 = vpack.c.bf16 %v7590_v37, %v2505_v25  ;;  %v2508_v44 = vld [vmem:[#allocation3 + $0xd0] sm:$0xff] }
 0x381   :  { %v7549_v59 = vld [vmem:[#allocation3 + $0x111] sm:$0xff]  ;;  %v7580_v48 = vpack.c.bf16 %v7569_v4, %v2501_v61  ;;  %v2509_v57 = vld [vmem:[#allocation3 + $0xe0] sm:$0xff]  ;;  %v3015_v60 = vpack.c.bf16 %v2501_v61, %v7571_v28 }
 0x382   :  { %v7539_v14 = vld [vmem:[#allocation3 + $0xf1] sm:$0xff]  ;;  %v2820_v25 = vld [vmem:[#allocation3 + $0x2] sm:$0xff] }
 0x383   :  { %v7543_v30 = vpack.c.bf16 %v7539_v14, %v7504_v62  ;;  %v7559_v27 = vld [vmem:[#allocation3 + $0xf2] sm:$0xff] }
 0x384   :  { %v7547_v31 = vld [vmem:[#allocation3 + $0x101] sm:$0xff]  ;;  %v2510_v3 = vld [vmem:[#allocation3 + $0xf0] sm:$0xff]  ;;  %v7646_v43 = vpack.c.bf16 %v7559_v27, %v7508_v10 }
 0x385   :  { %v7551_v9 = vld [vmem:[#allocation3 + $0x102] sm:$0xff]  ;;  %5755 = vmatprep.mubr.msk.bf16.mxu1 %vm2245_vm6, %v7543_v30  ;;  %v7557_v22 = vpack.c.bf16 %v7549_v59, %v7547_v31  ;;  %v7600_v42 = vpack.c.bf16 %v2510_v3, %v2509_v57  ;;  %v2512_v17 = vld [vmem:[#allocation3 + $0x110] sm:$0xff] }
 0x386   :  { %8150 = vst [vmem:[#allocation23_spill] sm:$0xff] %v7646_v43 }
 0x388   :  { %5756 = vmatmul.mubr.msk.bf16.gmra.mrb[28].mxu1 %vm2245_vm6, %v7557_v22 }
 0x389   :  { %5763 = vmatprep.mubr.msk.bf16.mxu1 %vm2245_vm6, %v2513_v20  ;;  %v6273_v20 = vld [vmem:[%s8087_s8 + $0x30] sm:$0xff]  }
 0x390   :  { %5764 = vmatmul.mubr.msk.bf16.vlgmr.msra.gmra.mrb[16].mxu1 %vm2245_vm6, %v7574_v15 }
 0x391   :  { %5767 = vmatprep.mubr.msk.bf16.mxu1 %vm2245_vm6, %v7580_v48  ;;  %5780 = vmatpush3.bf16.msra.mxu1 %v7435_v51  ;;  %v2507_v51 = vld [vmem:[#allocation3 + $0xc0] sm:$0xff] }
 0x392   :  { %5781 = vmatprep.subr.bf16.mxu1 %v6272_v41  ;;  %v7598_v45 = vpack.c.bf16 %v2508_v44, %v2507_v51  ;;  %v3018_v61 = vpack.c.bf16 %v2507_v51, %v7590_v37 }
 0x395   :  { %5782 = vmatpush3.bf16.msra.mxu1 %v6272_v41  ;;  %v2511_v41 = vld [vmem:[#allocation3 + $0x100] sm:$0xff] }
 0x396   :  { %5799 = vmatprep.subr.bf16.mxu1 %v6273_v20  ;;  %v7606_v47 = vpack.c.bf16 %v2512_v17, %v2511_v41 }
 0x398   :  { %5768 = vmatmul.mubr.msk.bf16.gmra.mrb[20].mxu1 %vm2245_vm6, %v7592_v13 }
 0x399   :  { %5771 = vmatprep.mubr.msk.bf16.mxu1 %vm2245_vm6, %v2517_v39  ;;  %v2836_v39 = vpack.c.bf16 %v7411_v11, %v2820_v25  ;;  %v6275_v25 = vld [vmem:[%s8087_s8 + $0x40] sm:$0xff]  }
 0x3a0   :  { %5772 = vmatmul.mubr.msk.bf16.gmra.mrb[24].mxu1 %vm2245_vm6, %v7598_v45 }
 0x3a1   :  { %5775 = vmatprep.mubr.msk.bf16.mxu1 %vm2245_vm6, %v7600_v42 }
 0x3a8   :  { %5776 = vmatmul.mubr.msk.bf16.gmra.mrb[28].mxu1 %vm2245_vm6, %v7606_v47 }
 0x3a9   :  { %5783 = vmatprep.mubr.msk.bf16.mxu1 %vm2245_vm6, %v2836_v39  ;;  %v2828_v39 = vld [vmem:[#allocation3 + $0xa2] sm:$0xff] }
 0x3aa   :  { %v2840_v35 = vpack.c.bf16 %v7531_v33, %v2828_v39 }
 0x3b0   :  { %5784 = vmatmul.mubr.msk.bf16.vlgmr.msra.gmra.mrb[16].mxu1 %vm2245_vm6, %v7614_v56 }
 0x3b1   :  { %5787 = vmatprep.mubr.msk.bf16.mxu1 %vm2245_vm6, %v7621_v29  ;;  %5800 = vmatpush3.bf16.msra.mxu1 %v6273_v20  ;;  %v7642_v20 = vpack.c.bf16 %v7506_v63, %v7516_v23 }
 0x3b2   :  { %5801 = vmatprep.subr.bf16.mxu1 %v6274_v0 }
 0x3b5   :  { %5802 = vmatpush3.bf16.msra.mxu1 %v6274_v0  ;;  %v7652_v0 = vld [vmem:[#allocation3 + $0x112] sm:$0xff] }
 0x3b6   :  { %5819 = vmatprep.subr.bf16.mxu1 %v6275_v25  ;;  %v7656_v39 = vpack.c.bf16 %v7652_v0, %v7551_v9 }
 0x3b8   :  { %5788 = vmatmul.mubr.msk.bf16.gmra.mrb[20].mxu1 %vm2245_vm6, %v7634_v2 }
 0x3b9   :  { %5791 = vmatprep.mubr.msk.bf16.mxu1 %vm2245_vm6, %v2840_v35  ;;  %v3014_v35 = vpack.c.bf16 %v2499_v24, %v7545_v8  ;;  %v6277_v8 = vld [vmem:[%s8087_s8 + $0x50] sm:$0xff]   ;;  %v7672_v24 = vld [vmem:[#allocation3 + $0x80] sm:$0xff] }
 0x3ba   :  { %v3017_v28 = vpack.c.bf16 %v7672_v24, %v2504_v40  ;;  %v6278_v40 = vld [vmem:[%s8087_s8 + $0x58] sm:$0xff]  }
 0x3c0   :  { %5792 = vmatmul.mubr.msk.bf16.gmra.mrb[24].mxu1 %vm2245_vm6, %v7642_v20 }
 0x3c1   :  { %5795 = vmatprep.mubr.msk.bf16.mxu1 %vm2245_vm6, %v7646_v43  ;;  %v3016_v43 = vpack.c.bf16 %v2503_v50, %v7569_v4  ;;  %v7680_v50 = vld [vmem:[#allocation3 + $0x120] sm:$0xff] }
 0x3c2   :  { %v3021_v4 = vpack.c.bf16 %v7680_v50, %v2512_v17 }
 0x3c8   :  { %5796 = vmatmul.mubr.msk.bf16.gmra.mrb[28].mxu1 %vm2245_vm6, %v7656_v39 }
 0x3c9   :  { %5803 = vmatprep.mubr.msk.bf16.mxu1 %vm2245_vm6, %v3014_v35 }
 0x3d0   :  { %5804 = vmatmul.mubr.msk.bf16.vlgmr.msra.gmra.mrb[16].mxu1 %vm2245_vm6, %v3015_v60  ;;  %v3019_v60 = vpack.c.bf16 %v2509_v57, %v2508_v44  ;;  %v8153_v44 = vpack.c.bf16 %v7459_v5, %v7444_v53  ;;  %v8156_v53 = vpack.c.bf16 %v7547_v31, %v7539_v14  ;;  %v7719_v5 = vld [vmem:[#allocation3 + $0x121] sm:$0xff]  ;;  %v8157_v57 = vpack.c.bf16 %v7391_v19, %v7411_v11  ;;  %v6281_v11 = vld [vmem:[%s8087_s8 + $0x70] sm:$0xff]  }
 0x3d1   :  { %5807 = vmatprep.mubr.msk.bf16.mxu1 %vm2245_vm6, %v3016_v43  ;;  %5820 = vmatpush3.bf16.msra.mxu1 %v6275_v25  ;;  %v3020_v43 = vpack.c.bf16 %v2511_v41, %v2510_v3  ;;  %v8152_v3 = vpack.c.bf16 %v7382_v54, %v7380_v21  ;;  %v8154_v21 = vpack.c.bf16 %v7514_v18, %v7495_v49  ;;  %v6285_v49 = vld [vmem:[%s8089_s10] sm:$0xff]  }
 0x3d2   :  { %5821 = vmatprep.subr.bf16.mxu1 %v6276_v55  ;;  %v8155_v54 = vpack.c.bf16 %v7504_v62, %v7497_v52  ;;  %v6286_v52 = vld [vmem:[%s8089_s10 + $0x8] sm:$0xff]   ;;  %5919 = vmatprep.subr.bf16.mxu0 %v6285_v49  ;;  %v8158_v18 = vpack.c.bf16 %v7408_v36, %v7416_v34  ;;  %v8159_v19 = vpack.c.bf16 %v7475_v12, %v7481_v38 }
 0x3d3   :  { %5920 = vmatpush3.bf16.msra.mxu0 %v6285_v49  ;;  %v6280_v62 = vld [vmem:[%s8087_s8 + $0x68] sm:$0xff]   ;;  %v8160_v36 = vpack.c.bf16 %v7516_v23, %v7531_v33  ;;  %v8161_v34 = vpack.c.bf16 %v7508_v10, %v7506_v63  ;;  %v8162_v12 = vpack.c.bf16 %v7551_v9, %v7559_v27  ;;  %v6282_v23 = vld [vmem:[%s8087_s8 + $0x78] sm:$0xff]   ;;  %v6283_v27 = vld [vmem:[%s8087_s8 + $0x80] sm:$0xff]  }
 0x3d4   :  { %5921 = vmatprep.subr.bf16.mxu0 %v6286_v52  ;;  %v3361_v31 = vld [vmem:[#allocation3 + $0x82] sm:$0xff]  ;;  %v3540_v9 = vld [vmem:[#allocation3 + $0x90] sm:$0xff] }
 0x3d5   :  { %5822 = vmatpush3.bf16.msra.mxu1 %v6276_v55  ;;  %v8151_v55 = vpack.c.bf16 %v7389_v26, %v7373_v1  ;;  %v6279_v1 = vld [vmem:[%s8087_s8 + $0x60] sm:$0xff]   ;;  %v3373_v37 = vpack.c.bf16 %v3361_v31, %v7630_v7  ;;  %v6284_v63 = vld [vmem:[%s8087_s8 + $0x88] sm:$0xff]  }
 0x3d6   :  { %5839 = vmatprep.subr.bf16.mxu1 %v6277_v8  ;;  %v7702_v26 = vld [vmem:[#allocation3 + $0x81] sm:$0xff] }
 0x3d7   :  { %v3195_v17 = vpack.c.bf16 %v7702_v26, %v7461_v46  ;;  %v3199_v46 = vpack.c.bf16 %v7719_v5, %v7549_v59  ;;  %v6287_v59 = vld [vmem:[%s8089_s10 + $0x10] sm:$0xff]   ;;  %5922 = vmatpush3.bf16.msra.mxu0 %v6286_v52  ;;  %v3369_v38 = vld [vmem:[#allocation3 + $0x122] sm:$0xff]  ;;  %v8168_v52 = vld [vmem:[#allocation9_spill] sm:$0xff] }
 0x3d8   :  { %5808 = vmatmul.mubr.msk.bf16.gmra.mrb[20].mxu1 %vm2245_vm6, %v3017_v28  ;;  %5923 = vmatprep.subr.bf16.mxu0 %v6287_v59  ;;  %v3377_v7 = vpack.c.bf16 %v3369_v38, %v7652_v0 }
 0x3d9   :  { %5811 = vmatprep.mubr.msk.bf16.mxu1 %vm2245_vm6, %v3018_v61 }
 0x3db   :  { %5924 = vmatpush3.bf16.msra.mxu0 %v6287_v59 }
 0x3e0   :  { %5812 = vmatmul.mubr.msk.bf16.gmra.mrb[24].mxu1 %vm2245_vm6, %v3019_v60 }
 0x3e1   :  { %5815 = vmatprep.mubr.msk.bf16.mxu1 %vm2245_vm6, %v3020_v43 }
 0x3e8   :  { %5816 = vmatmul.mubr.msk.bf16.gmra.mrb[28].mxu1 %vm2245_vm6, %v3021_v4 }
 0x3e9   :  { %5823 = vmatprep.mubr.msk.bf16.mxu1 %vm2245_vm6, %v8151_v55 }
 0x3f0   :  { %5824 = vmatmul.mubr.msk.bf16.vlgmr.msra.gmra.mrb[16].mxu1 %vm2245_vm6, %v8152_v3 }
 0x3f1   :  { %5827 = vmatprep.mubr.msk.bf16.mxu1 %vm2245_vm6, %v8153_v44  ;;  %5840 = vmatpush3.bf16.msra.mxu1 %v6277_v8 }
 0x3f2   :  { %5841 = vmatprep.subr.bf16.mxu1 %v6278_v40 }
 0x3f5   :  { %5842 = vmatpush3.bf16.msra.mxu1 %v6278_v40 }
 0x3f6   :  { %5859 = vmatprep.subr.bf16.mxu1 %v6279_v1 }
 0x3f8   :  { %5828 = vmatmul.mubr.msk.bf16.gmra.mrb[20].mxu1 %vm2245_vm6, %v3195_v17 }
 0x3f9   :  { %5831 = vmatprep.mubr.msk.bf16.mxu1 %vm2245_vm6, %v8154_v21 }
 0x400   :  { %5832 = vmatmul.mubr.msk.bf16.gmra.mrb[24].mxu1 %vm2245_vm6, %v8155_v54 }
 0x401   :  { %5835 = vmatprep.mubr.msk.bf16.mxu1 %vm2245_vm6, %v8156_v53 }
 0x408   :  { %5836 = vmatmul.mubr.msk.bf16.gmra.mrb[28].mxu1 %vm2245_vm6, %v3199_v46 }
 0x409   :  { %5843 = vmatprep.mubr.msk.bf16.mxu1 %vm2245_vm6, %v8157_v57  ;;  %v8169_v57 = vld [vmem:[#allocation7_spill] sm:$0xff] }
 0x40a   :  { %v8170_v59 = vpack.c.bf16 %v8168_v52, %v8169_v57 }
 0x410   :  { %5844 = vmatmul.mubr.msk.bf16.vlgmr.msra.gmra.mrb[16].mxu1 %vm2245_vm6, %v8158_v18 }
 0x411   :  { %5847 = vmatprep.mubr.msk.bf16.mxu1 %vm2245_vm6, %v8159_v19  ;;  %5860 = vmatpush3.bf16.msra.mxu1 %v6279_v1  ;;  %v8165_v1 = vld [vmem:[#allocation10_spill] sm:$0xff] }
 0x412   :  { %5861 = vmatprep.subr.bf16.mxu1 %v6280_v62 }
 0x415   :  { %5862 = vmatpush3.bf16.msra.mxu1 %v6280_v62 }
 0x416   :  { %5879 = vmatprep.subr.bf16.mxu1 %v6281_v11 }
 0x418   :  { %5848 = vmatmul.mubr.msk.bf16.gmra.mrb[20].mxu1 %vm2245_vm6, %v3373_v37 }
 0x419   :  { %5851 = vmatprep.mubr.msk.bf16.mxu1 %vm2245_vm6, %v8160_v36 }
 0x420   :  { %5852 = vmatmul.mubr.msk.bf16.gmra.mrb[24].mxu1 %vm2245_vm6, %v8161_v34 }
 0x421   :  { %5855 = vmatprep.mubr.msk.bf16.mxu1 %vm2245_vm6, %v8162_v12  ;;  %v8171_v12 = vld [vmem:[#allocation14_spill] sm:$0xff] }
 0x428   :  { %5856 = vmatmul.mubr.msk.bf16.gmra.mrb[28].mxu1 %vm2245_vm6, %v3377_v7 }
 0x429   :  { %5863 = vmatprep.mubr.msk.bf16.mxu1 %vm2245_vm6, %v7574_v15  ;;  %v3552_v15 = vpack.c.bf16 %v3540_v9, %v7672_v24 }
 0x430   :  { %5864 = vmatmul.mubr.msk.bf16.vlgmr.msra.gmra.mrb[16].mxu1 %vm2245_vm6, %v7580_v48  ;;  %v3548_v48 = vld [vmem:[#allocation3 + $0x130] sm:$0xff] }
 0x431   :  { %5867 = vmatprep.mubr.msk.bf16.mxu1 %vm2245_vm6, %v7592_v13  ;;  %5880 = vmatpush3.bf16.msra.mxu1 %v6281_v11  ;;  %v3556_v13 = vpack.c.bf16 %v3548_v48, %v7680_v50 }
 0x432   :  { %5881 = vmatprep.subr.bf16.mxu1 %v6282_v23 }
 0x435   :  { %5882 = vmatpush3.bf16.msra.mxu1 %v6282_v23 }
 0x436   :  { %5899 = vmatprep.subr.bf16.mxu1 %v6283_v27 }
 0x438   :  { %5868 = vmatmul.mubr.msk.bf16.gmra.mrb[20].mxu1 %vm2245_vm6, %v3552_v15 }
 0x439   :  { %5871 = vmatprep.mubr.msk.bf16.mxu1 %vm2245_vm6, %v7598_v45 }
 0x440   :  { %5872 = vmatmul.mubr.msk.bf16.gmra.mrb[24].mxu1 %vm2245_vm6, %v7600_v42  ;;  %v3718_v42 = vld [vmem:[#allocation3 + $0x91] sm:$0xff] }
 0x441   :  { %5875 = vmatprep.mubr.msk.bf16.mxu1 %vm2245_vm6, %v7606_v47  ;;  %v3730_v47 = vpack.c.bf16 %v3718_v42, %v7702_v26  ;;  %v8166_v26 = vld [vmem:[#allocation8_spill] sm:$0xff]  ;;  %v8175_v42 = vld [vmem:[#allocation11_spill] sm:$0xff] }
 0x442   :  { %v8167_v17 = vpack.c.bf16 %v8165_v1, %v8166_v26 }
 0x448   :  { %5876 = vmatmul.mubr.msk.bf16.gmra.mrb[28].mxu1 %vm2245_vm6, %v3556_v13 }
 0x449   :  { %5883 = vmatprep.mubr.msk.bf16.mxu1 %vm2245_vm6, %v7403_v6  ;;  %v3726_v6 = vld [vmem:[#allocation3 + $0x131] sm:$0xff] }
 0x450   :  { %5884 = vmatmul.mubr.msk.bf16.vlgmr.msra.gmra.mrb[16].mxu1 %vm2245_vm6, %v7452_v58  ;;  %v3734_v58 = vpack.c.bf16 %v3726_v6, %v7719_v5 }
 0x451   :  { %5887 = vmatprep.mubr.msk.bf16.mxu1 %vm2245_vm6, %v7472_v16  ;;  %5900 = vmatpush3.bf16.msra.mxu1 %v6283_v27  ;;  %v3896_v16 = vld [vmem:[#allocation3 + $0x92] sm:$0xff] }
 0x452   :  { %5901 = vmatprep.subr.bf16.mxu1 %v6284_v63  ;;  %v3908_v45 = vpack.c.bf16 %v3896_v16, %v3361_v31 }
 0x455   :  { %5902 = vmatpush3.bf16.msra.mxu1 %v6284_v63  ;;  %v8174_v63 = vld [vmem:[#allocation13_spill] sm:$0xff] }
 0x458   :  { %5888 = vmatmul.mubr.msk.bf16.gmra.mrb[20].mxu1 %vm2245_vm6, %v3730_v47  ;;  %v8176_v47 = vpack.c.bf16 %v8174_v63, %v8175_v42 }
 0x459   :  { %5891 = vmatprep.mubr.msk.bf16.mxu1 %vm2245_vm6, %v7529_v32  ;;  %v7829_v32 = vld [vmem:[%s8088_s9] ss:$0 sm:$0xff] }
 0x460   :  { %5892 = vmatmul.mubr.msk.bf16.gmra.mrb[24].mxu1 %vm2245_vm6, %v7543_v30 }
 0x461   :  { %5895 = vmatprep.mubr.msk.bf16.mxu1 %vm2245_vm6, %v7557_v22  ;;  %v8163_v22 = vld [vmem:[#allocation23_spill] sm:$0xff] }
 0x468   :  { %5896 = vmatmul.mubr.msk.bf16.gmra.mrb[28].mxu1 %vm2245_vm6, %v3734_v58 }
 0x469   :  { %5903 = vmatprep.mubr.msk.bf16.mxu1 %vm2245_vm6, %v7614_v56  ;;  %v3904_v56 = vld [vmem:[#allocation3 + $0x132] sm:$0xff] }
 0x46a   :  { %v3912_v10 = vpack.c.bf16 %v3904_v56, %v3369_v38  ;;  %v8172_v38 = vld [vmem:[#allocation12_spill] sm:$0xff] }
 0x46b   :  { %v8173_v7 = vpack.c.bf16 %v8171_v12, %v8172_v38 }
 0x470   :  { %5904 = vmatmul.mubr.msk.bf16.vlgmr.msra.gmra.mrb[16].mxu1 %vm2245_vm6, %v7621_v29  ;;  %v6288_v29 = vld [vmem:[%s8089_s10 + $0x18] sm:$0xff]  }
 0x471   :  { %5907 = vmatprep.mubr.msk.bf16.mxu1 %vm2245_vm6, %v7634_v2  ;;  %5925 = vmatprep.subr.bf16.mxu0 %v6288_v29  ;;  %v8164_v2 = vmov 0.0  }
 0x472   :  { %5926 = vmatpush3.bf16.msra.mxu0 %v6288_v29 }
 0x473   :  { %5943 = vmatprep.subr.bf16.mxu0 %v8164_v2 }
 0x478   :  { %5908 = vmatmul.mubr.msk.bf16.gmra.mrb[20].mxu1 %vm2245_vm6, %v3908_v45 }
 0x479   :  { %5911 = vmatprep.mubr.msk.bf16.mxu1 %vm2245_vm6, %v7642_v20 }
 0x480   :  { %5912 = vmatmul.mubr.msk.bf16.gmra.mrb[24].mxu1 %vm2245_vm6, %v8163_v22 }
 0x481   :  { %5915 = vmatprep.mubr.msk.bf16.mxu1 %vm2245_vm6, %v7656_v39 }
 0x488   :  { %5916 = vmatmul.mubr.msk.bf16.gmra.mrb[28].mxu1 %vm2245_vm6, %v3912_v10 }
 0x543   :  { %v5905_v33 = vpop.f32.mrb[16].mxu1 }
 0x544   :  { %v4076_v14 = vadd.f32 %v5905_v33, %v7829_v32  ;;  %v3988_v30 = vpop.f32.mrb[17].mxu1  ;;  %v8177_v33 = vld [vmem:[#allocation18_spill] sm:$0xff] }
 0x545   :  { %v4074_v51 = vadd.f32 %v7829_v32, %v3988_v30  ;;  %v5906_v41 = vpop.f32.mrb[18].mxu1 }
 0x546   :  { %v4077_v25 = vadd.f32 %v5906_v41, %v7829_v32  ;;  %v3991_v20 = vpop.f32.mrb[19].mxu1  ;;  %v4092_v39 = vmax.f32 %v4076_v14, 0.0  ;;  %v8178_v14 = vld [vmem:[#allocation16_spill] sm:$0xff] }
 0x547   :  { %v4075_v0 = vadd.f32 %v7829_v32, %v3991_v20  ;;  %v4090_v8 = vmax.f32 %v4074_v51, 0.0  ;;  %v8179_v30 = vpack.c.bf16 %v8177_v33, %v8178_v14 }
 0x548   :  { %v4093_v35 = vmax.f32 %v4077_v25, 0.0 }
 0x549   :  { %v4091_v24 = vmax.f32 %v4075_v0, 0.0 }
 0x54a   :  { %v4107_v28 = vpack.c.bf16 %v4093_v35, %v4092_v39  ;;  %v8180_v35 = vld [vmem:[#allocation17_spill] sm:$0xff] }
 0x54b   :  { %v4106_v61 = vpack.c.bf16 %v4091_v24, %v4090_v8  ;;  %v5909_v60 = vpop.f32.mrb[20].mxu1  ;;  %v8181_v8 = vld [vmem:[#allocation15_spill] sm:$0xff] }
 0x54c   :  { %v4080_v43 = vadd.f32 %v5909_v60, %v7829_v32  ;;  %v4004_v50 = vpop.f32.mrb[21].mxu1  ;;  %v8182_v24 = vpack.c.bf16 %v8180_v35, %v8181_v8  ;;  %v8186_v60 = vld [vmem:[#allocation21_spill] sm:$0xff] }
 0x54d   :  { %v4078_v4 = vadd.f32 %v7829_v32, %v4004_v50  ;;  %v5910_v55 = vpop.f32.mrb[22].mxu1  ;;  %5927 = vmatprep.mubr.msk.bf16.mxu0 %vm1377_vm4, %v4106_v61 }
 0x54e   :  { %v4081_v40 = vadd.f32 %v5910_v55, %v7829_v32  ;;  %v4007_v3 = vpop.f32.mrb[23].mxu1  ;;  %5928 = vmatmul.mubr.msk.bf16.vlgmr.msra.gmra.mrb[48].mxu0 %vm1377_vm4, %v4107_v28  ;;  %v4096_v21 = vmax.f32 %v4080_v43, 0.0  ;;  %v8184_v28 = vld [vmem:[#allocation20_spill] sm:$0xff]  ;;  %v8187_v43 = vld [vmem:[#allocation19_spill] sm:$0xff]  ;;  %v6289_v55 = vld [vmem:[%s8092_s13] sm:$0xff]  }
 0x54f   :  { %v4079_v44 = vadd.f32 %v7829_v32, %v4007_v3  ;;  %5944 = vmatpush3.bf16.msra.mxu0 %v8167_v17  ;;  %v4094_v53 = vmax.f32 %v4078_v4, 0.0  ;;  %v8188_v50 = vpack.c.bf16 %v8186_v60, %v8187_v43  ;;  %v4575_v4 = vld [vmem:[%s8091_s12] sm:$0xf] }
 0x550   :  { %v4097_v54 = vmax.f32 %v4081_v40, 0.0  ;;  %5945 = vmatprep.subr.bf16.mxu0 %v8164_v2  ;;  %v6290_v40 = vld [vmem:[%s8092_s13 + $0x8] sm:$0xff]   ;;  %v7905_v3 = vld [vmem:[%s8090_s11] ss:$0 sm:$0xff] }
 0x551   :  { %v4095_v5 = vmax.f32 %v4079_v44, 0.0 }
 0x552   :  { %v4109_v46 = vpack.c.bf16 %v4097_v54, %v4096_v21 }
 0x553   :  { %v4108_v49 = vpack.c.bf16 %v4095_v5, %v4094_v53  ;;  %5946 = vmatpush3.bf16.msra.mxu0 %v8170_v59  ;;  %v5913_v62 = vpop.f32.mrb[24].mxu1 }
 0x554   :  { %v4084_v18 = vadd.f32 %v5913_v62, %v7829_v32  ;;  %v4020_v19 = vpop.f32.mrb[25].mxu1  ;;  %5947 = vmatprep.subr.bf16.mxu0 %v8164_v2 }
 0x555   :  { %v4082_v11 = vadd.f32 %v7829_v32, %v4020_v19  ;;  %v5914_v31 = vpop.f32.mrb[26].mxu1  ;;  %5931 = vmatprep.mubr.msk.bf16.mxu0 %vm1377_vm4, %v4108_v49 }
 0x556   :  { %v4085_v37 = vadd.f32 %v5914_v31, %v7829_v32  ;;  %v4023_v36 = vpop.f32.mrb[27].mxu1  ;;  %5932 = vmatmul.mubr.msk.bf16.gmra.mrb[52].mxu0 %vm1377_vm4, %v4109_v46  ;;  %v4100_v23 = vmax.f32 %v4084_v18, 0.0 }
 0x557   :  { %v4083_v34 = vadd.f32 %v7829_v32, %v4023_v36  ;;  %5948 = vmatpush3.bf16.msra.mxu0 %v8173_v7  ;;  %v4098_v9 = vmax.f32 %v4082_v11, 0.0 }
 0x558   :  { %v4101_v27 = vmax.f32 %v4085_v37, 0.0  ;;  %5949 = vmatprep.subr.bf16.mxu0 %v8164_v2 }
 0x559   :  { %v4099_v15 = vmax.f32 %v4083_v34, 0.0 }
 0x55a   :  { %v4111_v48 = vpack.c.bf16 %v4101_v27, %v4100_v23 }
 0x55b   :  { %v4110_v13 = vpack.c.bf16 %v4099_v15, %v4098_v9  ;;  %5950 = vmatpush3.bf16.msra.mxu0 %v8176_v47  ;;  %v5917_v6 = vpop.f32.mrb[28].mxu1 }
 0x55c   :  { %v4088_v58 = vadd.f32 %v5917_v6, %v7829_v32  ;;  %v4036_v16 = vpop.f32.mrb[29].mxu1  ;;  %5951 = vmatprep.subr.bf16.mxu0 %v8164_v2 }
 0x55d   :  { %v4086_v45 = vadd.f32 %v7829_v32, %v4036_v16  ;;  %v5918_v22 = vpop.f32.mrb[30].mxu1  ;;  %5935 = vmatprep.mubr.msk.bf16.mxu0 %vm1377_vm4, %v4110_v13 }
 0x55e   :  { %v4089_v56 = vadd.f32 %v5918_v22, %v7829_v32  ;;  %v4039_v10 = vpop.f32.mrb[31].mxu1  ;;  %5936 = vmatmul.mubr.msk.bf16.gmra.mrb[56].mxu0 %vm1377_vm4, %v4111_v48  ;;  %v4104_v51 = vmax.f32 %v4088_v58, 0.0 }
 0x55f   :  { %v4087_v29 = vadd.f32 %v7829_v32, %v4039_v10  ;;  %5952 = vmatpush3.bf16.msra.mxu0 %v8179_v30  ;;  %v4102_v25 = vmax.f32 %v4086_v45, 0.0  ;;  %v8183_v32 = vld [vmem:[#allocation22_spill] sm:$0xff] }
 0x560   :  { %v4105_v41 = vmax.f32 %v4089_v56, 0.0  ;;  %5953 = vmatprep.subr.bf16.mxu0 %v8164_v2  ;;  %v8185_v61 = vpack.c.bf16 %v8183_v32, %v8184_v28 }
 0x561   :  { %v4103_v20 = vmax.f32 %v4087_v29, 0.0 }
 0x562   :  { %v4113_v0 = vpack.c.bf16 %v4105_v41, %v4104_v51 }
 0x563   :  { %v4112_v39 = vpack.c.bf16 %v4103_v20, %v4102_v25  ;;  %5954 = vmatpush3.bf16.msra.mxu0 %v8182_v24 }
 0x564   :  { %5955 = vmatprep.subr.bf16.mxu0 %v8164_v2 }
 0x565   :  { %5939 = vmatprep.mubr.msk.bf16.mxu0 %vm1377_vm4, %v4112_v39 }
 0x566   :  { %5940 = vmatmul.mubr.msk.bf16.gmra.mrb[60].mxu0 %vm1377_vm4, %v4113_v0 }
 0x567   :  { %5956 = vmatpush3.bf16.msra.mxu0 %v8185_v61  ;;  %5959 = vmatprep.mubr.msk.bf16.mxu0 %vm6382_vm8, %v8164_v2 }
 0x568   :  { %5957 = vmatprep.subr.bf16.mxu0 %v8164_v2 }
 0x56b   :  { %5958 = vmatpush3.bf16.msra.mxu0 %v8188_v50 }
 0x56c   :  { %5963 = vmatprep.subr.bf16.mxu0 %v8164_v2 }
 0x56e   :  { %5960 = vmatmul.mubr.bf16.vlgmr.msra.gmra.mrb[64].mxu0 %v4575_v4 }
 0x56f   :  { %5967 = vmatprep.mubr.msk.bf16.mxu0 %vm6382_vm8, %v8164_v2  ;;  %5964 = vmatpush3.bf16.msra.mxu0 %v6289_v55 }
 0x570   :  { %5965 = vmatprep.subr.bf16.mxu0 %v8164_v2 }
 0x573   :  { %5966 = vmatpush3.bf16.msra.mxu0 %v6290_v40 }
 0x574   :  { %5971 = vmatprep.subr.bf16.mxu0 %v8164_v2 }
 0x621   :  { %v5929_v44 = vpop.f32.mrb[48].mxu0 }
 0x622   :  { %v4220_v1 = vadd.f32 %v5929_v44, %v7905_v3  ;;  %v4211_v26 = vpop.f32.mrb[49].mxu0 }
 0x623   :  { %v4212_v17 = vadd.f32 %v7905_v3, %v4211_v26  ;;  %v5930_v21 = vpop.f32.mrb[50].mxu0 }
 0x624   :  { %4277 = vst.msk [vmem:[%s8096_s17 + $0x10] sm:$0xff] %vm4274_vm9, %v4220_v1  ;;  %v5249_v54 = vmul.f32 -1.442695, %v4220_v1  ;;  %v4223_v53 = vadd.f32 %v5930_v21, %v7905_v3  ;;  %v4214_v5 = vpop.f32.mrb[51].mxu0 }
 0x625   :  { %4275 = vst.msk [vmem:[%s8096_s17] sm:$0xff] %vm4274_vm9, %v4212_v17  ;;  %v5247_v46 = vmul.f32 -1.442695, %v4212_v17  ;;  %v4215_v49 = vadd.f32 %v7905_v3, %v4214_v5 }
 0x626   :  { %6293 = vpow2.f32 %v5249_v54  ;;  %4278 = vst.msk [vmem:[%s8096_s17 + $0x18] sm:$0xff] %vm4274_vm9, %v4223_v53  ;;  %v5250_v52 = vmul.f32 -1.442695, %v4223_v53 }
 0x627   :  { %6295 = vpow2.f32 %v5247_v46  ;;  %4276 = vst.msk [vmem:[%s8096_s17 + $0x8] sm:$0xff] %vm4274_vm9, %v4215_v49  ;;  %v5248_v57 = vmul.f32 -1.442695, %v4215_v49 }
 0x628   :  { %6297 = vpow2.f32 %v5250_v52 }
 0x629   :  { %6299 = vpow2.f32 %v5248_v57  ;;  %v5933_v59 = vpop.f32.mrb[52].mxu0 }
 0x62a   :  { %v4236_v62 = vadd.f32 %v5933_v59, %v7905_v3  ;;  %v4227_v18 = vpop.f32.mrb[53].mxu0 }
 0x62b   :  { %v4228_v19 = vadd.f32 %v7905_v3, %v4227_v18  ;;  %v5934_v11 = vpop.f32.mrb[54].mxu0 }
 0x62c   :  { %4281 = vst.msk [vmem:[%s8096_s17 + $0x30] sm:$0xff] %vm4274_vm9, %v4236_v62  ;;  %v5253_v31 = vmul.f32 -1.442695, %v4236_v62  ;;  %v4239_v37 = vadd.f32 %v5934_v11, %v7905_v3  ;;  %v4230_v36 = vpop.f32.mrb[55].mxu0 }
 0x62d   :  { %4279 = vst.msk [vmem:[%s8096_s17 + $0x20] sm:$0xff] %vm4274_vm9, %v4228_v19  ;;  %v5251_v34 = vmul.f32 -1.442695, %v4228_v19  ;;  %v4231_v12 = vadd.f32 %v7905_v3, %v4230_v36 }
 0x62e   :  { %6301 = vpow2.f32 %v5253_v31  ;;  %4282 = vst.msk [vmem:[%s8096_s17 + $0x38] sm:$0xff] %vm4274_vm9, %v4239_v37  ;;  %v5254_v38 = vmul.f32 -1.442695, %v4239_v37 }
 0x62f   :  { %6303 = vpow2.f32 %v5251_v34  ;;  %4280 = vst.msk [vmem:[%s8096_s17 + $0x28] sm:$0xff] %vm4274_vm9, %v4231_v12  ;;  %v5252_v7 = vmul.f32 -1.442695, %v4231_v12 }
 0x630   :  { %v6294_v23 = vpop.eup %6293  ;;  %6305 = vpow2.f32 %v5254_v38 }
 0x631   :  { %v6296_v27 = vpop.eup %6295  ;;  %v4341_v9 = vadd.f32 1.0, %v6294_v23  ;;  %6307 = vpow2.f32 %v5252_v7  ;;  %v5937_v15 = vpop.f32.mrb[56].mxu0 }
 0x632   :  { %v6298_v48 = vpop.eup %6297  ;;  %v4339_v13 = vadd.f32 1.0, %v6296_v27  ;;  %v4252_v63 = vadd.f32 %v5937_v15, %v7905_v3  ;;  %v4243_v42 = vpop.f32.mrb[57].mxu0 }
 0x633   :  { %v6300_v47 = vpop.eup %6299  ;;  %6309 = vrcp.f32 %v4341_v9  ;;  %v4342_v6 = vadd.f32 1.0, %v6298_v48  ;;  %v4244_v58 = vadd.f32 %v7905_v3, %v4243_v42  ;;  %v5938_v16 = vpop.f32.mrb[58].mxu0 }
 0x634   :  { %6311 = vrcp.f32 %v4339_v13  ;;  %v4340_v45 = vadd.f32 1.0, %v6300_v47  ;;  %4285 = vst.msk [vmem:[%s8096_s17 + $0x50] sm:$0xff] %vm4274_vm9, %v4252_v63  ;;  %v5257_v22 = vmul.f32 -1.442695, %v4252_v63  ;;  %v4255_v56 = vadd.f32 %v5938_v16, %v7905_v3  ;;  %v4246_v10 = vpop.f32.mrb[59].mxu0 }
 0x635   :  { %6313 = vrcp.f32 %v4342_v6  ;;  %4283 = vst.msk [vmem:[%s8096_s17 + $0x40] sm:$0xff] %vm4274_vm9, %v4244_v58  ;;  %v5255_v29 = vmul.f32 -1.442695, %v4244_v58  ;;  %v4247_v33 = vadd.f32 %v7905_v3, %v4246_v10 }
 0x636   :  { %6315 = vrcp.f32 %v4340_v45  ;;  %4286 = vst.msk [vmem:[%s8096_s17 + $0x58] sm:$0xff] %vm4274_vm9, %v4255_v56  ;;  %v5258_v14 = vmul.f32 -1.442695, %v4255_v56 }
 0x637   :  { %6317 = vpow2.f32 %v5257_v22  ;;  %4284 = vst.msk [vmem:[%s8096_s17 + $0x48] sm:$0xff] %vm4274_vm9, %v4247_v33  ;;  %v5256_v30 = vmul.f32 -1.442695, %v4247_v33 }
 0x638   :  { %v6302_v51 = vpop.eup %6301  ;;  %6319 = vpow2.f32 %v5255_v29 }
 0x639   :  { %v6304_v41 = vpop.eup %6303  ;;  %v4345_v25 = vadd.f32 1.0, %v6302_v51  ;;  %6321 = vpow2.f32 %v5258_v14  ;;  %v5941_v20 = vpop.f32.mrb[60].mxu0 }
 0x63a   :  { %v6306_v0 = vpop.eup %6305  ;;  %v4343_v39 = vadd.f32 1.0, %v6304_v41  ;;  %6323 = vpow2.f32 %v5256_v30  ;;  %v4268_v35 = vadd.f32 %v5941_v20, %v7905_v3  ;;  %v4259_v8 = vpop.f32.mrb[61].mxu0 }
 0x63b   :  { %v6308_v24 = vpop.eup %6307  ;;  %6325 = vrcp.f32 %v4345_v25  ;;  %v4346_v32 = vadd.f32 1.0, %v6306_v0  ;;  %v4260_v28 = vadd.f32 %v7905_v3, %v4259_v8  ;;  %v5942_v61 = vpop.f32.mrb[62].mxu0 }
 0x63c   :  { %6327 = vrcp.f32 %v4343_v39  ;;  %v4344_v60 = vadd.f32 1.0, %v6308_v24  ;;  %4289 = vst.msk [vmem:[%s8096_s17 + $0x70] sm:$0xff] %vm4274_vm9, %v4268_v35  ;;  %v5261_v43 = vmul.f32 -1.442695, %v4268_v35  ;;  %v4271_v50 = vadd.f32 %v5942_v61, %v7905_v3  ;;  %v4262_v4 = vpop.f32.mrb[63].mxu0 }
 0x63d   :  { %v6310_v55 = vpop.eup %6309  ;;  %6329 = vrcp.f32 %v4346_v32  ;;  %4287 = vst.msk [vmem:[%s8096_s17 + $0x60] sm:$0xff] %vm4274_vm9, %v4260_v28  ;;  %v5259_v40 = vmul.f32 -1.442695, %v4260_v28  ;;  %v4263_v44 = vadd.f32 %v7905_v3, %v4262_v4 }
 0x63e   :  { %v6312_v1 = vpop.eup %6311  ;;  %v4401_v26 = vsel %vm4274_vm9, %v6310_v55, 0.0  ;;  %6331 = vrcp.f32 %v4344_v60  ;;  %4290 = vst.msk [vmem:[%s8096_s17 + $0x78] sm:$0xff] %vm4274_vm9, %v4271_v50  ;;  %v5262_v17 = vmul.f32 -1.442695, %v4271_v50 }
 0x63f   :  { %v6314_v21 = vpop.eup %6313  ;;  %v4402_v54 = vrot.slane %v4401_v26, 4  ;;  %v4387_v53 = vsel %vm4274_vm9, %v6312_v1, 0.0  ;;  %6333 = vpow2.f32 %v5261_v43  ;;  %4288 = vst.msk [vmem:[%s8096_s17 + $0x68] sm:$0xff] %vm4274_vm9, %v4263_v44  ;;  %v5260_v3 = vmul.f32 -1.442695, %v4263_v44 }
 0x640   :  { %v6316_v5 = vpop.eup %6315  ;;  %v4388_v46 = vrot.slane %v4387_v53, 4  ;;  %v4408_v49 = vsel %vm4274_vm9, %v6314_v21, 0.0  ;;  %6335 = vpow2.f32 %v5259_v40 }
 0x641   :  { %v6318_v52 = vpop.eup %6317  ;;  %v4403_v57 = vadd.f32 %v4402_v54, %v4401_v26  ;;  %v4409_v59 = vrot.slane %v4408_v49, 4  ;;  %v4394_v62 = vsel %vm4274_vm9, %v6316_v5, 0.0  ;;  %6337 = vpow2.f32 %v5262_v17  ;;  %v7991_v18 = vpop.f32.mrb[64].mxu0 }
 0x642   :  { %v6320_v19 = vpop.eup %6319  ;;  %v4389_v11 = vadd.f32 %v4388_v46, %v4387_v53  ;;  %v4395_v31 = vrot.slane %v4394_v62, 4  ;;  %v4557_v37 = vadd.f32 %v4394_v62, %v4387_v53  ;;  %v4349_v36 = vadd.f32 1.0, %v6318_v52  ;;  %v5961_v34 = vpop.f32.mrb[65].mxu0 }
 0x643   :  { %v6322_v12 = vpop.eup %6321  ;;  %v4404_v38 = vrot.slane %v4403_v57, 2  ;;  %v4410_v7 = vadd.f32 %v4409_v59, %v4408_v49  ;;  %v4347_v23 = vadd.f32 1.0, %v6320_v19  ;;  %6339 = vpow2.f32 %v5260_v3  ;;  %v4613_v27 = vpop.f32.mrb[66].mxu0 }
 0x644   :  { %v7993_v9 = vpop.eup %6323  ;;  %v4390_v15 = vrot.slane %v4389_v11, 2  ;;  %v4396_v48 = vadd.f32 %v4395_v31, %v4394_v62  ;;  %v4558_v13 = vadd.f32 %v4557_v37, %v4401_v26  ;;  %6341 = vrcp.f32 %v4349_v36  ;;  %v5962_v63 = vpop.f32.mrb[67].mxu0 }
 0x645   :  { %v6326_v42 = vpop.eup %6325  ;;  %v4405_v47 = vadd.f32 %v4404_v38, %v4403_v57  ;;  %v4411_v6 = vrot.slane %v4410_v7, 2  ;;  %6343 = vrcp.f32 %v4347_v23  ;;  %v4350_v32 = vadd.f32 1.0, %v6322_v12 }
 0x646   :  { %v6328_v58 = vpop.eup %6327  ;;  %v4391_v16 = vadd.f32 %v4390_v15, %v4389_v11  ;;  %v4397_v45 = vrot.slane %v4396_v48, 2  ;;  %v4429_v22 = vsel %vm4274_vm9, %v6326_v42, 0.0  ;;  %v4559_v56 = vadd.f32 %v4558_v13, %v4408_v49 }
 0x647   :  { %v6330_v10 = vpop.eup %6329  ;;  %v4406_v29 = vrot.slane %v4405_v47, 1  ;;  %v4412_v33 = vadd.f32 %v4411_v6, %v4410_v7  ;;  %v4430_v14 = vrot.slane %v4429_v22, 4  ;;  %v4415_v30 = vsel %vm4274_vm9, %v6328_v58, 0.0 }
 0x648   :  { %v6332_v51 = vpop.eup %6331  ;;  %v4392_v41 = vrot.slane %v4391_v16, 1  ;;  %v4398_v25 = vadd.f32 %v4397_v45, %v4396_v48  ;;  %v4416_v20 = vrot.slane %v4415_v30, 4  ;;  %v4560_v0 = vadd.f32 %v4559_v56, %v4415_v30 }
 0x649   :  { %v6334_v39 = vpop.eup %6333  ;;  %v4413_v35 = vrot.slane %v4412_v33, 1  ;;  %v4431_v8 = vadd.f32 %v4430_v14, %v4429_v22  ;;  %v4436_v24 = vsel %vm4274_vm9, %v6330_v10, 0.0  ;;  %v4407_v55 = vadd.f32 %v4406_v29, %v4405_v47 }
 0x64a   :  { %v6336_v28 = vpop.eup %6335  ;;  %v4393_v61 = vadd.f32 %v4392_v41, %v4391_v16  ;;  %v4399_v60 = vrot.slane %v4398_v25, 1  ;;  %v4417_v43 = vadd.f32 %v4416_v20, %v4415_v30  ;;  %v4437_v50 = vrot.slane %v4436_v24, 4 }
 0x64b   :  { %v6338_v4 = vpop.eup %6337  ;;  %v4432_v40 = vrot.slane %v4431_v8, 2  ;;  %v4422_v44 = vsel %vm4274_vm9, %v6332_v51, 0.0  ;;  %v4414_v1 = vadd.f32 %v4413_v35, %v4412_v33  ;;  %6345 = vrcp.f32 %v4350_v32 }
 0x64c   :  { %v4400_v26 = vadd.f32 %v4399_v60, %v4398_v25  ;;  %v4418_v17 = vrot.slane %v4417_v43, 2  ;;  %v4438_v21 = vadd.f32 %v4437_v50, %v4436_v24  ;;  %v4500_v53 = vmul.f32 0.125, %v4393_v61 }
 0x64d   :  { %v6340_v54 = vpop.eup %6339  ;;  %v4433_v3 = vadd.f32 %v4432_v40, %v4431_v8  ;;  %v4423_v5 = vrot.slane %v4422_v44, 4  ;;  %v4561_v46 = vadd.f32 %v4560_v0, %v4422_v44  ;;  %v4502_v19 = vmul.f32 0.125, %v4407_v55 }
 0x64e   :  { %v6342_v49 = vpop.eup %6341  ;;  %v4501_v52 = vmul.f32 0.125, %v4400_v26  ;;  %v4419_v57 = vadd.f32 %v4418_v17, %v4417_v43  ;;  %v4439_v59 = vrot.slane %v4438_v21, 2  ;;  %v4503_v37 = vmul.f32 0.125, %v4414_v1 }
 0x64f   :  { %v6344_v62 = vpop.eup %6343  ;;  %v4424_v11 = vadd.f32 %v4423_v5, %v4422_v44  ;;  %v4562_v31 = vadd.f32 %v4561_v46, %v4429_v22  ;;  %v4434_v27 = vrot.slane %v4433_v3, 1  ;;  %v4457_v58 = vsel %vm4274_vm9, %v6342_v49, 0.0 }
 0x650   :  { %v4533_v36 = vsel %vm4532_vm10, %v4501_v52, %v4500_v53  ;;  %v4420_v34 = vrot.slane %v4419_v57, 1  ;;  %v4440_v12 = vadd.f32 %v4439_v59, %v4438_v21  ;;  %v4443_v47 = vsel %vm4274_vm9, %v6344_v62, 0.0 }
 0x651   :  { %v4535_v38 = vsel %vm4534_vm11, %v4502_v19, %v4533_v36  ;;  %v4425_v7 = vrot.slane %v4424_v11, 2  ;;  %v4563_v23 = vadd.f32 %v4562_v31, %v4436_v24  ;;  %v4348_v45 = vadd.f32 1.0, %v7993_v9 }
 0x652   :  { %v4421_v15 = vadd.f32 %v4420_v34, %v4419_v57  ;;  %v4537_v48 = vsel %vm4536_vm12, %v4503_v37, %v4535_v38  ;;  %v4441_v13 = vrot.slane %v4440_v12, 1  ;;  %v4353_v22 = vadd.f32 1.0, %v6334_v39 }
 0x653   :  { %v4426_v63 = vadd.f32 %v4425_v7, %v4424_v11  ;;  %v4571_v42 = vmul.f32 0.125, %v4563_v23  ;;  %v4351_v56 = vadd.f32 1.0, %v6336_v28  ;;  %v4435_v10 = vadd.f32 %v4434_v27, %v4433_v3 }
 0x654   :  { %v4504_v6 = vmul.f32 0.125, %v4421_v15  ;;  %v4442_v33 = vadd.f32 %v4441_v13, %v4440_v12  ;;  %v4444_v14 = vrot.slane %v4443_v47, 4  ;;  %6347 = vrcp.f32 %v4348_v45 }
 0x655   :  { %v4427_v16 = vrot.slane %v4426_v63, 1  ;;  %4573 = vst.msk [vmem:[%s8098_s19] sm:$0xff] %vm4274_vm9, %v4571_v42  ;;  %v4354_v51 = vadd.f32 1.0, %v6338_v4  ;;  %v4352_v41 = vadd.f32 1.0, %v6340_v54  ;;  %v6346_v25 = vpop.eup %6345  ;;  %v4458_v20 = vrot.slane %v4457_v58, 4 }
 0x656   :  { %v4539_v29 = vsel %vm4538_vm13, %v4504_v6, %v4537_v48  ;;  %6349 = vrcp.f32 %v4353_v22  ;;  %v4616_v0 = vpack.c.bf16 %v7991_v18, %v7991_v18  ;;  %v4464_v9 = vsel %vm4274_vm9, %v6346_v25, 0.0 }
 0x657   :  { %v4428_v30 = vadd.f32 %v4427_v16, %v4426_v63  ;;  %6351 = vrcp.f32 %v4351_v56  ;;  %v4506_v39 = vmul.f32 0.125, %v4435_v10  ;;  %v4445_v8 = vadd.f32 %v4444_v14, %v4443_v47 }
 0x658   :  { %v4465_v24 = vrot.slane %v4464_v9, 4  ;;  %6353 = vrcp.f32 %v4354_v51  ;;  %5968 = vmatmul.mubr.msk.bf16.vlgmr.msra.gmra.mrb[68].mxu0 %vm2245_vm6, %v4616_v0  ;;  %v4507_v32 = vmul.f32 0.125, %v4442_v33  ;;  %v4459_v61 = vadd.f32 %v4458_v20, %v4457_v58 }
 0x659   :  { %v4505_v35 = vmul.f32 0.125, %v4428_v30  ;;  %6355 = vrcp.f32 %v4352_v41  ;;  %5975 = vmatprep.mubr.msk.bf16.mxu0 %vm6382_vm8, %v8164_v2  ;;  %v4446_v50 = vrot.slane %v4445_v8, 2 }
 0x65a   :  { %v4466_v60 = vadd.f32 %v4465_v24, %v4464_v9  ;;  %v4460_v4 = vrot.slane %v4459_v61, 2 }
 0x65b   :  { %v4541_v28 = vsel %vm4540_vm14, %v4505_v35, %v4539_v29  ;;  %v4447_v1 = vadd.f32 %v4446_v50, %v4445_v8 }
 0x65c   :  { %v4543_v18 = vsel %vm4542_vm15, %v4506_v39, %v4541_v28  ;;  %v4467_v55 = vrot.slane %v4466_v60, 2  ;;  %v4461_v5 = vadd.f32 %v4460_v4, %v4459_v61 }
 0x65d   :  { %v4545_v43 = vsel %vm4544_vm0, %v4507_v32, %v4543_v18  ;;  %v4448_v31 = vrot.slane %v4447_v1, 1 }
 0x65e   :  { %4555 = vst.msk [vmem:[%s8097_s18] sm:$0xff] %vm4274_vm9, %v4545_v43  ;;  %v6348_v40 = vpop.eup %6347  ;;  %v4468_v46 = vadd.f32 %v4467_v55, %v4466_v60  ;;  %v4462_v27 = vrot.slane %v4461_v5, 1 }
 0x65f   :  { %v4450_v26 = vsel %vm4274_vm9, %v6348_v40, 0.0 }
 0x660   :  { %v6350_v44 = vpop.eup %6349  ;;  %v4451_v21 = vrot.slane %v4450_v26, 4  ;;  %v4564_v54 = vadd.f32 %v4450_v26, %v4443_v47  ;;  %v4469_v15 = vrot.slane %v4468_v46, 1  ;;  %v4463_v33 = vadd.f32 %v4462_v27, %v4461_v5  ;;  %v6291_v5 = vld [vmem:[%s8094_s15] sm:$0xff]  }
 0x661   :  { %v6352_v17 = vpop.eup %6351  ;;  %v4485_v53 = vsel %vm4274_vm9, %v6350_v44, 0.0  ;;  %5972 = vmatpush3.bf16.msra.mxu0 %v6291_v5 }
 0x662   :  { %v6354_v3 = vpop.eup %6353  ;;  %v4486_v49 = vrot.slane %v4485_v53, 4  ;;  %v4471_v52 = vsel %vm4274_vm9, %v6352_v17, 0.0  ;;  %v4452_v59 = vadd.f32 %v4451_v21, %v4450_v26  ;;  %v4565_v62 = vadd.f32 %v4564_v54, %v4457_v58  ;;  %5973 = vmatprep.subr.bf16.mxu0 %v8164_v2 }
 0x663   :  { %v6356_v57 = vpop.eup %6355  ;;  %v4472_v19 = vrot.slane %v4471_v52, 4  ;;  %v4492_v11 = vsel %vm4274_vm9, %v6354_v3, 0.0  ;;  %v4449_v58 = vadd.f32 %v4448_v31, %v4447_v1  ;;  %v4470_v14 = vadd.f32 %v4469_v15, %v4468_v46  ;;  %v6292_v46 = vld [vmem:[%s8094_s15 + $0x8] sm:$0xff]  }
 0x664   :  { %v4487_v37 = vadd.f32 %v4486_v49, %v4485_v53  ;;  %v4493_v36 = vrot.slane %v4492_v11, 4  ;;  %v4478_v34 = vsel %vm4274_vm9, %v6356_v57, 0.0  ;;  %v4453_v12 = vrot.slane %v4452_v59, 2  ;;  %v5263_v49 = vld [vmem:[%s8093_s14] ss:$0 sm:$0xff]  ;;  %s6383_s14 = smov 96  }
 0x665   :  { %v4473_v38 = vadd.f32 %v4472_v19, %v4471_v52  ;;  %v4566_v7 = vadd.f32 %v4565_v62, %v4464_v9  ;;  %v4479_v23 = vrot.slane %v4478_v34, 4  ;;  %v4508_v35 = vmul.f32 0.125, %v4449_v58  ;;  %5974 = vmatpush3.bf16.msra.mxu0 %v6292_v46 }
 0x666   :  { %v4488_v48 = vrot.slane %v4487_v37, 2  ;;  %v4494_v13 = vadd.f32 %v4493_v36, %v4492_v11  ;;  %v4454_v63 = vadd.f32 %v4453_v12, %v4452_v59  ;;  %v4510_v28 = vmul.f32 0.125, %v4463_v33  ;;  %5979 = vmatprep.subr.bf16.mxu0 %v8164_v2 }
 0x667   :  { %v4474_v42 = vrot.slane %v4473_v38, 2  ;;  %v4567_v47 = vadd.f32 %v4566_v7, %v4471_v52  ;;  %v4480_v6 = vadd.f32 %v4479_v23, %v4478_v34  ;;  %v4511_v18 = vmul.f32 0.125, %v4470_v14 }
 0x668   :  { %v4489_v16 = vadd.f32 %v4488_v48, %v4487_v37  ;;  %v4495_v45 = vrot.slane %v4494_v13, 2  ;;  %v4455_v22 = vrot.slane %v4454_v63, 1  ;;  %v5267_v37 = vld [vmem:[%s8095_s16] ss:$0 sm:$0xff]  ;;  %s6384_s16 = smov [#allocation4]  }
 0x669   :  { %v4475_v56 = vadd.f32 %v4474_v42, %v4473_v38  ;;  %v4481_v10 = vrot.slane %v4480_v6, 2  ;;  %v4568_v29 = vadd.f32 %v4567_v47, %v4478_v34  ;;  %s4867_s26 = sshll.u32 %s6384_s16, 4  ;;  %s4868_s26 = int_to_ptr.vmem [resolvable:$true] %s4867_s26 }
 0x66a   :  { %v4490_v30 = vrot.slane %v4489_v16, 1  ;;  %v4496_v51 = vadd.f32 %v4495_v45, %v4494_v13  ;;  %v4456_v41 = vadd.f32 %v4455_v22, %v4454_v63  ;;  %s6357_s6 = scalar_lea.vmem %s4868_s26, 128  ;;  %p6362_p1 = scmp.lt.s32.totalorder %s4868_s26, %s4868_s26 }
 0x66b   :  { %v4476_v25 = vrot.slane %v4475_v56, 1  ;;  %v4482_v20 = vadd.f32 %v4481_v10, %v4480_v6  ;;  %v4569_v0 = vadd.f32 %v4568_v29, %v4485_v53  ;;  %p6358_p0 = scmp.ne.s32.totalorder %s4868_s26, %s6357_s6  ;;  %p6363_p2 = scmp.lt.s32.totalorder %s6357_s6, %s6357_s6 }
 0x66c   :  { %v4497_v9 = vrot.slane %v4496_v51, 1  ;;  %v4509_v39 = vmul.f32 0.125, %v4456_v41  ;;  %v4491_v61 = vadd.f32 %v4490_v30, %v4489_v16 }
 0x66d   :  { %v4477_v8 = vadd.f32 %v4476_v25, %v4475_v56  ;;  %v4483_v24 = vrot.slane %v4482_v20, 1  ;;  %v4570_v32 = vadd.f32 %v4569_v0, %v4492_v11  ;;  %p6364_p3 = por %p6363_p2, %p6362_p1 }
 0x66e   :  { %v4498_v60 = vadd.f32 %v4497_v9, %v4496_v51  ;;  %v4546_v43 = vsel %vm4532_vm10, %v4509_v39, %v4508_v35  ;;  %v4514_v26 = vmul.f32 0.125, %v4491_v61 }
 0x66f   :  { %v4512_v50 = vmul.f32 0.125, %v4477_v8  ;;  %v4484_v4 = vadd.f32 %v4483_v24, %v4482_v20  ;;  %v4572_v55 = vmul.f32 0.125, %v4570_v32  ;;  %v4547_v40 = vsel %vm4534_vm11, %v4510_v28, %v4546_v43  ;;  %p6365_p4 = pnand %p6364_p3, %p6358_p0 }
 0x670   :  { %v4548_v44 = vsel %vm4536_vm12, %v4511_v18, %v4547_v40  ;;  %v4515_v21 = vmul.f32 0.125, %v4498_v60 }
 0x671   :  { %v4513_v1 = vmul.f32 0.125, %v4484_v4  ;;  %4574 = vst.msk [vmem:[%s8098_s19 + $0x8] sm:$0xff] %vm4274_vm9, %v4572_v55  ;;  %v4549_v17 = vsel %vm4538_vm13, %v4512_v50, %v4548_v44 }
 0x673   :  { %v4550_v54 = vsel %vm4540_vm14, %v4513_v1, %v4549_v17 }
 0x674   :  { %v4551_v53 = vsel %vm4542_vm15, %v4514_v26, %v4550_v54 }
 0x675   :  { %v4552_v3 = vsel %vm4544_vm0, %v4515_v21, %v4551_v53 }
 0x676   :  { %4556 = vst.msk [vmem:[%s8097_s18 + $0x8] sm:$0xff] %vm4274_vm9, %v4552_v3 }
 0x72b   :  { %v4677_v52 = vpop.f32.mrb[68].mxu0 }
 0x72c   :  { %v4678_v57 = vadd.f32 %v5263_v49, %v4677_v52  ;;  %v5969_v59 = vpop.f32.mrb[69].mxu0 }
 0x72d   :  { %v4680_v62 = vpop.f32.mrb[70].mxu0 }
 0x72e   :  { %v4683_v19 = vmax.f32 %v4678_v57, 0.0  ;;  %v5970_v11 = vpop.f32.mrb[71].mxu0 }
 0x730   :  { %v4684_v31 = vpack.c.bf16 %v4683_v19, %v4683_v19 }
 0x732   :  { %5976 = vmatmul.mubr.msk.bf16.vlgmr.msra.gmra.mrb[72].mxu0 %vm2245_vm6, %v4684_v31 }
 0x733   :  { %5981 = vmatprep.mubr.msk.bf16.mxu0 %vm6382_vm8, %v8164_v2 }
 0x805   :  { %v4745_v36 = vpop.f32.mrb[72].mxu0 }
 0x806   :  { %v4746_v34 = vadd.f32 %v5267_v37, %v4745_v36  ;;  %v5977_v12 = vpop.f32.mrb[73].mxu0 }
 0x807   :  { %v4748_v38 = vpop.f32.mrb[74].mxu0 }
 0x808   :  { %v4751_v7 = vpack.c.bf16 %v4746_v34, %v4746_v34  ;;  %v5978_v23 = vpop.f32.mrb[75].mxu0 }
 0x80a   :  { %4753 = vrot.lane.b32.xlu0 %v4751_v7, %s6383_s14  ;;  %v4804_v27 = vrot.slane %v4751_v7, 2 }
 0x80e   :  { %4805 = vrot.lane.b32.xlu0 %v4804_v27, %s6383_s14 }
 0x87c   :  { %v4754_v15 = vpop.permute.xlu0 %4753 }
 0x87d   :  { %v4759_v48 = vsel %vm2245_vm6, %v4754_v15, 0 }
 0x87e   :  { %5980 = vmatpush3.bf16.xpose.msra.mxu0 %v4759_v48 }
 0x87f   :  { %5985 = vmatprep.subr.bf16.mxu0 %v8164_v2 }
 0x880   :  { %v4806_v13 = vpop.permute.xlu0 %4805 }
 0x881   :  { %v4811_v63 = vsel %vm2245_vm6, %v4806_v13, 0 }
 0x885   :  { %5982 = vmatmul.mubr.msk.bf16.vlgmr.msra.gmra.mrb[76].mxu0 %vm2245_vm6, %v4751_v7 }
 0x886   :  { %5986 = vmatpush3.bf16.xpose.msra.mxu0 %v4811_v63  ;;  %5987 = vmatprep.mubr.msk.bf16.mxu0 %vm6382_vm8, %v8164_v2 }
 0x88d   :  { %5988 = vmatmul.mubr.msk.bf16.vlgmr.msra.gmra.mrb[80].mxu0 %vm2245_vm6, %v4804_v27 }
 0x958   :  { %v4795_v42 = vpop.f32.mrb[76].mxu0 }
 0x959   :  { %v4801_v47 = vmul.f32 0.17677669, %v4795_v42  ;;  %v5983_v6 = vpop.f32.mrb[77].mxu0 }
 0x95a   :  { %v4798_v58 = vpop.f32.mrb[78].mxu0 }
 0x95b   :  { %4803 = vst.msk [vmem:[#allocation4] sm:$0xf] %vm4802_vm1, %v4801_v47  ;;  %v5984_v16 = vpop.f32.mrb[79].mxu0 }
 0x960   :  { %v4847_v45 = vpop.f32.mrb[80].mxu0 }
 0x961   :  { %v4853_v22 = vmul.f32 0.17677669, %v4847_v45  ;;  %v5989_v56 = vpop.f32.mrb[81].mxu0 }
 0x962   :  { %v4850_v10 = vpop.f32.mrb[82].mxu0 }
 0x963   :  { %4855 = vst.msk [vmem:[#allocation4 + $0x4] sm:$0xf] %vm4802_vm1, %v4853_v22  ;;  %v5990_v29 = vpop.f32.mrb[83].mxu0 }
 0x964   :  { %6368 = shalt.err (!%p6365_p4)
}
 0x965   :  { %s6369_s5 = scalar_lea.hbm %s8099_s20, 128 }
 0x966   :  { %p6370_p5 = scmp.ne.s32.totalorder %s8099_s20, %s6369_s5  ;;  %p6373_p6 = scmp.lt.u32.totalorder %s6369_s5, %s8099_s20 }
 0x968   :  { %p6375_p7 = pnand %p6373_p6, %p6370_p5 }
 0x96a   :  { %6378 = shalt.err (!%p6375_p7)
}
 0x96b   :  { %s6385_s30 = smov 64   ;;  %s6386_s0 = smov 4  }
 0x96c   :  { %4873 = dma.vmem_to_hbm [thread:$0]  %s4868_s26, 128, %s8099_s20, [#allocation5], %s6385_s30, %s6385_s30, %s6386_s0  }
 0x96d   :  { %6379 = dma.done.wait [#allocation5], 128  }
 0x96e   :  { %6380 = vsyncadd [#allocation5], 4294967168 }
 0x96f   :  { %4883 = vsyncpa [#allocation5], 1 }

</bundles_post_ra>
